<compile_context>
chip_gen: v7x
topology: tpu7x:2x2x1
jax: 0.10.0
libtpu: 0.0.40
codegen_flags: <defaults>
</compile_context>

<pallas_src>
import functools

import jax
import jax.numpy as jnp
from jax.experimental import pallas as pl
from jax.experimental.pallas import tpu as pltpu


def _round_up(x, m):
    return (x + m - 1) // m * m


def _generator_kernel(x_ref, w1_ref, b1_ref, w2_ref, b2_ref, w3_ref, b3_ref,
                      o_ref):
    """Fused 3-layer MLP: tanh(relu(relu(x@W1+b1)@W2+b2)@W3+b3)."""
    cdt = w1_ref.dtype  # bf16 MXU operands; accumulate / elementwise in f32.

    # Layer 1: single K=32 contraction (noise++conditions concatenated in the
    # wrapper), rather than two lane-sparse K=16 dots.
    h1 = jnp.dot(x_ref[...].astype(cdt), w1_ref[...],
                 preferred_element_type=jnp.float32)
    # Bias add + ReLU in f32, then cast to bf16 right away so the f32 live
    # range ends here (halves spill/store pressure for the next matmul).
    h1 = jnp.maximum(h1 + b1_ref[...], 0.0).astype(cdt)

    # Layer 2.
    h2 = jnp.dot(h1, w2_ref[...], preferred_element_type=jnp.float32)
    h2 = jnp.maximum(h2 + b2_ref[...], 0.0).astype(cdt)

    # Layer 3 + Tanh (EUP).
    y = jnp.dot(h2, w3_ref[...], preferred_element_type=jnp.float32)
    o_ref[...] = jnp.tanh(y + b3_ref[...]).astype(o_ref.dtype)


def prepare_generator_params(params, compute_dtype=jnp.bfloat16):
    """One-time weight preprocessing, hoisted out of the per-call jit path.

    Casts matmul weights to the MXU compute dtype and zero-pads the last
    layer to a lane-dense multiple of 128 output columns (unmasked full-lane
    stores in the kernel).  Biases stay f32 for the elementwise path.
    Returns (prepared_params, output_dim).
    """
    w3, b3 = params["w3"], params["b3"]
    d_out = w3.shape[1]
    d_out_p = _round_up(d_out, 128)
    if d_out_p != d_out:
        w3 = jnp.pad(w3, ((0, 0), (0, d_out_p - d_out)))
        b3 = jnp.pad(b3, ((0, 0), (0, d_out_p - d_out)))
    prepared = {
        "w1": params["w1"].astype(compute_dtype),
        "b1": params["b1"].astype(jnp.float32),
        "w2": params["w2"].astype(compute_dtype),
        "b2": params["b2"].astype(jnp.float32),
        "w3": w3.astype(compute_dtype),
        "b3": b3.astype(jnp.float32),
    }
    return prepared, d_out


@functools.partial(jax.jit, static_argnames=("d_out", "block_b"))
def generator_forward(noise, conditions, prepared, d_out, block_b=512):
    """Pallas implementation of Generator.forward.

    noise:      (B, input_dim)      float32
    conditions: (B, condition_dim)  float32
    prepared:   output of prepare_generator_params (bf16 weights, padded W3).
    d_out:      true output dim (static); padded columns are sliced off.
    """
    B, nd = noise.shape
    _, cd = conditions.shape
    K = nd + cd

    w1, b1 = prepared["w1"], prepared["b1"]
    w2, b2 = prepared["w2"], prepared["b2"]
    w3, b3 = prepared["w3"], prepared["b3"]
    H1 = w1.shape[1]
    H2 = w2.shape[1]
    D_out_p = w3.shape[1]

    # Single (B, K) input: merging the two layer-1 dots is worth far more than
    # avoiding this tiny concat copy.
    x = jnp.concatenate([noise, conditions], axis=1)

    # Batch tile: MXU-row aligned, clamped for small batches (sublane x8).
    # block_b=512 keeps per-step compute well above the ~0.35 us step cost;
    # with B >= 2*block_b the "parallel" axis has >=2 steps for v7x's 2 TCs.
    bb = min(block_b, _round_up(B, 8))
    grid = (pl.cdiv(B, bb),)

    flops = 2 * B * (K * H1 + H1 * H2 + H2 * D_out_p)
    bytes_accessed = (
        x.size * 4
        + (w1.size + w2.size + w3.size) * 2        # bf16 weights
        + (b1.size + b2.size + b3.size) * 4
        + B * D_out_p * 4)
    cost = pl.CostEstimate(flops=flops, transcendentals=B * D_out_p,
                           bytes_accessed=bytes_accessed)

    out_padded = pl.pallas_call(
        _generator_kernel,
        out_shape=jax.ShapeDtypeStruct((B, D_out_p), noise.dtype),
        grid_spec=pltpu.PrefetchScalarGridSpec(
            num_scalar_prefetch=0,
            grid=grid,
            in_specs=[
                # activations: tiled over batch
                pl.BlockSpec((bb, K), lambda i: (i, 0)),
                # weights / biases: whole array, resident across batch tiles
                pl.BlockSpec((K, H1), lambda i: (0, 0)),
                pl.BlockSpec((1, H1), lambda i: (0, 0)),
                pl.BlockSpec((H1, H2), lambda i: (0, 0)),
                pl.BlockSpec((1, H2), lambda i: (0, 0)),
                pl.BlockSpec((H2, D_out_p), lambda i: (0, 0)),
                pl.BlockSpec((1, D_out_p), lambda i: (0, 0)),
            ],
            out_specs=pl.BlockSpec((bb, D_out_p), lambda i: (i, 0)),
        ),
        compiler_params=pltpu.CompilerParams(
            dimension_semantics=("parallel",),
            vmem_limit_bytes=32 * 1024 * 1024),
        cost_estimate=cost,
    )(x, w1, b1, w2, b2, w3, b3)

    return out_padded[:, :d_out] if D_out_p != d_out else out_padded


def init_generator_params(key, input_dim, condition_dim, output_dim):
    """Deterministic init matching nn.Linear default (U(-1/sqrt(fan_in), ...)).

    Weights are stored transposed, i.e. shape [in_features, out_features].
    """
    dims = [(input_dim + condition_dim, 256), (256, 512), (512, output_dim)]
    params = {}
    for idx, (fan_in, fan_out) in enumerate(dims, start=1):
        key, kw, kb = jax.random.split(key, 3)
        bound = 1.0 / jnp.sqrt(jnp.float32(fan_in))
        params[f"w{idx}"] = jax.random.uniform(
            kw, (fan_in, fan_out), jnp.float32, -bound, bound)
        params[f"b{idx}"] = jax.random.uniform(
            kb, (1, fan_out), jnp.float32, -bound, bound)
    return params


def _reference_forward(noise, conditions, params):
    """Pure-JAX f32 reference for correctness check."""
    x = jnp.concatenate([noise, conditions], axis=1)
    h1 = jnp.maximum(x @ params["w1"] + params["b1"], 0.0)
    h2 = jnp.maximum(h1 @ params["w2"] + params["b2"], 0.0)
    return jnp.tanh(h2 @ params["w3"] + params["b3"])


if __name__ == "__main__":
    # Small, module-consistent shapes.  batch=1024 with block_b=512 gives
    # exactly 2 grid steps, so the parallel batch axis has work for both v7x
    # TensorCores while per-step compute still dwarfs grid-step overhead.
    batch = 1024
    input_dim = 16       # noise latent dim
    condition_dim = 16   # condition embedding dim
    output_dim = 64      # generated sample dim (exercises lane-pad path)

    key = jax.random.PRNGKey(0)
    k_noise, k_cond, k_params = jax.random.split(key, 3)

    noise = jax.random.normal(k_noise, (batch, input_dim), jnp.float32)
    conditions = jax.random.normal(k_cond, (batch, condition_dim), jnp.float32)
    params = init_generator_params(k_params, input_dim, condition_dim,
                                   output_dim)

    # One-time weight preprocessing (outside the per-call jitted path).
    prepared, d_out = prepare_generator_params(params)
    prepared = jax.tree_util.tree_map(jax.block_until_ready, prepared)

    out = generator_forward(noise, conditions, prepared, d_out)
    out = jax.block_until_ready(out)

    ref = _reference_forward(noise, conditions, params)
    assert out.shape == (batch, output_dim), out.shape
    # bf16 MXU operands / bf16 inter-layer activations with f32 accumulation
    # -> loosened tolerance vs the f32 reference (fine for a GAN generator).
    assert jnp.allclose(out, ref, atol=2e-2, rtol=2e-2), "mismatch vs reference"

    print("KERNEL_OK")
</pallas_src>

<mosaic_0001>
module attributes {stable_mosaic.version = 11 : i64} {
  func.func @_generator_kernel(%arg0: i32, %arg1: memref<512x32xf32, #tpu.memory_space<vmem>>, %arg2: memref<32x256xbf16, #tpu.memory_space<vmem>>, %arg3: memref<1x256xf32, #tpu.memory_space<vmem>>, %arg4: memref<256x512xbf16, #tpu.memory_space<vmem>>, %arg5: memref<1x512xf32, #tpu.memory_space<vmem>>, %arg6: memref<512x128xbf16, #tpu.memory_space<vmem>>, %arg7: memref<1x128xf32, #tpu.memory_space<vmem>>, %arg8: memref<512x128xf32, #tpu.memory_space<vmem>>) attributes {dimension_semantics = [#tpu.dimension_semantics<parallel>], iteration_bounds = array<i64: 2>, scalar_prefetch = 0 : i64, scratch_operands = 0 : i64, tpu.core_type = #tpu.core_type<tc>, window_params = [{transform_indices = @transform_0, window_bounds = array<i64: 512, 32>}, {pipeline_mode = #tpu.pipeline_mode<synchronous>, transform_indices = @transform_1, window_bounds = array<i64: 32, 256>}, {pipeline_mode = #tpu.pipeline_mode<synchronous>, transform_indices = @transform_2, window_bounds = array<i64: 1, 256>}, {pipeline_mode = #tpu.pipeline_mode<synchronous>, transform_indices = @transform_3, window_bounds = array<i64: 256, 512>}, {pipeline_mode = #tpu.pipeline_mode<synchronous>, transform_indices = @transform_4, window_bounds = array<i64: 1, 512>}, {pipeline_mode = #tpu.pipeline_mode<synchronous>, transform_indices = @transform_5, window_bounds = array<i64: 512, 128>}, {pipeline_mode = #tpu.pipeline_mode<synchronous>, transform_indices = @transform_6, window_bounds = array<i64: 1, 128>}, {transform_indices = @transform_7, window_bounds = array<i64: 512, 128>}]} {
    %c0 = arith.constant 0 : index
    %c0_0 = arith.constant 0 : index
    %0 = vector.load %arg1[%c0, %c0_0] : memref<512x32xf32, #tpu.memory_space<vmem>>, vector<512x32xf32>
    %1 = arith.truncf %0 : vector<512x32xf32> to vector<512x32xbf16>
    %c0_1 = arith.constant 0 : index
    %c0_2 = arith.constant 0 : index
    %2 = vector.load %arg2[%c0_1, %c0_2] : memref<32x256xbf16, #tpu.memory_space<vmem>>, vector<32x256xbf16>
    %cst = arith.constant dense<0.000000e+00> : vector<512x256xf32>
    %3 = tpu.matmul %1, %2, %cst {dimension_numbers = #tpu.dot_dimension_numbers<[1], [0], [0], [1], [0, 0, 1, 1], [], []>} : vector<512x32xbf16>, vector<32x256xbf16>, vector<512x256xf32> -> vector<512x256xf32>
    %c0_3 = arith.constant 0 : index
    %c0_4 = arith.constant 0 : index
    %4 = vector.load %arg3[%c0_3, %c0_4] : memref<1x256xf32, #tpu.memory_space<vmem>>, vector<1x256xf32>
    %5 = vector.broadcast %4 : vector<1x256xf32> to vector<512x256xf32>
    %6 = arith.addf %3, %5 : vector<512x256xf32>
    %cst_5 = arith.constant 0.000000e+00 : f32
    %7 = vector.broadcast %cst_5 : f32 to vector<512x256xf32>
    %8 = arith.maximumf %6, %7 : vector<512x256xf32>
    %9 = arith.truncf %8 : vector<512x256xf32> to vector<512x256xbf16>
    %c0_6 = arith.constant 0 : index
    %c0_7 = arith.constant 0 : index
    %10 = vector.load %arg4[%c0_6, %c0_7] : memref<256x512xbf16, #tpu.memory_space<vmem>>, vector<256x512xbf16>
    %cst_8 = arith.constant dense<0.000000e+00> : vector<512x512xf32>
    %11 = tpu.matmul %9, %10, %cst_8 {dimension_numbers = #tpu.dot_dimension_numbers<[1], [0], [0], [1], [0, 0, 1, 1], [], []>} : vector<512x256xbf16>, vector<256x512xbf16>, vector<512x512xf32> -> vector<512x512xf32>
    %c0_9 = arith.constant 0 : index
    %c0_10 = arith.constant 0 : index
    %12 = vector.load %arg5[%c0_9, %c0_10] : memref<1x512xf32, #tpu.memory_space<vmem>>, vector<1x512xf32>
    %13 = vector.broadcast %12 : vector<1x512xf32> to vector<512x512xf32>
    %14 = arith.addf %11, %13 : vector<512x512xf32>
    %cst_11 = arith.constant 0.000000e+00 : f32
    %15 = vector.broadcast %cst_11 : f32 to vector<512x512xf32>
    %16 = arith.maximumf %14, %15 : vector<512x512xf32>
    %17 = arith.truncf %16 : vector<512x512xf32> to vector<512x512xbf16>
    %c0_12 = arith.constant 0 : index
    %c0_13 = arith.constant 0 : index
    %18 = vector.load %arg6[%c0_12, %c0_13] : memref<512x128xbf16, #tpu.memory_space<vmem>>, vector<512x128xbf16>
    %cst_14 = arith.constant dense<0.000000e+00> : vector<512x128xf32>
    %19 = tpu.matmul %17, %18, %cst_14 {dimension_numbers = #tpu.dot_dimension_numbers<[1], [0], [0], [1], [0, 0, 1, 1], [], []>} : vector<512x512xbf16>, vector<512x128xbf16>, vector<512x128xf32> -> vector<512x128xf32>
    %c0_15 = arith.constant 0 : index
    %c0_16 = arith.constant 0 : index
    %20 = vector.load %arg7[%c0_15, %c0_16] : memref<1x128xf32, #tpu.memory_space<vmem>>, vector<1x128xf32>
    %21 = vector.broadcast %20 : vector<1x128xf32> to vector<512x128xf32>
    %22 = arith.addf %19, %21 : vector<512x128xf32>
    %23 = math.tanh %22 : vector<512x128xf32>
    %c0_17 = arith.constant 0 : index
    %c0_18 = arith.constant 0 : index
    %24 = vector.load %arg8[%c0_17, %c0_18] : memref<512x128xf32, #tpu.memory_space<vmem>>, vector<512x128xf32>
    tpu.vector_store %arg8[%c0_17, %c0_18], %23 {strides = array<i32>} : memref<512x128xf32, #tpu.memory_space<vmem>>, vector<512x128xf32>,
    return
  }
  func.func @transform_0(%arg0: i32) -> (i32, i32) {
    %c0_i32 = arith.constant 0 : i32
    %c0_i32_0 = arith.constant 0 : i32
    return %arg0, %c0_i32 : i32, i32
  }
  func.func @transform_1(%arg0: i32) -> (i32, i32) {
    %c0_i32 = arith.constant 0 : i32
    %c0_i32_0 = arith.constant 0 : i32
    %c0_i32_1 = arith.constant 0 : i32
    return %c0_i32, %c0_i32_0 : i32, i32
  }
  func.func @transform_2(%arg0: i32) -> (i32, i32) {
    %c0_i32 = arith.constant 0 : i32
    %c0_i32_0 = arith.constant 0 : i32
    %c0_i32_1 = arith.constant 0 : i32
    return %c0_i32, %c0_i32_0 : i32, i32
  }
  func.func @transform_3(%arg0: i32) -> (i32, i32) {
    %c0_i32 = arith.constant 0 : i32
    %c0_i32_0 = arith.constant 0 : i32
    %c0_i32_1 = arith.constant 0 : i32
    return %c0_i32, %c0_i32_0 : i32, i32
  }
  func.func @transform_4(%arg0: i32) -> (i32, i32) {
    %c0_i32 = arith.constant 0 : i32
    %c0_i32_0 = arith.constant 0 : i32
    %c0_i32_1 = arith.constant 0 : i32
    return %c0_i32, %c0_i32_0 : i32, i32
  }
  func.func @transform_5(%arg0: i32) -> (i32, i32) {
    %c0_i32 = arith.constant 0 : i32
    %c0_i32_0 = arith.constant 0 : i32
    %c0_i32_1 = arith.constant 0 : i32
    return %c0_i32, %c0_i32_0 : i32, i32
  }
  func.func @transform_6(%arg0: i32) -> (i32, i32) {
    %c0_i32 = arith.constant 0 : i32
    %c0_i32_0 = arith.constant 0 : i32
    %c0_i32_1 = arith.constant 0 : i32
    return %c0_i32, %c0_i32_0 : i32, i32
  }
  func.func @transform_7(%arg0: i32) -> (i32, i32) {
    %c0_i32 = arith.constant 0 : i32
    %c0_i32_0 = arith.constant 0 : i32
    return %arg0, %c0_i32 : i32, i32
  }
}

</mosaic_0001>

<bundles_post_ra>
// kernel: generator_forward.1
= control target key start
LH: loop header
LB: loop body
LE: loop exit
PB: predicated region body
PF: predicated region fallthrough
CT: control target
= control target key end

     0   :  { %s4266_s24 = smov 0   ;;  %s5832_s0 = inlined_call_operand.vmem [shape: f32[1024,32], index: 0, kind: input, shape index: {}]   ;;  %s5833_s1 = inlined_call_operand.vmem [shape: bf16[32,256], index: 1, kind: input, shape index: {}]   ;;  %s5834_s2 = inlined_call_operand.vmem [shape: f32[1,256], index: 2, kind: input, shape index: {}]   ;;  %s5835_s3 = inlined_call_operand.vmem [shape: bf16[256,512], index: 3, kind: input, shape index: {}]   ;;  %s5836_s4 = inlined_call_operand.vmem [shape: f32[1,512], index: 4, kind: input, shape index: {}]   ;;  %s5837_s5 = inlined_call_operand.vmem [shape: bf16[512,128], index: 5, kind: input, shape index: {}]   ;;  %s5838_s6 = inlined_call_operand.vmem [shape: f32[1,128], index: 6, kind: input, shape index: {}]   ;;  %s5839_s7 = inlined_call_operand.vmem [shape: f32[1024,128], index: 7, kind: output, shape index: {}]  }
   0x1 LB: > { %s3578_s25 = sadd.s32 4294967295, %s4223_s24   ;;  %p3582_p0 = scmp.ge.s32.totalorder %s4223_s24, 1  ;;  %s4223_s24 = sphi %s4266_s24, %s17_s24  }
   0x2   : > { %p238_p1 = scmp.lt.s32.totalorder %s4223_s24, 3 }
   0x4   : > { %p239_p2 = pnand %p3582_p0, %p238_p1 }
   0x6   : > { %242 = sbr.rel (%p239_p2) target bundleno = 1232 (0x4d0), region = 48 }
   0xd   : > { %v3955_v0 = vld [vmem:[%s5833_s1 + $0x4] ss:$8 sps:$4 sm:$0xff]   ;;  %s3583_s28 = sshll.u32 %s3578_s25, 6  ;;  %v3957_v1 = vld [vmem:[%s5833_s1] ss:$8 sps:$4 sm:$0xff]   ;;  %v5843_v2 = vmov 0  }
   0xe   : > { %544 = vmatprep.mubr.bf16.mxu0 %v5843_v2  ;;  %p271_p3 = scmp.lt.s32.totalorder %s3583_s28, 127  ;;  %512 = vmatprep.subr.bf16.mxu0 %v3955_v0  ;;  %v3958_v3 = vld [vmem:[%s5833_s1 + $0x14] ss:$8 sps:$4 sm:$0xff]   ;;  %v3960_v4 = vld [vmem:[%s5833_s1 + $0x10] ss:$8 sps:$4 sm:$0xff]   ;;  %vm415_vm0 = vcmask 261120  }
   0xf   : > { %513 = vmatpush1.bf16.msra.mxu0 %v3957_v1  ;;  %v3963_v5 = vld [vmem:[%s5835_s3 + $0x4] ss:$16 sps:$4 sm:$0xff]   ;;  %v3961_v6 = vld [vmem:[%s5835_s3] ss:$16 sps:$4 sm:$0xff]  }
  0x10   : > { %s5854_s28 = smov (!%p271_p3, %s3583_s28), 127  ;;  %514 = vmatprep.subr.bf16.mxu0 %v3958_v3  ;;  %v3966_v7 = vld [vmem:[%s5835_s3 + $0x24] ss:$16 sps:$4 sm:$0xff]   ;;  %3722 = vmatprep.subr.bf16.mxu1 %v3963_v5  ;;  %v3964_v11 = vld [vmem:[%s5835_s3 + $0x20] ss:$16 sps:$4 sm:$0xff]  }
  0x11   : > { %s3584_s16 = sshll.u32 %s5854_s28, 3  ;;  %3738 = vmatpush1.bf16.msra.mxu1 %v3961_v6  ;;  %v3969_v12 = vld [vmem:[%s5835_s3 + $0x44] ss:$16 sps:$4 sm:$0xff]   ;;  %v3967_v15 = vld [vmem:[%s5835_s3 + $0x40] ss:$16 sps:$4 sm:$0xff]  }
  0x12   : > { %s4304_s21 = scalar_lea.vmem %s5832_s0, %s3584_s16  ;;  %3723 = vmatprep.subr.bf16.mxu1 %v3966_v7  ;;  %v3972_v16 = vld [vmem:[%s5835_s3 + $0x64] ss:$16 sps:$4 sm:$0xff]   ;;  %v3970_v18 = vld [vmem:[%s5835_s3 + $0x60] ss:$16 sps:$4 sm:$0xff]   ;;  %s5695_s18 = scalar_lea.vmem %s5839_s7, %s3584_s16 }
  0x13   : > { %515 = vmatpush1.bf16.msra.mxu0 %v3960_v4  ;;  %v283_v8 = vld [vmem:[%s4304_s21] sm:$0xff]  ;;  %v284_v9 = vld [vmem:[%s4304_s21 + $0x8] sm:$0xff]  ;;  %v285_v13 = vld [vmem:[%s4304_s21 + $0x10] sm:$0xff] }
  0x14   : > { %v347_v10 = vpack.c.bf16 %v284_v9, %v283_v8  ;;  %1463 = vmatprep.subr.bf16.mxu0 %v3963_v5  ;;  %v286_v14 = vld [vmem:[%s4304_s21 + $0x18] sm:$0xff]  ;;  %v287_v19 = vld [vmem:[%s4304_s21 + $0x20] sm:$0xff]  ;;  %v288_v21 = vld [vmem:[%s4304_s21 + $0x28] sm:$0xff] }
  0x15   : > { %3739 = vmatpush1.bf16.msra.mxu1 %v3964_v11  ;;  %v348_v17 = vpack.c.bf16 %v286_v14, %v285_v13  ;;  %v3975_v20 = vld [vmem:[%s5835_s3 + $0x84] ss:$16 sps:$4 sm:$0xff]   ;;  %v3973_v22 = vld [vmem:[%s5835_s3 + $0x80] ss:$16 sps:$4 sm:$0xff]   ;;  %v349_v24 = vpack.c.bf16 %v288_v21, %v287_v19  ;;  %v290_v28 = vld [vmem:[%s4304_s21 + $0x38] sm:$0xff] }
  0x16   : > { %3591 = vmatmul.mubr.msk.bf16.vlgmr.msra.gmra.mrb[0].mxu0 %vm415_vm0, %v347_v10  ;;  %3724 = vmatprep.subr.bf16.mxu1 %v3969_v12  ;;  %v3978_v23 = vld [vmem:[%s5835_s3 + $0xa4] ss:$16 sps:$4 sm:$0xff]   ;;  %v3976_v25 = vld [vmem:[%s5835_s3 + $0xa0] ss:$16 sps:$4 sm:$0xff]   ;;  %v292_v35 = vld [vmem:[%s4304_s21 + $0x48] sm:$0xff] }
  0x17   : > { %1464 = vmatpush1.bf16.msra.mxu0 %v3961_v6  ;;  %554 = vmatprep.mubr.bf16.mxu0 %v5843_v2  ;;  %v289_v26 = vld [vmem:[%s4304_s21 + $0x30] sm:$0xff]  ;;  %v291_v34 = vld [vmem:[%s4304_s21 + $0x40] sm:$0xff]  ;;  %v294_v42 = vld [vmem:[%s4304_s21 + $0x58] sm:$0xff] }
  0x18   : > { %1465 = vmatprep.subr.bf16.mxu0 %v3966_v7  ;;  %v3981_v27 = vld [vmem:[%s5835_s3 + $0xc4] ss:$16 sps:$4 sm:$0xff]   ;;  %v3979_v29 = vld [vmem:[%s5835_s3 + $0xc0] ss:$16 sps:$4 sm:$0xff]   ;;  %v350_v31 = vpack.c.bf16 %v290_v28, %v289_v26  ;;  %v351_v38 = vpack.c.bf16 %v292_v35, %v291_v34  ;;  %v296_v46 = vld [vmem:[%s4304_s21 + $0x68] sm:$0xff] }
  0x19   : > { %3740 = vmatpush1.bf16.msra.mxu1 %v3967_v15  ;;  %v3984_v30 = vld [vmem:[%s5835_s3 + $0xe4] ss:$16 sps:$4 sm:$0xff]   ;;  %v3982_v32 = vld [vmem:[%s5835_s3 + $0xe0] ss:$16 sps:$4 sm:$0xff]   ;;  %v298_v51 = vld [vmem:[%s4304_s21 + $0x78] sm:$0xff] }
  0x1a   : > { %3725 = vmatprep.subr.bf16.mxu1 %v3972_v16  ;;  %v3987_v33 = vld [vmem:[%s5835_s3 + $0x104] ss:$16 sps:$4 sm:$0xff]   ;;  %v3985_v36 = vld [vmem:[%s5835_s3 + $0x100] ss:$16 sps:$4 sm:$0xff]   ;;  %v300_v54 = vld [vmem:[%s4304_s21 + $0x88] sm:$0xff] }
  0x1b   : > { %1466 = vmatpush1.bf16.msra.mxu0 %v3964_v11  ;;  %v3990_v37 = vld [vmem:[%s5835_s3 + $0x124] ss:$16 sps:$4 sm:$0xff]   ;;  %v3988_v39 = vld [vmem:[%s5835_s3 + $0x120] ss:$16 sps:$4 sm:$0xff]   ;;  %v302_v59 = vld [vmem:[%s4304_s21 + $0x98] sm:$0xff] }
  0x1c   : > { %1467 = vmatprep.subr.bf16.mxu0 %v3969_v12  ;;  %v293_v40 = vld [vmem:[%s4304_s21 + $0x50] sm:$0xff]  ;;  %v295_v45 = vld [vmem:[%s4304_s21 + $0x60] sm:$0xff]  ;;  %v304_v62 = vld [vmem:[%s4304_s21 + $0xa8] sm:$0xff] }
  0x1d   : > { %3741 = vmatpush1.bf16.msra.mxu1 %v3970_v18  ;;  %v3993_v41 = vld [vmem:[%s5835_s3 + $0x144] ss:$16 sps:$4 sm:$0xff]   ;;  %v3991_v43 = vld [vmem:[%s5835_s3 + $0x140] ss:$16 sps:$4 sm:$0xff]   ;;  %v352_v44 = vpack.c.bf16 %v294_v42, %v293_v40  ;;  %v353_v47 = vpack.c.bf16 %v296_v46, %v295_v45  ;;  %v306_v4 = vld [vmem:[%s4304_s21 + $0xb8] sm:$0xff] }
  0x1e   : > { %3592 = vmatmul.mubr.msk.bf16.gmra.mrb[4].mxu0 %vm415_vm0, %v348_v17  ;;  %3726 = vmatprep.subr.bf16.mxu1 %v3975_v20  ;;  %v3994_v48 = vld [vmem:[%s5835_s3 + $0x160] ss:$16 sps:$4 sm:$0xff]   ;;  %v3996_v49 = vld [vmem:[%s5835_s3 + $0x164] ss:$16 sps:$4 sm:$0xff]   ;;  %v308_v7 = vld [vmem:[%s4304_s21 + $0xc8] sm:$0xff] }
  0x1f   : > { %564 = vmatprep.mubr.bf16.mxu0 %v5843_v2  ;;  %1468 = vmatpush1.bf16.msra.mxu0 %v3967_v15  ;;  %v297_v50 = vld [vmem:[%s4304_s21 + $0x70] sm:$0xff]  ;;  %v299_v53 = vld [vmem:[%s4304_s21 + $0x80] sm:$0xff]  ;;  %v310_v10 = vld [vmem:[%s4304_s21 + $0xd8] sm:$0xff] }
  0x20   : > { %1469 = vmatprep.subr.bf16.mxu0 %v3972_v16  ;;  %v354_v52 = vpack.c.bf16 %v298_v51, %v297_v50  ;;  %v355_v55 = vpack.c.bf16 %v300_v54, %v299_v53  ;;  %v3997_v56 = vld [vmem:[%s5835_s3 + $0x180] ss:$16 sps:$4 sm:$0xff]   ;;  %v3999_v57 = vld [vmem:[%s5835_s3 + $0x184] ss:$16 sps:$4 sm:$0xff]   ;;  %v312_v15 = vld [vmem:[%s4304_s21 + $0xe8] sm:$0xff] }
  0x21   : > { %3742 = vmatpush1.bf16.msra.mxu1 %v3973_v22  ;;  %v301_v58 = vld [vmem:[%s4304_s21 + $0x90] sm:$0xff]  ;;  %v303_v61 = vld [vmem:[%s4304_s21 + $0xa0] sm:$0xff]  ;;  %v318_v26 = vld [vmem:[%s4304_s21 + $0x118] sm:$0xff] }
  0x22   : > { %3727 = vmatprep.subr.bf16.mxu1 %v3978_v23  ;;  %v356_v60 = vpack.c.bf16 %v302_v59, %v301_v58  ;;  %v357_v63 = vpack.c.bf16 %v304_v62, %v303_v61  ;;  %v4000_v0 = vld [vmem:[%s5835_s3 + $0x1a0] ss:$16 sps:$4 sm:$0xff]   ;;  %v4002_v1 = vld [vmem:[%s5835_s3 + $0x1a4] ss:$16 sps:$4 sm:$0xff]   ;;  %v324_v35 = vld [vmem:[%s4304_s21 + $0x148] sm:$0xff] }
  0x23   : > { %1470 = vmatpush1.bf16.msra.mxu0 %v3970_v18  ;;  %v305_v3 = vld [vmem:[%s4304_s21 + $0xb0] sm:$0xff]  ;;  %v307_v6 = vld [vmem:[%s4304_s21 + $0xc0] sm:$0xff]  ;;  %v314_v18 = vld [vmem:[%s4304_s21 + $0xf8] sm:$0xff] }
  0x24   : > { %1471 = vmatprep.subr.bf16.mxu0 %v3975_v20  ;;  %v358_v5 = vpack.c.bf16 %v306_v4, %v305_v3  ;;  %v359_v8 = vpack.c.bf16 %v308_v7, %v307_v6  ;;  %v309_v9 = vld [vmem:[%s4304_s21 + $0xd0] sm:$0xff]  ;;  %v311_v14 = vld [vmem:[%s4304_s21 + $0xe0] sm:$0xff]  ;;  %v334_v50 = vld [vmem:[%s4304_s21 + $0x198] sm:$0xff] }
  0x25   : > { %3743 = vmatpush1.bf16.msra.mxu1 %v3976_v25  ;;  %v4003_v11 = vld [vmem:[%s5835_s3 + $0x1c0] ss:$16 sps:$4 sm:$0xff]   ;;  %v4005_v12 = vld [vmem:[%s5835_s3 + $0x1c4] ss:$16 sps:$4 sm:$0xff]   ;;  %v360_v13 = vpack.c.bf16 %v310_v10, %v309_v9  ;;  %v361_v16 = vpack.c.bf16 %v312_v15, %v311_v14  ;;  %v4011_v9 = vld [vmem:[%s5835_s3 + $0xc] ss:$16 sps:$4 sm:$0xff]  }
  0x26   : > { %3593 = vmatmul.mubr.msk.bf16.gmra.mrb[8].mxu0 %vm415_vm0, %v349_v24  ;;  %3728 = vmatprep.subr.bf16.mxu1 %v3981_v27  ;;  %v313_v17 = vld [vmem:[%s4304_s21 + $0xf0] sm:$0xff]  ;;  %v319_v28 = vld [vmem:[%s4304_s21 + $0x120] sm:$0xff] }
  0x27   : > { %574 = vmatprep.mubr.bf16.mxu0 %v5843_v2  ;;  %1472 = vmatpush1.bf16.msra.mxu0 %v3973_v22  ;;  %v4006_v19 = vld [vmem:[%s5835_s3 + $0x1e0] ss:$16 sps:$4 sm:$0xff]   ;;  %v4008_v20 = vld [vmem:[%s5835_s3 + $0x1e4] ss:$16 sps:$4 sm:$0xff]   ;;  %v362_v21 = vpack.c.bf16 %v314_v18, %v313_v17 }
  0x28   : > { %1473 = vmatprep.subr.bf16.mxu0 %v3978_v23  ;;  %v315_v22 = vld [vmem:[%s4304_s21 + $0x100] sm:$0xff]  ;;  %v316_v23 = vld [vmem:[%s4304_s21 + $0x108] sm:$0xff]  ;;  %v337_v62 = vld [vmem:[%s4304_s21 + $0x1b0] sm:$0xff] }
  0x29   : > { %3744 = vmatpush1.bf16.msra.mxu1 %v3979_v29  ;;  %v363_v24 = vpack.c.bf16 %v316_v23, %v315_v22  ;;  %v323_v34 = vld [vmem:[%s4304_s21 + $0x140] sm:$0xff] }
  0x2a   : > { %3729 = vmatprep.subr.bf16.mxu1 %v3984_v30  ;;  %v327_v40 = vld [vmem:[%s4304_s21 + $0x160] sm:$0xff] }
  0x2b   : > { %1474 = vmatpush1.bf16.msra.mxu0 %v3976_v25  ;;  %v317_v25 = vld [vmem:[%s4304_s21 + $0x110] sm:$0xff]  ;;  %v331_v46 = vld [vmem:[%s4304_s21 + $0x180] sm:$0xff] }
  0x2c   : > { %1475 = vmatprep.subr.bf16.mxu0 %v3981_v27  ;;  %v364_v27 = vpack.c.bf16 %v318_v26, %v317_v25  ;;  %v335_v54 = vld [vmem:[%s4304_s21 + $0x1a0] sm:$0xff] }
  0x2d   : > { %3745 = vmatpush1.bf16.msra.mxu1 %v3982_v32  ;;  %v383_v58 = vld [vmem:[%s5834_s2] sm:$0x3] }
  0x2e   : > { %3594 = vmatmul.mubr.msk.bf16.gmra.mrb[12].mxu0 %vm415_vm0, %v350_v31  ;;  %3730 = vmatprep.subr.bf16.mxu1 %v3987_v33  ;;  %v321_v31 = vld [vmem:[%s4304_s21 + $0x130] sm:$0xff]  ;;  %v339_v15 = vld [vmem:[%s4304_s21 + $0x1c0] sm:$0xff] }
  0x2f   : > { %584 = vmatprep.mubr.bf16.mxu0 %v5843_v2  ;;  %1476 = vmatpush1.bf16.msra.mxu0 %v3979_v29  ;;  %v320_v29 = vld [vmem:[%s4304_s21 + $0x128] sm:$0xff] }
  0x30   : > { %1477 = vmatprep.subr.bf16.mxu0 %v3984_v30  ;;  %v365_v30 = vpack.c.bf16 %v320_v29, %v319_v28 }
  0x31   : > { %3746 = vmatpush1.bf16.msra.mxu1 %v3985_v36 }
  0x32   : > { %3731 = vmatprep.subr.bf16.mxu1 %v3990_v37 }
  0x33   : > { %1478 = vmatpush1.bf16.msra.mxu0 %v3982_v32  ;;  %v322_v32 = vld [vmem:[%s4304_s21 + $0x138] sm:$0xff] }
  0x34   : > { %1479 = vmatprep.subr.bf16.mxu0 %v3987_v33  ;;  %v366_v33 = vpack.c.bf16 %v322_v32, %v321_v31  ;;  %v341_v32 = vld [vmem:[%s4304_s21 + $0x1d0] sm:$0xff] }
  0x35   : > { %3747 = vmatpush1.bf16.msra.mxu1 %v3988_v39 }
  0x36   : > { %3595 = vmatmul.mubr.msk.bf16.gmra.mrb[16].mxu0 %vm415_vm0, %v351_v38  ;;  %3732 = vmatprep.subr.bf16.mxu1 %v3993_v41  ;;  %v326_v38 = vld [vmem:[%s4304_s21 + $0x158] sm:$0xff] }
  0x37   : > { %594 = vmatprep.mubr.bf16.mxu0 %v5843_v2  ;;  %1480 = vmatpush1.bf16.msra.mxu0 %v3985_v36  ;;  %v367_v36 = vpack.c.bf16 %v324_v35, %v323_v34 }
  0x38   : > { %1481 = vmatprep.subr.bf16.mxu0 %v3990_v37  ;;  %v325_v37 = vld [vmem:[%s4304_s21 + $0x150] sm:$0xff] }
  0x39   : > { %3748 = vmatpush1.bf16.msra.mxu1 %v3991_v43 }
  0x3a   : > { %3733 = vmatprep.subr.bf16.mxu1 %v3996_v49 }
  0x3b   : > { %1482 = vmatpush1.bf16.msra.mxu0 %v3988_v39  ;;  %v368_v39 = vpack.c.bf16 %v326_v38, %v325_v37 }
  0x3c   : > { %1483 = vmatprep.subr.bf16.mxu0 %v3993_v41  ;;  %v328_v41 = vld [vmem:[%s4304_s21 + $0x168] sm:$0xff] }
  0x3d   : > { %3749 = vmatpush1.bf16.msra.mxu1 %v3994_v48  ;;  %v369_v42 = vpack.c.bf16 %v328_v41, %v327_v40 }
  0x3e   : > { %3596 = vmatmul.mubr.msk.bf16.gmra.mrb[20].mxu0 %vm415_vm0, %v352_v44  ;;  %3734 = vmatprep.subr.bf16.mxu1 %v3999_v57  ;;  %v330_v44 = vld [vmem:[%s4304_s21 + $0x178] sm:$0xff] }
  0x3f   : > { %604 = vmatprep.mubr.bf16.mxu0 %v5843_v2  ;;  %1484 = vmatpush1.bf16.msra.mxu0 %v3991_v43  ;;  %v329_v43 = vld [vmem:[%s4304_s21 + $0x170] sm:$0xff] }
  0x40   : > { %1485 = vmatprep.subr.bf16.mxu0 %v3996_v49  ;;  %v370_v45 = vpack.c.bf16 %v330_v44, %v329_v43  ;;  %v333_v49 = vld [vmem:[%s4304_s21 + $0x190] sm:$0xff] }
  0x41   : > { %3750 = vmatpush1.bf16.msra.mxu1 %v3997_v56  ;;  %v372_v51 = vpack.c.bf16 %v334_v50, %v333_v49  ;;  %v343_v49 = vld [vmem:[%s4304_s21 + $0x1e0] sm:$0xff]  ;;  %v344_v50 = vld [vmem:[%s4304_s21 + $0x1e8] sm:$0xff] }
  0x42   : > { %3735 = vmatprep.subr.bf16.mxu1 %v4002_v1 }
  0x43   : > { %1486 = vmatpush1.bf16.msra.mxu0 %v3994_v48 }
  0x44   : > { %1487 = vmatprep.subr.bf16.mxu0 %v3999_v57 }
  0x45   : > { %3751 = vmatpush1.bf16.msra.mxu1 %v4000_v0 }
  0x46   : > { %3597 = vmatmul.mubr.msk.bf16.gmra.mrb[24].mxu0 %vm415_vm0, %v353_v47  ;;  %3736 = vmatprep.subr.bf16.mxu1 %v4005_v12  ;;  %v332_v47 = vld [vmem:[%s4304_s21 + $0x188] sm:$0xff] }
  0x47   : > { %614 = vmatprep.mubr.bf16.mxu0 %v5843_v2  ;;  %1488 = vmatpush1.bf16.msra.mxu0 %v3997_v56  ;;  %v371_v48 = vpack.c.bf16 %v332_v47, %v331_v46 }
  0x48   : > { %1489 = vmatprep.subr.bf16.mxu0 %v4002_v1 }
  0x49   : > { %3752 = vmatpush1.bf16.msra.mxu1 %v4003_v11 }
  0x4a   : > { %3737 = vmatprep.subr.bf16.mxu1 %v4008_v20 }
  0x4b   : > { %1490 = vmatpush1.bf16.msra.mxu0 %v4000_v0 }
  0x4c   : > { %1491 = vmatprep.subr.bf16.mxu0 %v4005_v12 }
  0x4d   : > { %3753 = vmatpush1.bf16.msra.mxu1 %v4006_v19 }
  0x4e   : > { %3598 = vmatmul.mubr.msk.bf16.gmra.mrb[28].mxu0 %vm415_vm0, %v354_v52  ;;  %2816 = vmatprep.subr.bf16.mxu1 %v5843_v2  ;;  %v385_v52 = vlaneseq }
  0x4f   : > { %624 = vmatprep.mubr.bf16.mxu0 %v5843_v2  ;;  %1492 = vmatpush1.bf16.msra.mxu0 %v4003_v11 }
  0x50   : > { %1493 = vmatprep.subr.bf16.mxu0 %v4008_v20  ;;  %v4497_v53 = vshrl.u32 %v385_v52, 7 }
  0x52   : > { %v5841_v57 = vsub.s32 0, %v4497_v53  ;;  %v5840_v59 = vsub.s32 1, %v4497_v53 }
  0x53   : > { %1494 = vmatpush1.bf16.msra.mxu0 %v4006_v19 }
  0x54   : > { %v4514_v61 = vrot.slane %v383_v58, %v5840_v59  ;;  %1816 = vmatprep.subr.bf16.mxu0 %v4011_v9  ;;  %v346_v9 = vld [vmem:[%s4304_s21 + $0x1f8] sm:$0xff] }
  0x56   : > { %3599 = vmatmul.mubr.msk.bf16.gmra.mrb[32].mxu0 %vm415_vm0, %v355_v55  ;;  %v336_v55 = vld [vmem:[%s4304_s21 + $0x1a8] sm:$0xff] }
  0x57   : > { %634 = vmatprep.mubr.bf16.mxu0 %v5843_v2  ;;  %v373_v56 = vpack.c.bf16 %v336_v55, %v335_v54 }
  0x5e   : > { %3600 = vmatmul.mubr.msk.bf16.gmra.mrb[36].mxu0 %vm415_vm0, %v356_v60  ;;  %v4510_v60 = vrot.slane %v383_v58, %v5841_v57  ;;  %v377_v58 = vpack.c.bf16 %v344_v50, %v343_v49 }
  0x5f   : > { %644 = vmatprep.mubr.bf16.mxu0 %v5843_v2 }
  0x66   : > { %3601 = vmatmul.mubr.msk.bf16.gmra.mrb[40].mxu0 %vm415_vm0, %v357_v63  ;;  %v338_v63 = vld [vmem:[%s4304_s21 + $0x1b8] sm:$0xff] }
  0x67   : > { %654 = vmatprep.mubr.bf16.mxu0 %v5843_v2  ;;  %v374_v4 = vpack.c.bf16 %v338_v63, %v337_v62 }
  0x6e   : > { %3602 = vmatmul.mubr.msk.bf16.gmra.mrb[44].mxu0 %vm415_vm0, %v358_v5 }
  0x6f   : > { %664 = vmatprep.mubr.bf16.mxu0 %v5843_v2 }
  0x76   : > { %3603 = vmatmul.mubr.msk.bf16.gmra.mrb[48].mxu0 %vm415_vm0, %v359_v8 }
  0x77   : > { %674 = vmatprep.mubr.bf16.mxu0 %v5843_v2 }
  0x7e   : > { %3604 = vmatmul.mubr.msk.bf16.gmra.mrb[52].mxu0 %vm415_vm0, %v360_v13 }
  0x7f   : > { %684 = vmatprep.mubr.bf16.mxu0 %v5843_v2 }
  0x86   : > { %3605 = vmatmul.mubr.msk.bf16.gmra.mrb[56].mxu0 %vm415_vm0, %v361_v16  ;;  %v340_v16 = vld [vmem:[%s4304_s21 + $0x1c8] sm:$0xff] }
  0x87   : > { %694 = vmatprep.mubr.bf16.mxu0 %v5843_v2  ;;  %v375_v22 = vpack.c.bf16 %v340_v16, %v339_v15 }
  0x8e   : > { %3606 = vmatmul.mubr.msk.bf16.gmra.mrb[60].mxu0 %vm415_vm0, %v362_v21 }
  0x8f   : > { %704 = vmatprep.mubr.bf16.mxu0 %v5843_v2 }
  0x96   : > { %3607 = vmatmul.mubr.msk.bf16.gmra.mrb[64].mxu0 %vm415_vm0, %v363_v24 }
  0x97   : > { %714 = vmatprep.mubr.bf16.mxu0 %v5843_v2 }
  0x9e   : > { %3608 = vmatmul.mubr.msk.bf16.gmra.mrb[68].mxu0 %vm415_vm0, %v364_v27 }
  0x9f   : > { %724 = vmatprep.mubr.bf16.mxu0 %v5843_v2 }
  0xa6   : > { %3609 = vmatmul.mubr.msk.bf16.gmra.mrb[72].mxu0 %vm415_vm0, %v365_v30 }
  0xa7   : > { %734 = vmatprep.mubr.bf16.mxu0 %v5843_v2 }
  0xae   : > { %3610 = vmatmul.mubr.msk.bf16.gmra.mrb[76].mxu0 %vm415_vm0, %v366_v33  ;;  %v342_v33 = vld [vmem:[%s4304_s21 + $0x1d8] sm:$0xff] }
  0xaf   : > { %744 = vmatprep.mubr.bf16.mxu0 %v5843_v2 }
  0xb6   : > { %3611 = vmatmul.mubr.msk.bf16.gmra.mrb[80].mxu0 %vm415_vm0, %v367_v36 }
  0xb7   : > { %754 = vmatprep.mubr.bf16.mxu0 %v5843_v2 }
  0xbe   : > { %3612 = vmatmul.mubr.msk.bf16.gmra.mrb[84].mxu0 %vm415_vm0, %v368_v39  ;;  %v376_v39 = vpack.c.bf16 %v342_v33, %v341_v32 }
  0xbf   : > { %764 = vmatprep.mubr.bf16.mxu0 %v5843_v2 }
  0xc6   : > { %3613 = vmatmul.mubr.msk.bf16.gmra.mrb[88].mxu0 %vm415_vm0, %v369_v42 }
  0xc7   : > { %774 = vmatprep.mubr.bf16.mxu0 %v5843_v2 }
  0xce   : > { %3614 = vmatmul.mubr.msk.bf16.gmra.mrb[92].mxu0 %vm415_vm0, %v370_v45 }
  0xcf   : > { %784 = vmatprep.mubr.bf16.mxu0 %v5843_v2 }
  0xd6   : > { %3615 = vmatmul.mubr.msk.bf16.gmra.mrb[96].mxu0 %vm415_vm0, %v371_v48 }
  0xd7   : > { %794 = vmatprep.mubr.bf16.mxu0 %v5843_v2 }
  0xde   : > { %3616 = vmatmul.mubr.msk.bf16.gmra.mrb[100].mxu0 %vm415_vm0, %v372_v51 }
  0xdf   : > { %804 = vmatprep.mubr.bf16.mxu0 %v5843_v2 }
  0xe6   : > { %3617 = vmatmul.mubr.msk.bf16.gmra.mrb[104].mxu0 %vm415_vm0, %v373_v56 }
  0xe7   : > { %814 = vmatprep.mubr.bf16.mxu0 %v5843_v2 }
  0xe9   : > { %v546_v0 = vpop.f32.mrb[0].mxu0 }
  0xea   : > { %v547_v1 = vadd.f32 %v546_v0, %v4510_v60  ;;  %v548_v3 = vpop.f32.mrb[1].mxu0 }
  0xeb   : > { %v549_v5 = vadd.f32 %v548_v3, %v4514_v61  ;;  %v550_v6 = vpop.f32.mrb[2].mxu0 }
  0xec   : > { %v551_v7 = vadd.f32 %v550_v6, %v4510_v60  ;;  %v552_v8 = vpop.f32.mrb[3].mxu0  ;;  %v865_v11 = vmax.f32 %v547_v1, 0.0 }
  0xed   : > { %v553_v10 = vadd.f32 %v552_v8, %v4514_v61  ;;  %v866_v13 = vmax.f32 %v549_v5, 0.0  ;;  %v345_v8 = vld [vmem:[%s4304_s21 + $0x1f0] sm:$0xff] }
  0xee   : > { %v867_v12 = vmax.f32 %v551_v7, 0.0  ;;  %3618 = vmatmul.mubr.msk.bf16.gmra.mrb[108].mxu0 %vm415_vm0, %v374_v4  ;;  %v378_v15 = vpack.c.bf16 %v346_v9, %v345_v8  ;;  %v4023_v9 = vld [vmem:[%s5835_s3 + $0x8c] ss:$16 sps:$4 sm:$0xff]  }
  0xef   : > { %v868_v14 = vmax.f32 %v553_v10, 0.0  ;;  %824 = vmatprep.mubr.bf16.mxu0 %v5843_v2 }
  0xf0   : > { %v4530_v17 = vpack.c.bf16 %v867_v12, %v865_v11 }
  0xf1   : > { %v556_v18 = vpop.f32.mrb[4].mxu0  ;;  %v4532_v19 = vpack.c.bf16 %v868_v14, %v866_v13 }
  0xf2   : > { %v557_v20 = vadd.f32 %v556_v18, %v4510_v60  ;;  %v558_v21 = vpop.f32.mrb[5].mxu0 }
  0xf3   : > { %v559_v23 = vadd.f32 %v558_v21, %v4514_v61  ;;  %v560_v24 = vpop.f32.mrb[6].mxu0 }
  0xf4   : > { %v561_v25 = vadd.f32 %v560_v24, %v4510_v60  ;;  %v562_v26 = vpop.f32.mrb[7].mxu0  ;;  %v869_v28 = vmax.f32 %v557_v20, 0.0 }
  0xf5   : > { %v563_v27 = vadd.f32 %v562_v26, %v4514_v61  ;;  %v870_v30 = vmax.f32 %v559_v23, 0.0 }
  0xf6   : > { %v871_v29 = vmax.f32 %v561_v25, 0.0  ;;  %3619 = vmatmul.mubr.msk.bf16.gmra.mrb[112].mxu0 %vm415_vm0, %v375_v22 }
  0xf7   : > { %v872_v31 = vmax.f32 %v563_v27, 0.0  ;;  %834 = vmatprep.mubr.bf16.mxu0 %v5843_v2 }
  0xf8   : > { %v4542_v34 = vpack.c.bf16 %v871_v29, %v869_v28 }
  0xf9   : > { %v566_v35 = vpop.f32.mrb[8].mxu0  ;;  %v4544_v36 = vpack.c.bf16 %v872_v31, %v870_v30 }
  0xfa   : > { %v567_v37 = vadd.f32 %v566_v35, %v4510_v60  ;;  %v568_v38 = vpop.f32.mrb[9].mxu0  ;;  %v4009_v35 = vld [vmem:[%s5835_s3 + $0x8] ss:$16 sps:$4 sm:$0xff]  }
  0xfb   : > { %v569_v40 = vadd.f32 %v568_v38, %v4514_v61  ;;  %v570_v41 = vpop.f32.mrb[10].mxu0 }
  0xfc   : > { %v571_v42 = vadd.f32 %v570_v41, %v4510_v60  ;;  %v572_v43 = vpop.f32.mrb[11].mxu0  ;;  %v873_v45 = vmax.f32 %v567_v37, 0.0 }
  0xfd   : > { %v573_v44 = vadd.f32 %v572_v43, %v4514_v61  ;;  %v874_v47 = vmax.f32 %v569_v40, 0.0 }
  0xfe   : > { %v875_v46 = vmax.f32 %v571_v42, 0.0  ;;  %3620 = vmatmul.mubr.msk.bf16.gmra.mrb[116].mxu0 %vm415_vm0, %v376_v39  ;;  %v4014_v39 = vld [vmem:[%s5835_s3 + $0x2c] ss:$16 sps:$4 sm:$0xff]  }
  0xff   : > { %v876_v48 = vmax.f32 %v573_v44, 0.0  ;;  %844 = vmatprep.mubr.bf16.mxu0 %v5843_v2 }
 0x100   : > { %v4554_v51 = vpack.c.bf16 %v875_v46, %v873_v45  ;;  %v4012_v45 = vld [vmem:[%s5835_s3 + $0x28] ss:$16 sps:$4 sm:$0xff]  }
 0x101   : > { %v576_v52 = vpop.f32.mrb[12].mxu0  ;;  %v4556_v54 = vpack.c.bf16 %v876_v48, %v874_v47  ;;  %v4017_v47 = vld [vmem:[%s5835_s3 + $0x4c] ss:$16 sps:$4 sm:$0xff]  }
 0x102   : > { %v577_v55 = vadd.f32 %v576_v52, %v4510_v60  ;;  %v578_v56 = vpop.f32.mrb[13].mxu0 }
 0x103   : > { %v579_v62 = vadd.f32 %v578_v56, %v4514_v61  ;;  %v580_v63 = vpop.f32.mrb[14].mxu0 }
 0x104   : > { %v581_v0 = vadd.f32 %v580_v63, %v4510_v60  ;;  %v582_v1 = vpop.f32.mrb[15].mxu0  ;;  %v877_v4 = vmax.f32 %v577_v55, 0.0 }
 0x105   : > { %v583_v3 = vadd.f32 %v582_v1, %v4514_v61  ;;  %v878_v6 = vmax.f32 %v579_v62, 0.0 }
 0x106   : > { %v879_v5 = vmax.f32 %v581_v0, 0.0  ;;  %3621 = vmatmul.mubr.msk.bf16.gmra.mrb[120].mxu0 %vm415_vm0, %v377_v58  ;;  %v4015_v58 = vld [vmem:[%s5835_s3 + $0x48] ss:$16 sps:$4 sm:$0xff]   ;;  %v4020_v0 = vld [vmem:[%s5835_s3 + $0x6c] ss:$16 sps:$4 sm:$0xff]  }
 0x107   : > { %v880_v7 = vmax.f32 %v583_v3, 0.0  ;;  %854 = vmatprep.mubr.bf16.mxu0 %v5843_v2 }
 0x108   : > { %v4566_v10 = vpack.c.bf16 %v879_v5, %v877_v4 }
 0x109   : > { %v586_v11 = vpop.f32.mrb[16].mxu0  ;;  %v4568_v12 = vpack.c.bf16 %v880_v7, %v878_v6  ;;  %v4018_v7 = vld [vmem:[%s5835_s3 + $0x68] ss:$16 sps:$4 sm:$0xff]  }
 0x10a   : > { %v587_v13 = vadd.f32 %v586_v11, %v4510_v60  ;;  %v588_v14 = vpop.f32.mrb[17].mxu0 }
 0x10b   : > { %v589_v16 = vadd.f32 %v588_v14, %v4514_v61  ;;  %v590_v18 = vpop.f32.mrb[18].mxu0 }
 0x10c   : > { %v591_v20 = vadd.f32 %v590_v18, %v4510_v60  ;;  %v592_v21 = vpop.f32.mrb[19].mxu0  ;;  %v881_v23 = vmax.f32 %v587_v13, 0.0 }
 0x10d   : > { %v593_v22 = vadd.f32 %v592_v21, %v4514_v61  ;;  %v882_v25 = vmax.f32 %v589_v16, 0.0 }
 0x10e   : > { %v883_v24 = vmax.f32 %v591_v20, 0.0  ;;  %3622 = vmatmul.mubr.msk.bf16.gmra.mrb[124].mxu0 %vm415_vm0, %v378_v15  ;;  %v4021_v20 = vld [vmem:[%s5835_s3 + $0x88] ss:$16 sps:$4 sm:$0xff]  }
 0x10f   : > { %v884_v26 = vmax.f32 %v593_v22, 0.0  ;;  %1495 = vmatprep.mubr.bf16.mxu0 %v4532_v19 }
 0x110   : > { %v4576_v27 = vpack.c.bf16 %v883_v24, %v881_v23  ;;  %v4026_v23 = vld [vmem:[%s5835_s3 + $0xac] ss:$16 sps:$4 sm:$0xff]  }
 0x111   : > { %v596_v28 = vpop.f32.mrb[20].mxu0  ;;  %v4578_v29 = vpack.c.bf16 %v884_v26, %v882_v25 }
 0x112   : > { %v597_v30 = vadd.f32 %v596_v28, %v4510_v60  ;;  %v598_v31 = vpop.f32.mrb[21].mxu0 }
 0x113   : > { %v599_v32 = vadd.f32 %v598_v31, %v4514_v61  ;;  %v600_v33 = vpop.f32.mrb[22].mxu0  ;;  %v4024_v31 = vld [vmem:[%s5835_s3 + $0xa8] ss:$16 sps:$4 sm:$0xff]  }
 0x114   : > { %v601_v37 = vadd.f32 %v600_v33, %v4510_v60  ;;  %v602_v38 = vpop.f32.mrb[23].mxu0  ;;  %v885_v41 = vmax.f32 %v597_v30, 0.0  ;;  %v4029_v33 = vld [vmem:[%s5835_s3 + $0xcc] ss:$16 sps:$4 sm:$0xff]  }
 0x115   : > { %v603_v40 = vadd.f32 %v602_v38, %v4514_v61  ;;  %v886_v43 = vmax.f32 %v599_v32, 0.0 }
 0x116   : > { %v887_v42 = vmax.f32 %v601_v37, 0.0  ;;  %1496 = vmatmul.mubr.bf16.vlgmr.msra.gmra.mrb[128].mxu0 %v4530_v17 }
 0x117   : > { %v888_v44 = vmax.f32 %v603_v40, 0.0  ;;  %1505 = vmatprep.mubr.bf16.mxu0 %v4544_v36  ;;  %1817 = vmatpush1.bf16.msra.mxu0 %v4009_v35 }
 0x118   : > { %v4595_v46 = vpack.c.bf16 %v887_v42, %v885_v41  ;;  %1818 = vmatprep.subr.bf16.mxu0 %v4014_v39  ;;  %v4027_v42 = vld [vmem:[%s5835_s3 + $0xc8] ss:$16 sps:$4 sm:$0xff]  }
 0x119   : > { %v606_v48 = vpop.f32.mrb[24].mxu0  ;;  %v4600_v49 = vpack.c.bf16 %v888_v44, %v886_v43 }
 0x11a   : > { %v607_v50 = vadd.f32 %v606_v48, %v4510_v60  ;;  %v608_v52 = vpop.f32.mrb[25].mxu0 }
 0x11b   : > { %v609_v55 = vadd.f32 %v608_v52, %v4514_v61  ;;  %v610_v56 = vpop.f32.mrb[26].mxu0  ;;  %1819 = vmatpush1.bf16.msra.mxu0 %v4012_v45  ;;  %v4032_v45 = vld [vmem:[%s5835_s3 + $0xec] ss:$16 sps:$4 sm:$0xff]  }
 0x11c   : > { %v611_v62 = vadd.f32 %v610_v56, %v4510_v60  ;;  %v612_v63 = vpop.f32.mrb[27].mxu0  ;;  %1820 = vmatprep.subr.bf16.mxu0 %v4017_v47  ;;  %v889_v3 = vmax.f32 %v607_v50, 0.0  ;;  %v4030_v56 = vld [vmem:[%s5835_s3 + $0xe8] ss:$16 sps:$4 sm:$0xff]  }
 0x11d   : > { %v613_v1 = vadd.f32 %v612_v63, %v4514_v61  ;;  %v890_v5 = vmax.f32 %v609_v55, 0.0 }
 0x11e   : > { %v891_v4 = vmax.f32 %v611_v62, 0.0  ;;  %1506 = vmatmul.mubr.bf16.gmra.mrb[132].mxu0 %v4542_v34  ;;  %v4036_v62 = vld [vmem:[%s5835_s3 + $0x10c] ss:$16 sps:$4 sm:$0xff]  }
 0x11f   : > { %v892_v6 = vmax.f32 %v613_v1, 0.0  ;;  %1515 = vmatprep.mubr.bf16.mxu0 %v4556_v54  ;;  %1821 = vmatpush1.bf16.msra.mxu0 %v4015_v58 }
 0x120   : > { %v4617_v8 = vpack.c.bf16 %v891_v4, %v889_v3  ;;  %1822 = vmatprep.subr.bf16.mxu0 %v4020_v0 }
 0x121   : > { %v616_v11 = vpop.f32.mrb[28].mxu0  ;;  %v4622_v13 = vpack.c.bf16 %v892_v6, %v890_v5  ;;  %v4034_v6 = vld [vmem:[%s5835_s3 + $0x108] ss:$16 sps:$4 sm:$0xff]  }
 0x122   : > { %v617_v14 = vadd.f32 %v616_v11, %v4510_v60  ;;  %v618_v15 = vpop.f32.mrb[29].mxu0  ;;  %v4039_v11 = vld [vmem:[%s5835_s3 + $0x12c] ss:$16 sps:$4 sm:$0xff]  }
 0x123   : > { %v619_v16 = vadd.f32 %v618_v15, %v4514_v61  ;;  %v620_v18 = vpop.f32.mrb[30].mxu0  ;;  %1823 = vmatpush1.bf16.msra.mxu0 %v4018_v7 }
 0x124   : > { %v621_v21 = vadd.f32 %v620_v18, %v4510_v60  ;;  %v622_v22 = vpop.f32.mrb[31].mxu0  ;;  %1824 = vmatprep.subr.bf16.mxu0 %v4023_v9  ;;  %v893_v25 = vmax.f32 %v617_v14, 0.0 }
 0x125   : > { %v623_v24 = vadd.f32 %v622_v22, %v4514_v61  ;;  %v894_v28 = vmax.f32 %v619_v16, 0.0 }
 0x126   : > { %v895_v26 = vmax.f32 %v621_v21, 0.0  ;;  %1516 = vmatmul.mubr.bf16.gmra.mrb[136].mxu0 %v4554_v51  ;;  %v4037_v21 = vld [vmem:[%s5835_s3 + $0x128] ss:$16 sps:$4 sm:$0xff]  }
 0x127   : > { %v896_v30 = vmax.f32 %v623_v24, 0.0  ;;  %1525 = vmatprep.mubr.bf16.mxu0 %v4568_v12  ;;  %1825 = vmatpush1.bf16.msra.mxu0 %v4021_v20 }
 0x128   : > { %v4639_v32 = vpack.c.bf16 %v895_v26, %v893_v25  ;;  %1826 = vmatprep.subr.bf16.mxu0 %v4026_v23  ;;  %v4043_v23 = vld [vmem:[%s5835_s3 + $0x14c] ss:$16 sps:$4 sm:$0xff]  }
 0x129   : > { %v626_v35 = vpop.f32.mrb[32].mxu0  ;;  %v4644_v37 = vpack.c.bf16 %v896_v30, %v894_v28 }
 0x12a   : > { %v627_v38 = vadd.f32 %v626_v35, %v4510_v60  ;;  %v628_v39 = vpop.f32.mrb[33].mxu0 }
 0x12b   : > { %v629_v40 = vadd.f32 %v628_v39, %v4514_v61  ;;  %v630_v41 = vpop.f32.mrb[34].mxu0  ;;  %1827 = vmatpush1.bf16.msra.mxu0 %v4024_v31  ;;  %v4046_v39 = vld [vmem:[%s5835_s3 + $0x16c] ss:$16 sps:$4 sm:$0xff]  }
 0x12c   : > { %v631_v43 = vadd.f32 %v630_v41, %v4510_v60  ;;  %v632_v44 = vpop.f32.mrb[35].mxu0  ;;  %1828 = vmatprep.subr.bf16.mxu0 %v4029_v33  ;;  %v897_v48 = vmax.f32 %v627_v38, 0.0  ;;  %v4041_v33 = vld [vmem:[%s5835_s3 + $0x148] ss:$16 sps:$4 sm:$0xff]  }
 0x12d   : > { %v633_v47 = vadd.f32 %v632_v44, %v4514_v61  ;;  %v898_v52 = vmax.f32 %v629_v40, 0.0 }
 0x12e   : > { %v899_v50 = vmax.f32 %v631_v43, 0.0  ;;  %1526 = vmatmul.mubr.bf16.gmra.mrb[140].mxu0 %v4566_v10 }
 0x12f   : > { %v900_v55 = vmax.f32 %v633_v47, 0.0  ;;  %1535 = vmatprep.mubr.bf16.mxu0 %v4578_v29  ;;  %1829 = vmatpush1.bf16.msra.mxu0 %v4027_v42 }
 0x130   : > { %v4661_v58 = vpack.c.bf16 %v899_v50, %v897_v48  ;;  %1830 = vmatprep.subr.bf16.mxu0 %v4032_v45  ;;  %v4044_v45 = vld [vmem:[%s5835_s3 + $0x168] ss:$16 sps:$4 sm:$0xff]   ;;  %v4050_v48 = vld [vmem:[%s5835_s3 + $0x18c] ss:$16 sps:$4 sm:$0xff]  }
 0x131   : > { %v636_v63 = vpop.f32.mrb[36].mxu0  ;;  %v4666_v0 = vpack.c.bf16 %v900_v55, %v898_v52 }
 0x132   : > { %v637_v1 = vadd.f32 %v636_v63, %v4510_v60  ;;  %v638_v3 = vpop.f32.mrb[37].mxu0 }
 0x133   : > { %v639_v4 = vadd.f32 %v638_v3, %v4514_v61  ;;  %v640_v5 = vpop.f32.mrb[38].mxu0  ;;  %1831 = vmatpush1.bf16.msra.mxu0 %v4030_v56 }
 0x134   : > { %v641_v7 = vadd.f32 %v640_v5, %v4510_v60  ;;  %v642_v9 = vpop.f32.mrb[39].mxu0  ;;  %1832 = vmatprep.subr.bf16.mxu0 %v4036_v62  ;;  %v901_v15 = vmax.f32 %v637_v1, 0.0  ;;  %v4048_v1 = vld [vmem:[%s5835_s3 + $0x188] ss:$16 sps:$4 sm:$0xff]   ;;  %v4054_v5 = vld [vmem:[%s5835_s3 + $0x1ac] ss:$16 sps:$4 sm:$0xff]  }
 0x135   : > { %v643_v14 = vadd.f32 %v642_v9, %v4514_v61  ;;  %v902_v18 = vmax.f32 %v639_v4, 0.0 }
 0x136   : > { %v903_v16 = vmax.f32 %v641_v7, 0.0  ;;  %1536 = vmatmul.mubr.bf16.gmra.mrb[144].mxu0 %v4576_v27 }
 0x137   : > { %v904_v20 = vmax.f32 %v643_v14, 0.0  ;;  %1545 = vmatprep.mubr.bf16.mxu0 %v4600_v49  ;;  %1833 = vmatpush1.bf16.msra.mxu0 %v4034_v6 }
 0x138   : > { %v4683_v22 = vpack.c.bf16 %v903_v16, %v901_v15  ;;  %1834 = vmatprep.subr.bf16.mxu0 %v4039_v11  ;;  %v4052_v15 = vld [vmem:[%s5835_s3 + $0x1a8] ss:$16 sps:$4 sm:$0xff]  }
 0x139   : > { %v646_v24 = vpop.f32.mrb[40].mxu0  ;;  %v4688_v25 = vpack.c.bf16 %v904_v20, %v902_v18  ;;  %v4057_v18 = vld [vmem:[%s5835_s3 + $0x1cc] ss:$16 sps:$4 sm:$0xff]  }
 0x13a   : > { %v647_v26 = vadd.f32 %v646_v24, %v4510_v60  ;;  %v648_v28 = vpop.f32.mrb[41].mxu0 }
 0x13b   : > { %v649_v30 = vadd.f32 %v648_v28, %v4514_v61  ;;  %v650_v31 = vpop.f32.mrb[42].mxu0  ;;  %1835 = vmatpush1.bf16.msra.mxu0 %v4037_v21 }
 0x13c   : > { %v651_v35 = vadd.f32 %v650_v31, %v4510_v60  ;;  %v652_v38 = vpop.f32.mrb[43].mxu0  ;;  %1836 = vmatprep.subr.bf16.mxu0 %v4043_v23  ;;  %v905_v41 = vmax.f32 %v647_v26, 0.0 }
 0x13d   : > { %v653_v40 = vadd.f32 %v652_v38, %v4514_v61  ;;  %v906_v43 = vmax.f32 %v649_v30, 0.0  ;;  %v4055_v30 = vld [vmem:[%s5835_s3 + $0x1c8] ss:$16 sps:$4 sm:$0xff]  }
 0x13e   : > { %v907_v42 = vmax.f32 %v651_v35, 0.0  ;;  %1546 = vmatmul.mubr.bf16.gmra.mrb[148].mxu0 %v4595_v46  ;;  %v4061_v35 = vld [vmem:[%s5835_s3 + $0x1ec] ss:$16 sps:$4 sm:$0xff]  }
 0x13f   : > { %v908_v44 = vmax.f32 %v653_v40, 0.0  ;;  %1555 = vmatprep.mubr.bf16.mxu0 %v4622_v13  ;;  %1837 = vmatpush1.bf16.msra.mxu0 %v4041_v33 }
 0x140   : > { %v4705_v47 = vpack.c.bf16 %v907_v42, %v905_v41  ;;  %1838 = vmatprep.subr.bf16.mxu0 %v4046_v39 }
 0x141   : > { %v656_v50 = vpop.f32.mrb[44].mxu0  ;;  %v4710_v52 = vpack.c.bf16 %v908_v44, %v906_v43  ;;  %v4059_v43 = vld [vmem:[%s5835_s3 + $0x1e8] ss:$16 sps:$4 sm:$0xff]  }
 0x142   : > { %v657_v55 = vadd.f32 %v656_v50, %v4510_v60  ;;  %v658_v56 = vpop.f32.mrb[45].mxu0 }
 0x143   : > { %v659_v62 = vadd.f32 %v658_v56, %v4514_v61  ;;  %v660_v63 = vpop.f32.mrb[46].mxu0  ;;  %1839 = vmatpush1.bf16.msra.mxu0 %v4044_v45 }
 0x144   : > { %v661_v3 = vadd.f32 %v660_v63, %v4510_v60  ;;  %v662_v4 = vpop.f32.mrb[47].mxu0  ;;  %1840 = vmatprep.subr.bf16.mxu0 %v4050_v48  ;;  %v909_v7 = vmax.f32 %v657_v55, 0.0 }
 0x145   : > { %v663_v6 = vadd.f32 %v662_v4, %v4514_v61  ;;  %v910_v11 = vmax.f32 %v659_v62, 0.0 }
 0x146   : > { %v911_v9 = vmax.f32 %v661_v3, 0.0  ;;  %1556 = vmatmul.mubr.bf16.gmra.mrb[152].mxu0 %v4617_v8 }
 0x147   : > { %v912_v14 = vmax.f32 %v663_v6, 0.0  ;;  %1565 = vmatprep.mubr.bf16.mxu0 %v4644_v37  ;;  %1841 = vmatpush1.bf16.msra.mxu0 %v4048_v1 }
 0x148   : > { %v4727_v16 = vpack.c.bf16 %v911_v9, %v909_v7  ;;  %1842 = vmatprep.subr.bf16.mxu0 %v4054_v5 }
 0x149   : > { %v666_v20 = vpop.f32.mrb[48].mxu0  ;;  %v4732_v21 = vpack.c.bf16 %v912_v14, %v910_v11 }
 0x14a   : > { %v667_v23 = vadd.f32 %v666_v20, %v4510_v60  ;;  %v668_v24 = vpop.f32.mrb[49].mxu0 }
 0x14b   : > { %v669_v26 = vadd.f32 %v668_v24, %v4514_v61  ;;  %v670_v28 = vpop.f32.mrb[50].mxu0  ;;  %1843 = vmatpush1.bf16.msra.mxu0 %v4052_v15 }
 0x14c   : > { %v671_v31 = vadd.f32 %v670_v28, %v4510_v60  ;;  %v672_v33 = vpop.f32.mrb[51].mxu0  ;;  %1844 = vmatprep.subr.bf16.mxu0 %v4057_v18  ;;  %v913_v39 = vmax.f32 %v667_v23, 0.0 }
 0x14d   : > { %v673_v38 = vadd.f32 %v672_v33, %v4514_v61  ;;  %v914_v41 = vmax.f32 %v669_v26, 0.0 }
 0x14e   : > { %v915_v40 = vmax.f32 %v671_v31, 0.0  ;;  %1566 = vmatmul.mubr.bf16.gmra.mrb[156].mxu0 %v4639_v32 }
 0x14f   : > { %v916_v42 = vmax.f32 %v673_v38, 0.0  ;;  %1575 = vmatprep.mubr.bf16.mxu0 %v4666_v0  ;;  %1845 = vmatpush1.bf16.msra.mxu0 %v4055_v30 }
 0x150   : > { %v4749_v44 = vpack.c.bf16 %v915_v40, %v913_v39  ;;  %1846 = vmatprep.subr.bf16.mxu0 %v4061_v35 }
 0x151   : > { %v676_v45 = vpop.f32.mrb[52].mxu0  ;;  %v4751_v48 = vpack.c.bf16 %v916_v42, %v914_v41 }
 0x152   : > { %v677_v50 = vadd.f32 %v676_v45, %v4510_v60  ;;  %v678_v55 = vpop.f32.mrb[53].mxu0 }
 0x153   : > { %v679_v56 = vadd.f32 %v678_v55, %v4514_v61  ;;  %v680_v62 = vpop.f32.mrb[54].mxu0  ;;  %1847 = vmatpush1.bf16.msra.mxu0 %v4059_v43 }
 0x154   : > { %v681_v63 = vadd.f32 %v680_v62, %v4510_v60  ;;  %v682_v1 = vpop.f32.mrb[55].mxu0  ;;  %v917_v4 = vmax.f32 %v677_v50, 0.0 }
 0x155   : > { %v683_v3 = vadd.f32 %v682_v1, %v4514_v61  ;;  %v918_v6 = vmax.f32 %v679_v56, 0.0 }
 0x156   : > { %v919_v5 = vmax.f32 %v681_v63, 0.0  ;;  %1576 = vmatmul.mubr.bf16.gmra.mrb[160].mxu0 %v4661_v58 }
 0x157   : > { %v920_v7 = vmax.f32 %v683_v3, 0.0  ;;  %1585 = vmatprep.mubr.bf16.mxu0 %v4688_v25 }
 0x158   : > { %v4759_v9 = vpack.c.bf16 %v919_v5, %v917_v4 }
 0x159   : > { %v686_v11 = vpop.f32.mrb[56].mxu0  ;;  %v4761_v14 = vpack.c.bf16 %v920_v7, %v918_v6 }
 0x15a   : > { %v687_v15 = vadd.f32 %v686_v11, %v4510_v60  ;;  %v688_v18 = vpop.f32.mrb[57].mxu0 }
 0x15b   : > { %v689_v20 = vadd.f32 %v688_v18, %v4514_v61  ;;  %v690_v23 = vpop.f32.mrb[58].mxu0 }
 0x15c   : > { %v691_v24 = vadd.f32 %v690_v23, %v4510_v60  ;;  %v692_v26 = vpop.f32.mrb[59].mxu0  ;;  %v921_v30 = vmax.f32 %v687_v15, 0.0 }
 0x15d   : > { %v693_v28 = vadd.f32 %v692_v26, %v4514_v61  ;;  %v922_v33 = vmax.f32 %v689_v20, 0.0 }
 0x15e   : > { %v923_v31 = vmax.f32 %v691_v24, 0.0  ;;  %1586 = vmatmul.mubr.bf16.gmra.mrb[164].mxu0 %v4683_v22 }
 0x15f   : > { %v924_v35 = vmax.f32 %v693_v28, 0.0  ;;  %1595 = vmatprep.mubr.bf16.mxu0 %v4710_v52 }
 0x160   : > { %v4769_v38 = vpack.c.bf16 %v923_v31, %v921_v30 }
 0x161   : > { %v696_v39 = vpop.f32.mrb[60].mxu0  ;;  %v4771_v40 = vpack.c.bf16 %v924_v35, %v922_v33 }
 0x162   : > { %v697_v41 = vadd.f32 %v696_v39, %v4510_v60  ;;  %v698_v42 = vpop.f32.mrb[61].mxu0 }
 0x163   : > { %v699_v43 = vadd.f32 %v698_v42, %v4514_v61  ;;  %v700_v45 = vpop.f32.mrb[62].mxu0 }
 0x164   : > { %v701_v50 = vadd.f32 %v700_v45, %v4510_v60  ;;  %v702_v55 = vpop.f32.mrb[63].mxu0  ;;  %v925_v62 = vmax.f32 %v697_v41, 0.0 }
 0x165   : > { %v703_v56 = vadd.f32 %v702_v55, %v4514_v61  ;;  %v926_v1 = vmax.f32 %v699_v43, 0.0 }
 0x166   : > { %v927_v63 = vmax.f32 %v701_v50, 0.0  ;;  %1596 = vmatmul.mubr.bf16.gmra.mrb[168].mxu0 %v4705_v47 }
 0x167   : > { %v928_v3 = vmax.f32 %v703_v56, 0.0  ;;  %1605 = vmatprep.mubr.bf16.mxu0 %v4732_v21 }
 0x168   : > { %v4779_v4 = vpack.c.bf16 %v927_v63, %v925_v62 }
 0x169   : > { %v706_v5 = vpop.f32.mrb[64].mxu0  ;;  %v4781_v6 = vpack.c.bf16 %v928_v3, %v926_v1 }
 0x16a   : > { %v707_v7 = vadd.f32 %v706_v5, %v4510_v60  ;;  %v708_v11 = vpop.f32.mrb[65].mxu0 }
 0x16b   : > { %v709_v15 = vadd.f32 %v708_v11, %v4514_v61  ;;  %v710_v18 = vpop.f32.mrb[66].mxu0 }
 0x16c   : > { %v711_v20 = vadd.f32 %v710_v18, %v4510_v60  ;;  %v712_v23 = vpop.f32.mrb[67].mxu0  ;;  %v929_v26 = vmax.f32 %v707_v7, 0.0 }
 0x16d   : > { %v713_v24 = vadd.f32 %v712_v23, %v4514_v61  ;;  %v930_v30 = vmax.f32 %v709_v15, 0.0 }
 0x16e   : > { %v931_v28 = vmax.f32 %v711_v20, 0.0  ;;  %1606 = vmatmul.mubr.bf16.gmra.mrb[172].mxu0 %v4727_v16 }
 0x16f   : > { %v932_v31 = vmax.f32 %v713_v24, 0.0  ;;  %1615 = vmatprep.mubr.bf16.mxu0 %v4751_v48 }
 0x170   : > { %v4789_v33 = vpack.c.bf16 %v931_v28, %v929_v26 }
 0x171   : > { %v716_v35 = vpop.f32.mrb[68].mxu0  ;;  %v4791_v39 = vpack.c.bf16 %v932_v31, %v930_v30 }
 0x172   : > { %v717_v41 = vadd.f32 %v716_v35, %v4510_v60  ;;  %v718_v42 = vpop.f32.mrb[69].mxu0 }
 0x173   : > { %v719_v43 = vadd.f32 %v718_v42, %v4514_v61  ;;  %v720_v45 = vpop.f32.mrb[70].mxu0 }
 0x174   : > { %v721_v50 = vadd.f32 %v720_v45, %v4510_v60  ;;  %v722_v55 = vpop.f32.mrb[71].mxu0  ;;  %v933_v62 = vmax.f32 %v717_v41, 0.0 }
 0x175   : > { %v723_v56 = vadd.f32 %v722_v55, %v4514_v61  ;;  %v934_v1 = vmax.f32 %v719_v43, 0.0 }
 0x176   : > { %v935_v63 = vmax.f32 %v721_v50, 0.0  ;;  %1616 = vmatmul.mubr.bf16.gmra.mrb[176].mxu0 %v4749_v44 }
 0x177   : > { %v936_v3 = vmax.f32 %v723_v56, 0.0  ;;  %1625 = vmatprep.mubr.bf16.mxu0 %v4761_v14 }
 0x178   : > { %v4799_v5 = vpack.c.bf16 %v935_v63, %v933_v62 }
 0x179   : > { %v726_v7 = vpop.f32.mrb[72].mxu0  ;;  %v4801_v11 = vpack.c.bf16 %v936_v3, %v934_v1 }
 0x17a   : > { %v727_v15 = vadd.f32 %v726_v7, %v4510_v60  ;;  %v728_v18 = vpop.f32.mrb[73].mxu0 }
 0x17b   : > { %v729_v20 = vadd.f32 %v728_v18, %v4514_v61  ;;  %v730_v23 = vpop.f32.mrb[74].mxu0 }
 0x17c   : > { %v731_v24 = vadd.f32 %v730_v23, %v4510_v60  ;;  %v732_v26 = vpop.f32.mrb[75].mxu0  ;;  %v937_v30 = vmax.f32 %v727_v15, 0.0 }
 0x17d   : > { %v733_v28 = vadd.f32 %v732_v26, %v4514_v61  ;;  %v938_v35 = vmax.f32 %v729_v20, 0.0 }
 0x17e   : > { %v939_v31 = vmax.f32 %v731_v24, 0.0  ;;  %1626 = vmatmul.mubr.bf16.gmra.mrb[180].mxu0 %v4759_v9 }
 0x17f   : > { %v940_v41 = vmax.f32 %v733_v28, 0.0  ;;  %1635 = vmatprep.mubr.bf16.mxu0 %v4771_v40  ;;  %v4033_v28 = vld [vmem:[%s5837_s5] sm:$0xff]  }
 0x180   : > { %v4809_v42 = vpack.c.bf16 %v939_v31, %v937_v30 }
 0x181   : > { %v736_v43 = vpop.f32.mrb[76].mxu0  ;;  %v4811_v45 = vpack.c.bf16 %v940_v41, %v938_v35 }
 0x182   : > { %v737_v50 = vadd.f32 %v736_v43, %v4510_v60  ;;  %v738_v55 = vpop.f32.mrb[77].mxu0 }
 0x183   : > { %v739_v56 = vadd.f32 %v738_v55, %v4514_v61  ;;  %v740_v62 = vpop.f32.mrb[78].mxu0 }
 0x184   : > { %v741_v63 = vadd.f32 %v740_v62, %v4510_v60  ;;  %v742_v1 = vpop.f32.mrb[79].mxu0  ;;  %v941_v7 = vmax.f32 %v737_v50, 0.0 }
 0x185   : > { %v743_v3 = vadd.f32 %v742_v1, %v4514_v61  ;;  %v942_v18 = vmax.f32 %v739_v56, 0.0  ;;  %v4040_v56 = vld [vmem:[%s5837_s5 + $0x8] sm:$0xff]  }
 0x186   : > { %v943_v15 = vmax.f32 %v741_v63, 0.0  ;;  %1636 = vmatmul.mubr.bf16.gmra.mrb[184].mxu0 %v4769_v38 }
 0x187   : > { %v944_v20 = vmax.f32 %v743_v3, 0.0  ;;  %1645 = vmatprep.mubr.bf16.mxu0 %v4781_v6 }
 0x188   : > { %v4819_v23 = vpack.c.bf16 %v943_v15, %v941_v7 }
 0x189   : > { %v746_v24 = vpop.f32.mrb[80].mxu0  ;;  %v4821_v26 = vpack.c.bf16 %v944_v20, %v942_v18  ;;  %v4047_v20 = vld [vmem:[%s5837_s5 + $0x10] sm:$0xff]  }
 0x18a   : > { %v747_v30 = vadd.f32 %v746_v24, %v4510_v60  ;;  %v748_v31 = vpop.f32.mrb[81].mxu0 }
 0x18b   : > { %v749_v35 = vadd.f32 %v748_v31, %v4514_v61  ;;  %v750_v41 = vpop.f32.mrb[82].mxu0  ;;  %1685 = vmatprep.mubr.bf16.mxu1 %v4821_v26 }
 0x18c   : > { %v751_v43 = vadd.f32 %v750_v41, %v4510_v60  ;;  %v752_v50 = vpop.f32.mrb[83].mxu0  ;;  %1686 = vmatmul.mubr.bf16.vlgmr.msra.gmra.mrb[0].mxu1 %v4819_v23  ;;  %v945_v62 = vmax.f32 %v747_v30, 0.0 }
 0x18d   : > { %v753_v55 = vadd.f32 %v752_v50, %v4514_v61  ;;  %2817 = vmatpush1.bf16.msra.mxu1 %v4033_v28  ;;  %v946_v1 = vmax.f32 %v749_v35, 0.0  ;;  %v4051_v50 = vld [vmem:[%s5837_s5 + $0x18] sm:$0xff]  }
 0x18e   : > { %v947_v63 = vmax.f32 %v751_v43, 0.0  ;;  %1646 = vmatmul.mubr.bf16.gmra.mrb[188].mxu0 %v4779_v4  ;;  %2818 = vmatprep.subr.bf16.mxu1 %v5843_v2 }
 0x18f   : > { %v948_v3 = vmax.f32 %v753_v55, 0.0  ;;  %1655 = vmatprep.mubr.bf16.mxu0 %v4791_v39 }
 0x190   : > { %v4838_v7 = vpack.c.bf16 %v947_v63, %v945_v62 }
 0x191   : > { %v4840_v15 = vpack.c.bf16 %v948_v3, %v946_v1  ;;  %v756_v18 = vpop.f32.mrb[84].mxu0  ;;  %2819 = vmatpush1.bf16.msra.mxu1 %v4040_v56 }
 0x192   : > { %v757_v24 = vadd.f32 %v756_v18, %v4510_v60  ;;  %v758_v28 = vpop.f32.mrb[85].mxu0  ;;  %2820 = vmatprep.subr.bf16.mxu1 %v5843_v2 }
 0x193   : > { %v759_v30 = vadd.f32 %v758_v28, %v4514_v61  ;;  %v760_v31 = vpop.f32.mrb[86].mxu0  ;;  %1695 = vmatprep.mubr.bf16.mxu1 %v4840_v15 }
 0x194   : > { %v761_v35 = vadd.f32 %v760_v31, %v4510_v60  ;;  %v762_v41 = vpop.f32.mrb[87].mxu0  ;;  %1696 = vmatmul.mubr.bf16.gmra.mrb[4].mxu1 %v4838_v7  ;;  %v949_v55 = vmax.f32 %v757_v24, 0.0 }
 0x195   : > { %v763_v43 = vadd.f32 %v762_v41, %v4514_v61  ;;  %2821 = vmatpush1.bf16.msra.mxu1 %v4047_v20  ;;  %v950_v62 = vmax.f32 %v759_v30, 0.0  ;;  %v4058_v20 = vld [vmem:[%s5837_s5 + $0x20] sm:$0xff]  }
 0x196   : > { %v951_v56 = vmax.f32 %v761_v35, 0.0  ;;  %1656 = vmatmul.mubr.bf16.gmra.mrb[192].mxu0 %v4789_v33  ;;  %2822 = vmatprep.subr.bf16.mxu1 %v5843_v2 }
 0x197   : > { %v952_v63 = vmax.f32 %v763_v43, 0.0  ;;  %1665 = vmatprep.mubr.bf16.mxu0 %v4801_v11 }
 0x198   : > { %v4858_v1 = vpack.c.bf16 %v951_v56, %v949_v55 }
 0x199   : > { %v4860_v3 = vpack.c.bf16 %v952_v63, %v950_v62  ;;  %v766_v18 = vpop.f32.mrb[88].mxu0  ;;  %2823 = vmatpush1.bf16.msra.mxu1 %v4051_v50  ;;  %v4062_v50 = vld [vmem:[%s5837_s5 + $0x28] sm:$0xff]  }
 0x19a   : > { %v767_v24 = vadd.f32 %v766_v18, %v4510_v60  ;;  %v768_v28 = vpop.f32.mrb[89].mxu0  ;;  %2824 = vmatprep.subr.bf16.mxu1 %v5843_v2 }
 0x19b   : > { %v769_v30 = vadd.f32 %v768_v28, %v4514_v61  ;;  %v770_v31 = vpop.f32.mrb[90].mxu0  ;;  %1705 = vmatprep.mubr.bf16.mxu1 %v4860_v3 }
 0x19c   : > { %v771_v35 = vadd.f32 %v770_v31, %v4510_v60  ;;  %v772_v41 = vpop.f32.mrb[91].mxu0  ;;  %1706 = vmatmul.mubr.bf16.gmra.mrb[8].mxu1 %v4858_v1  ;;  %v953_v55 = vmax.f32 %v767_v24, 0.0 }
 0x19d   : > { %v773_v43 = vadd.f32 %v772_v41, %v4514_v61  ;;  %2825 = vmatpush1.bf16.msra.mxu1 %v4058_v20  ;;  %v954_v62 = vmax.f32 %v769_v30, 0.0  ;;  %v4063_v20 = vld [vmem:[%s5837_s5 + $0x30] sm:$0xff]  }
 0x19e   : > { %v955_v56 = vmax.f32 %v771_v35, 0.0  ;;  %1666 = vmatmul.mubr.bf16.gmra.mrb[196].mxu0 %v4799_v5  ;;  %2826 = vmatprep.subr.bf16.mxu1 %v5843_v2 }
 0x19f   : > { %v956_v63 = vmax.f32 %v773_v43, 0.0  ;;  %1675 = vmatprep.mubr.bf16.mxu0 %v4811_v45 }
 0x1a0   : > { %v4878_v18 = vpack.c.bf16 %v955_v56, %v953_v55  ;;  %v4064_v56 = vld [vmem:[%s5837_s5 + $0x38] sm:$0xff]  }
 0x1a1   : > { %v4880_v28 = vpack.c.bf16 %v956_v63, %v954_v62  ;;  %v776_v31 = vpop.f32.mrb[92].mxu0  ;;  %2827 = vmatpush1.bf16.msra.mxu1 %v4062_v50 }
 0x1a2   : > { %v777_v24 = vadd.f32 %v776_v31, %v4510_v60  ;;  %v778_v35 = vpop.f32.mrb[93].mxu0  ;;  %2828 = vmatprep.subr.bf16.mxu1 %v5843_v2 }
 0x1a3   : > { %v779_v30 = vadd.f32 %v778_v35, %v4514_v61  ;;  %v780_v41 = vpop.f32.mrb[94].mxu0  ;;  %1715 = vmatprep.mubr.bf16.mxu1 %v4880_v28 }
 0x1a4   : > { %v781_v43 = vadd.f32 %v780_v41, %v4510_v60  ;;  %v782_v55 = vpop.f32.mrb[95].mxu0  ;;  %1716 = vmatmul.mubr.bf16.gmra.mrb[12].mxu1 %v4878_v18  ;;  %v957_v62 = vmax.f32 %v777_v24, 0.0 }
 0x1a5   : > { %v783_v50 = vadd.f32 %v782_v55, %v4514_v61  ;;  %2829 = vmatpush1.bf16.msra.mxu1 %v4063_v20  ;;  %v958_v31 = vmax.f32 %v779_v30, 0.0  ;;  %v4065_v20 = vld [vmem:[%s5837_s5 + $0x40] sm:$0xff]  }
 0x1a6   : > { %v959_v63 = vmax.f32 %v781_v43, 0.0  ;;  %1676 = vmatmul.mubr.bf16.gmra.mrb[200].mxu0 %v4809_v42  ;;  %2830 = vmatprep.subr.bf16.mxu1 %v5843_v2 }
 0x1a7   : > { %v960_v35 = vmax.f32 %v783_v50, 0.0  ;;  %1848 = vmatprep.mubr.bf16.mxu0 %v4532_v19 }
 0x1a8   : > { %v4898_v41 = vpack.c.bf16 %v959_v63, %v957_v62  ;;  %v4066_v63 = vld [vmem:[%s5837_s5 + $0x48] sm:$0xff]  }
 0x1a9   : > { %v4900_v59 = vpack.c.bf16 %v960_v35, %v958_v31  ;;  %v786_v55 = vpop.f32.mrb[96].mxu0  ;;  %2831 = vmatpush1.bf16.msra.mxu1 %v4064_v56 }
 0x1aa   : > { %v787_v24 = vadd.f32 %v786_v55, %v4510_v60  ;;  %v788_v43 = vpop.f32.mrb[97].mxu0  ;;  %2832 = vmatprep.subr.bf16.mxu1 %v5843_v2 }
 0x1ab   : > { %v789_v30 = vadd.f32 %v788_v43, %v4514_v61  ;;  %v790_v50 = vpop.f32.mrb[98].mxu0  ;;  %1725 = vmatprep.mubr.bf16.mxu1 %v4900_v59 }
 0x1ac   : > { %v791_v19 = vadd.f32 %v790_v50, %v4510_v60  ;;  %v792_v62 = vpop.f32.mrb[99].mxu0  ;;  %1726 = vmatmul.mubr.bf16.gmra.mrb[16].mxu1 %v4898_v41  ;;  %v961_v31 = vmax.f32 %v787_v24, 0.0 }
 0x1ad   : > { %v793_v56 = vadd.f32 %v792_v62, %v4514_v61  ;;  %2833 = vmatpush1.bf16.msra.mxu1 %v4065_v20  ;;  %v962_v55 = vmax.f32 %v789_v30, 0.0  ;;  %v4067_v20 = vld [vmem:[%s5837_s5 + $0x50] sm:$0xff]  }
 0x1ae   : > { %v963_v35 = vmax.f32 %v791_v19, 0.0  ;;  %1849 = vmatmul.mubr.bf16.vlgmr.msra.gmra.mrb[204].mxu0 %v4530_v17  ;;  %2834 = vmatprep.subr.bf16.mxu1 %v5843_v2 }
 0x1af   : > { %v964_v43 = vmax.f32 %v793_v56, 0.0  ;;  %1858 = vmatprep.mubr.bf16.mxu0 %v4544_v36 }
 0x1b0   : > { %v4918_v50 = vpack.c.bf16 %v963_v35, %v961_v31  ;;  %v4068_v31 = vld [vmem:[%s5837_s5 + $0x58] sm:$0xff]  }
 0x1b1   : > { %v4920_v57 = vpack.c.bf16 %v964_v43, %v962_v55  ;;  %v796_v62 = vpop.f32.mrb[100].mxu0  ;;  %2835 = vmatpush1.bf16.msra.mxu1 %v4066_v63 }
 0x1b2   : > { %v797_v24 = vadd.f32 %v796_v62, %v4510_v60  ;;  %v798_v19 = vpop.f32.mrb[101].mxu0  ;;  %2836 = vmatprep.subr.bf16.mxu1 %v5843_v2 }
 0x1b3   : > { %v799_v17 = vadd.f32 %v798_v19, %v4514_v61  ;;  %v800_v30 = vpop.f32.mrb[102].mxu0  ;;  %1735 = vmatprep.mubr.bf16.mxu1 %v4920_v57 }
 0x1b4   : > { %v801_v36 = vadd.f32 %v800_v30, %v4510_v60  ;;  %v802_v56 = vpop.f32.mrb[103].mxu0  ;;  %1736 = vmatmul.mubr.bf16.gmra.mrb[20].mxu1 %v4918_v50  ;;  %v965_v35 = vmax.f32 %v797_v24, 0.0 }
 0x1b5   : > { %v803_v63 = vadd.f32 %v802_v56, %v4514_v61  ;;  %2837 = vmatpush1.bf16.msra.mxu1 %v4067_v20  ;;  %v966_v43 = vmax.f32 %v799_v17, 0.0  ;;  %v4069_v20 = vld [vmem:[%s5837_s5 + $0x60] sm:$0xff]  }
 0x1b6   : > { %v967_v55 = vmax.f32 %v801_v36, 0.0  ;;  %1859 = vmatmul.mubr.bf16.gmra.mrb[208].mxu0 %v4542_v34  ;;  %2838 = vmatprep.subr.bf16.mxu1 %v5843_v2 }
 0x1b7   : > { %v968_v62 = vmax.f32 %v803_v63, 0.0  ;;  %1868 = vmatprep.mubr.bf16.mxu0 %v4556_v54 }
 0x1b8   : > { %v4938_v19 = vpack.c.bf16 %v967_v55, %v965_v35  ;;  %v4070_v35 = vld [vmem:[%s5837_s5 + $0x68] sm:$0xff]  }
 0x1b9   : > { %v4940_v30 = vpack.c.bf16 %v968_v62, %v966_v43  ;;  %v806_v56 = vpop.f32.mrb[104].mxu0  ;;  %2839 = vmatpush1.bf16.msra.mxu1 %v4068_v31 }
 0x1ba   : > { %v807_v24 = vadd.f32 %v806_v56, %v4510_v60  ;;  %v808_v36 = vpop.f32.mrb[105].mxu0  ;;  %2840 = vmatprep.subr.bf16.mxu1 %v5843_v2 }
 0x1bb   : > { %v809_v34 = vadd.f32 %v808_v36, %v4514_v61  ;;  %v810_v17 = vpop.f32.mrb[106].mxu0  ;;  %1745 = vmatprep.mubr.bf16.mxu1 %v4940_v30 }
 0x1bc   : > { %v811_v54 = vadd.f32 %v810_v17, %v4510_v60  ;;  %v812_v63 = vpop.f32.mrb[107].mxu0  ;;  %1746 = vmatmul.mubr.bf16.gmra.mrb[24].mxu1 %v4938_v19  ;;  %v969_v55 = vmax.f32 %v807_v24, 0.0 }
 0x1bd   : > { %v813_v31 = vadd.f32 %v812_v63, %v4514_v61  ;;  %2841 = vmatpush1.bf16.msra.mxu1 %v4069_v20  ;;  %v970_v62 = vmax.f32 %v809_v34, 0.0  ;;  %v4071_v20 = vld [vmem:[%s5837_s5 + $0x70] sm:$0xff]  }
 0x1be   : > { %v971_v43 = vmax.f32 %v811_v54, 0.0  ;;  %1869 = vmatmul.mubr.bf16.gmra.mrb[212].mxu0 %v4554_v51  ;;  %2842 = vmatprep.subr.bf16.mxu1 %v5843_v2 }
 0x1bf   : > { %v972_v56 = vmax.f32 %v813_v31, 0.0  ;;  %1878 = vmatprep.mubr.bf16.mxu0 %v4568_v12 }
 0x1c0   : > { %v4958_v36 = vpack.c.bf16 %v971_v43, %v969_v55  ;;  %v4072_v55 = vld [vmem:[%s5837_s5 + $0x78] sm:$0xff]  }
 0x1c1   : > { %v4960_v17 = vpack.c.bf16 %v972_v56, %v970_v62  ;;  %v816_v63 = vpop.f32.mrb[108].mxu0  ;;  %2843 = vmatpush1.bf16.msra.mxu1 %v4070_v35 }
 0x1c2   : > { %5846 = vst [vmem:[#allocation2_spill] sm:$0xff] %v4958_v36  ;;  %v817_v24 = vadd.f32 %v816_v63, %v4510_v60  ;;  %v818_v54 = vpop.f32.mrb[109].mxu0  ;;  %2844 = vmatprep.subr.bf16.mxu1 %v5843_v2 }
 0x1c3   : > { %v819_v51 = vadd.f32 %v818_v54, %v4514_v61  ;;  %v820_v34 = vpop.f32.mrb[110].mxu0  ;;  %1755 = vmatprep.mubr.bf16.mxu1 %v4960_v17 }
 0x1c4   : > { %v821_v12 = vadd.f32 %v820_v34, %v4510_v60  ;;  %v822_v31 = vpop.f32.mrb[111].mxu0  ;;  %1756 = vmatmul.mubr.bf16.gmra.mrb[28].mxu1 %v4958_v36  ;;  %v973_v43 = vmax.f32 %v817_v24, 0.0 }
 0x1c5   : > { %v823_v35 = vadd.f32 %v822_v31, %v4514_v61  ;;  %2845 = vmatpush1.bf16.msra.mxu1 %v4071_v20  ;;  %v974_v56 = vmax.f32 %v819_v51, 0.0 }
 0x1c6   : > { %v975_v62 = vmax.f32 %v821_v12, 0.0  ;;  %1879 = vmatmul.mubr.bf16.gmra.mrb[216].mxu0 %v4566_v10  ;;  %2846 = vmatprep.subr.bf16.mxu1 %v5843_v2 }
 0x1c7   : > { %v976_v63 = vmax.f32 %v823_v35, 0.0  ;;  %1888 = vmatprep.mubr.bf16.mxu0 %v4578_v29 }
 0x1c8   : > { %v4978_v54 = vpack.c.bf16 %v975_v62, %v973_v43 }
 0x1c9   : > { %v4980_v34 = vpack.c.bf16 %v976_v63, %v974_v56  ;;  %v826_v31 = vpop.f32.mrb[112].mxu0  ;;  %2847 = vmatpush1.bf16.msra.mxu1 %v4072_v55 }
 0x1ca   : > { %5847 = vst [vmem:[#allocation3_spill] sm:$0xff] %v4978_v54  ;;  %v827_v20 = vadd.f32 %v826_v31, %v4510_v60  ;;  %v828_v36 = vpop.f32.mrb[113].mxu0  ;;  %3105 = vmatprep.subr.bf16.mxu1 %v5843_v2 }
 0x1cb   : > { %v829_v24 = vadd.f32 %v828_v36, %v4514_v61  ;;  %v830_v10 = vpop.f32.mrb[114].mxu0  ;;  %1765 = vmatprep.mubr.bf16.mxu1 %v4980_v34 }
 0x1cc   : > { %v831_v51 = vadd.f32 %v830_v10, %v4510_v60  ;;  %v832_v12 = vpop.f32.mrb[115].mxu0  ;;  %1766 = vmatmul.mubr.bf16.gmra.mrb[32].mxu1 %v4978_v54  ;;  %v977_v35 = vmax.f32 %v827_v20, 0.0 }
 0x1cd   : > { %v833_v29 = vadd.f32 %v832_v12, %v4514_v61  ;;  %v978_v55 = vmax.f32 %v829_v24, 0.0 }
 0x1ce   : > { %v979_v43 = vmax.f32 %v831_v51, 0.0  ;;  %1889 = vmatmul.mubr.bf16.gmra.mrb[220].mxu0 %v4576_v27 }
 0x1cf   : > { %v980_v62 = vmax.f32 %v833_v29, 0.0  ;;  %1898 = vmatprep.mubr.bf16.mxu0 %v4600_v49 }
 0x1d0   : > { %v4991_v56 = vpack.c.bf16 %v979_v43, %v977_v35 }
 0x1d1   : > { %v4993_v36 = vpack.c.bf16 %v980_v62, %v978_v55  ;;  %v836_v63 = vpop.f32.mrb[116].mxu0 }
 0x1d2   : > { %v837_v31 = vadd.f32 %v836_v63, %v4510_v60  ;;  %v838_v10 = vpop.f32.mrb[117].mxu0 }
 0x1d3   : > { %v839_v2 = vadd.f32 %v838_v10, %v4514_v61  ;;  %v840_v54 = vpop.f32.mrb[118].mxu0  ;;  %1775 = vmatprep.mubr.bf16.mxu1 %v4993_v36 }
 0x1d4   : > { %v841_v20 = vadd.f32 %v840_v54, %v4510_v60  ;;  %v842_v27 = vpop.f32.mrb[119].mxu0  ;;  %1776 = vmatmul.mubr.bf16.gmra.mrb[36].mxu1 %v4991_v56  ;;  %v981_v24 = vmax.f32 %v837_v31, 0.0 }
 0x1d5   : > { %v843_v49 = vadd.f32 %v842_v27, %v4514_v61  ;;  %v982_v12 = vmax.f32 %v839_v2, 0.0 }
 0x1d6   : > { %v983_v51 = vmax.f32 %v841_v20, 0.0  ;;  %1899 = vmatmul.mubr.bf16.gmra.mrb[224].mxu0 %v4595_v46 }
 0x1d7   : > { %v984_v29 = vmax.f32 %v843_v49, 0.0  ;;  %1908 = vmatprep.mubr.bf16.mxu0 %v4622_v13 }
 0x1d8   : > { %v5003_v35 = vpack.c.bf16 %v983_v51, %v981_v24 }
 0x1d9   : > { %v5005_v43 = vpack.c.bf16 %v984_v29, %v982_v12  ;;  %v846_v55 = vpop.f32.mrb[120].mxu0 }
 0x1da   : > { %v847_v54 = vadd.f32 %v846_v55, %v4510_v60  ;;  %v848_v62 = vpop.f32.mrb[121].mxu0 }
 0x1db   : > { %v849_v63 = vadd.f32 %v848_v62, %v4514_v61  ;;  %v850_v10 = vpop.f32.mrb[122].mxu0  ;;  %1785 = vmatprep.mubr.bf16.mxu1 %v5005_v43 }
 0x1dc   : > { %v851_v31 = vadd.f32 %v850_v10, %v4510_v60  ;;  %v852_v46 = vpop.f32.mrb[123].mxu0  ;;  %1786 = vmatmul.mubr.bf16.gmra.mrb[40].mxu1 %v5003_v35  ;;  %v985_v13 = vmax.f32 %v847_v54, 0.0 }
 0x1dd   : > { %v853_v2 = vadd.f32 %v852_v46, %v4514_v61  ;;  %v986_v27 = vmax.f32 %v849_v63, 0.0 }
 0x1de   : > { %v987_v20 = vmax.f32 %v851_v31, 0.0  ;;  %1909 = vmatmul.mubr.bf16.gmra.mrb[228].mxu0 %v4617_v8  ;;  %v5025_v8 = vld [vmem:[%s5836_s4] sm:$0xf] }
 0x1df   : > { %v988_v49 = vmax.f32 %v853_v2, 0.0  ;;  %1918 = vmatprep.mubr.bf16.mxu0 %v4644_v37  ;;  %v5848_v2 = vsub.s32 0, %v4497_v53 }
 0x1e0   : > { %v5015_v24 = vpack.c.bf16 %v987_v20, %v985_v13 }
 0x1e1   : > { %v5017_v51 = vpack.c.bf16 %v988_v49, %v986_v27  ;;  %v856_v12 = vpop.f32.mrb[124].mxu0  ;;  %v5034_v13 = vrot.slane %v5025_v8, %v5848_v2 }
 0x1e2   : > { %v857_v29 = vadd.f32 %v856_v12, %v4510_v60  ;;  %v858_v55 = vpop.f32.mrb[125].mxu0 }
 0x1e3   : > { %v859_v62 = vadd.f32 %v858_v55, %v4514_v61  ;;  %v860_v10 = vpop.f32.mrb[126].mxu0  ;;  %1795 = vmatprep.mubr.bf16.mxu1 %v5017_v51 }
 0x1e4   : > { %v861_v37 = vadd.f32 %v860_v10, %v4510_v60  ;;  %v862_v54 = vpop.f32.mrb[127].mxu0  ;;  %1796 = vmatmul.mubr.bf16.gmra.mrb[44].mxu1 %v5015_v24  ;;  %v989_v31 = vmax.f32 %v857_v29, 0.0  ;;  %v5849_v60 = vsub.s32 1, %v4497_v53 }
 0x1e5   : > { %v863_v63 = vadd.f32 %v862_v54, %v4514_v61  ;;  %v990_v20 = vmax.f32 %v859_v62, 0.0 }
 0x1e6   : > { %v991_v46 = vmax.f32 %v861_v37, 0.0  ;;  %1919 = vmatmul.mubr.bf16.gmra.mrb[232].mxu0 %v4639_v32  ;;  %v5040_v49 = vrot.slane %v5025_v8, %v5849_v60 }
 0x1e7   : > { %v992_v27 = vmax.f32 %v863_v63, 0.0  ;;  %1928 = vmatprep.mubr.bf16.mxu0 %v4666_v0 }
 0x1e8   : > { %v5042_v12 = vpack.c.bf16 %v991_v46, %v989_v31 }
 0x1e9   : > { %v5044_v61 = vpack.c.bf16 %v992_v27, %v990_v20  ;;  %v1497_v29 = vpop.f32.mrb[128].mxu0 }
 0x1ea   : > { %v1498_v32 = vadd.f32 %v1497_v29, %v5034_v13  ;;  %v1499_v55 = vpop.f32.mrb[129].mxu0  ;;  %v4073_v29 = vld [vmem:[%s5837_s5 + $0x80] sm:$0xff]  }
 0x1eb   : > { %v1500_v10 = vadd.f32 %v1499_v55, %v5040_v49  ;;  %v1501_v37 = vpop.f32.mrb[130].mxu0  ;;  %1805 = vmatprep.mubr.bf16.mxu1 %v5044_v61 }
 0x1ec   : > { %v1502_v0 = vadd.f32 %v1501_v37, %v5034_v13  ;;  %v1503_v62 = vpop.f32.mrb[131].mxu0  ;;  %1806 = vmatmul.mubr.bf16.gmra.mrb[48].mxu1 %v5042_v12  ;;  %v2169_v63 = vmax.f32 %v1498_v32, 0.0 }
 0x1ed   : > { %v1504_v54 = vadd.f32 %v1503_v62, %v5040_v49  ;;  %v2170_v46 = vmax.f32 %v1500_v10, 0.0 }
 0x1ee   : > { %v2173_v31 = vmax.f32 %v1502_v0, 0.0  ;;  %1929 = vmatmul.mubr.bf16.gmra.mrb[236].mxu0 %v4661_v58  ;;  %v4074_v0 = vld [vmem:[%s5837_s5 + $0x88] sm:$0xff]  }
 0x1ef   : > { %v2174_v2 = vmax.f32 %v1504_v54, 0.0  ;;  %1938 = vmatprep.mubr.bf16.mxu0 %v4688_v25 }
 0x1f0   : > { %v2425_v20 = vpack.c.bf16 %v2173_v31, %v2169_v63  ;;  %v5850_v31 = vmov 0  }
 0x1f1   : > { %v2426_v27 = vpack.c.bf16 %v2174_v2, %v2170_v46  ;;  %v1507_v60 = vpop.f32.mrb[132].mxu0 }
 0x1f2   : > { %v1508_v55 = vadd.f32 %v1507_v60, %v5034_v13  ;;  %v1509_v37 = vpop.f32.mrb[133].mxu0 }
 0x1f3   : > { %v1510_v62 = vadd.f32 %v1509_v37, %v5040_v49  ;;  %v1511_v32 = vpop.f32.mrb[134].mxu0  ;;  %2848 = vmatprep.mubr.bf16.mxu1 %v2426_v27 }
 0x1f4   : > { %v1512_v58 = vadd.f32 %v1511_v32, %v5034_v13  ;;  %v1513_v10 = vpop.f32.mrb[135].mxu0  ;;  %2849 = vmatmul.mubr.bf16.vlgmr.msra.gmra.mrb[52].mxu1 %v2425_v20  ;;  %v2177_v54 = vmax.f32 %v1508_v55, 0.0 }
 0x1f5   : > { %v1514_v25 = vadd.f32 %v1513_v10, %v5040_v49  ;;  %3106 = vmatpush1.bf16.msra.mxu1 %v4073_v29  ;;  %v2178_v46 = vmax.f32 %v1510_v62, 0.0  ;;  %v4075_v29 = vld [vmem:[%s5837_s5 + $0x90] sm:$0xff]   ;;  %v4076_v10 = vld [vmem:[%s5837_s5 + $0x98] sm:$0xff]  }
 0x1f6   : > { %v2181_v63 = vmax.f32 %v1512_v58, 0.0  ;;  %1939 = vmatmul.mubr.bf16.gmra.mrb[240].mxu0 %v4683_v22  ;;  %3107 = vmatprep.subr.bf16.mxu1 %v5850_v31 }
 0x1f7   : > { %v2182_v2 = vmax.f32 %v1514_v25, 0.0  ;;  %1948 = vmatprep.mubr.bf16.mxu0 %v4710_v52 }
 0x1f8   : > { %v2429_v27 = vpack.c.bf16 %v2181_v63, %v2177_v54 }
 0x1f9   : > { %v2430_v60 = vpack.c.bf16 %v2182_v2, %v2178_v46  ;;  %v1517_v20 = vpop.f32.mrb[136].mxu0  ;;  %3108 = vmatpush1.bf16.msra.mxu1 %v4074_v0 }
 0x1fa   : > { %v1518_v37 = vadd.f32 %v1517_v20, %v5034_v13  ;;  %v1519_v55 = vpop.f32.mrb[137].mxu0  ;;  %3109 = vmatprep.subr.bf16.mxu1 %v5850_v31 }
 0x1fb   : > { %v1520_v22 = vadd.f32 %v1519_v55, %v5040_v49  ;;  %v1521_v32 = vpop.f32.mrb[138].mxu0  ;;  %2856 = vmatprep.mubr.bf16.mxu1 %v2430_v60  ;;  %v4077_v60 = vld [vmem:[%s5837_s5 + $0xa0] sm:$0xff]  }
 0x1fc   : > { %v1522_v62 = vadd.f32 %v1521_v32, %v5034_v13  ;;  %v1523_v52 = vpop.f32.mrb[139].mxu0  ;;  %2857 = vmatmul.mubr.bf16.gmra.mrb[56].mxu1 %v2429_v27  ;;  %v2185_v25 = vmax.f32 %v1518_v37, 0.0  ;;  %v4078_v32 = vld [vmem:[%s5837_s5 + $0xa8] sm:$0xff]  }
 0x1fd   : > { %v1524_v58 = vadd.f32 %v1523_v52, %v5040_v49  ;;  %3110 = vmatpush1.bf16.msra.mxu1 %v4075_v29  ;;  %v2186_v54 = vmax.f32 %v1520_v22, 0.0 }
 0x1fe   : > { %v2189_v0 = vmax.f32 %v1522_v62, 0.0  ;;  %1949 = vmatmul.mubr.bf16.gmra.mrb[244].mxu0 %v4705_v47  ;;  %3111 = vmatprep.subr.bf16.mxu1 %v5850_v31 }
 0x1ff   : > { %v2190_v63 = vmax.f32 %v1524_v58, 0.0  ;;  %1958 = vmatprep.mubr.bf16.mxu0 %v4732_v21 }
 0x200   : > { %v2433_v46 = vpack.c.bf16 %v2189_v0, %v2185_v25 }
 0x201   : > { %v2434_v2 = vpack.c.bf16 %v2190_v63, %v2186_v54  ;;  %v1527_v27 = vpop.f32.mrb[140].mxu0  ;;  %3112 = vmatpush1.bf16.msra.mxu1 %v4076_v10  ;;  %v4079_v63 = vld [vmem:[%s5837_s5 + $0xb0] sm:$0xff]  }
 0x202   : > { %v1528_v20 = vadd.f32 %v1527_v27, %v5034_v13  ;;  %v1529_v29 = vpop.f32.mrb[141].mxu0  ;;  %3113 = vmatprep.subr.bf16.mxu1 %v5850_v31 }
 0x203   : > { %v1530_v47 = vadd.f32 %v1529_v29, %v5040_v49  ;;  %v1531_v37 = vpop.f32.mrb[142].mxu0  ;;  %2864 = vmatprep.mubr.bf16.mxu1 %v2434_v2  ;;  %v4080_v29 = vld [vmem:[%s5837_s5 + $0xb8] sm:$0xff]  }
 0x204   : > { %v1532_v55 = vadd.f32 %v1531_v37, %v5034_v13  ;;  %v1533_v21 = vpop.f32.mrb[143].mxu0  ;;  %2865 = vmatmul.mubr.bf16.gmra.mrb[60].mxu1 %v2433_v46  ;;  %v2193_v62 = vmax.f32 %v1528_v20, 0.0 }
 0x205   : > { %v1534_v22 = vadd.f32 %v1533_v21, %v5040_v49  ;;  %3114 = vmatpush1.bf16.msra.mxu1 %v4077_v60  ;;  %v2194_v58 = vmax.f32 %v1530_v47, 0.0 }
 0x206   : > { %v2197_v52 = vmax.f32 %v1532_v55, 0.0  ;;  %1959 = vmatmul.mubr.bf16.gmra.mrb[248].mxu0 %v4727_v16  ;;  %3115 = vmatprep.subr.bf16.mxu1 %v5850_v31 }
 0x207   : > { %v2198_v10 = vmax.f32 %v1534_v22, 0.0  ;;  %1968 = vmatprep.mubr.bf16.mxu0 %v4751_v48 }
 0x208   : > { %v2437_v25 = vpack.c.bf16 %v2197_v52, %v2193_v62  ;;  %v4081_v52 = vld [vmem:[%s5837_s5 + $0xc0] sm:$0xff]  }
 0x209   : > { %v2438_v0 = vpack.c.bf16 %v2198_v10, %v2194_v58  ;;  %v1537_v54 = vpop.f32.mrb[144].mxu0  ;;  %3116 = vmatpush1.bf16.msra.mxu1 %v4078_v32 }
 0x20a   : > { %v1538_v46 = vadd.f32 %v1537_v54, %v5034_v13  ;;  %v1539_v2 = vpop.f32.mrb[145].mxu0  ;;  %3117 = vmatprep.subr.bf16.mxu1 %v5850_v31 }
 0x20b   : > { %v1540_v16 = vadd.f32 %v1539_v2, %v5040_v49  ;;  %v1541_v27 = vpop.f32.mrb[146].mxu0  ;;  %2872 = vmatprep.mubr.bf16.mxu1 %v2438_v0 }
 0x20c   : > { %v1542_v60 = vadd.f32 %v1541_v27, %v5034_v13  ;;  %v1543_v48 = vpop.f32.mrb[147].mxu0  ;;  %2873 = vmatmul.mubr.bf16.gmra.mrb[64].mxu1 %v2437_v25  ;;  %v2201_v47 = vmax.f32 %v1538_v46, 0.0 }
 0x20d   : > { %v1544_v20 = vadd.f32 %v1543_v48, %v5040_v49  ;;  %3118 = vmatpush1.bf16.msra.mxu1 %v4079_v63  ;;  %v2202_v55 = vmax.f32 %v1540_v16, 0.0  ;;  %v4082_v63 = vld [vmem:[%s5837_s5 + $0xc8] sm:$0xff]  }
 0x20e   : > { %v2205_v37 = vmax.f32 %v1542_v60, 0.0  ;;  %1969 = vmatmul.mubr.bf16.gmra.mrb[252].mxu0 %v4749_v44  ;;  %3119 = vmatprep.subr.bf16.mxu1 %v5850_v31 }
 0x20f   : > { %v2206_v21 = vmax.f32 %v1544_v20, 0.0  ;;  %1978 = vmatprep.mubr.bf16.mxu0 %v4761_v14 }
 0x210   : > { %v2441_v22 = vpack.c.bf16 %v2205_v37, %v2201_v47 }
 0x211   : > { %v2442_v32 = vpack.c.bf16 %v2206_v21, %v2202_v55  ;;  %v1547_v62 = vpop.f32.mrb[148].mxu0  ;;  %3120 = vmatpush1.bf16.msra.mxu1 %v4080_v29  ;;  %v4083_v29 = vld [vmem:[%s5837_s5 + $0xd0] sm:$0xff]  }
 0x212   : > { %v1548_v58 = vadd.f32 %v1547_v62, %v5034_v13  ;;  %v1549_v10 = vpop.f32.mrb[149].mxu0  ;;  %3121 = vmatprep.subr.bf16.mxu1 %v5850_v31 }
 0x213   : > { %v1550_v44 = vadd.f32 %v1549_v10, %v5040_v49  ;;  %v1551_v25 = vpop.f32.mrb[150].mxu0  ;;  %2880 = vmatprep.mubr.bf16.mxu1 %v2442_v32 }
 0x214   : > { %v1552_v0 = vadd.f32 %v1551_v25, %v5034_v13  ;;  %v1553_v14 = vpop.f32.mrb[151].mxu0  ;;  %2881 = vmatmul.mubr.bf16.gmra.mrb[68].mxu1 %v2441_v22  ;;  %v2209_v46 = vmax.f32 %v1548_v58, 0.0 }
 0x215   : > { %v1554_v54 = vadd.f32 %v1553_v14, %v5040_v49  ;;  %3122 = vmatpush1.bf16.msra.mxu1 %v4081_v52  ;;  %v2210_v16 = vmax.f32 %v1550_v44, 0.0 }
 0x216   : > { %v2213_v2 = vmax.f32 %v1552_v0, 0.0  ;;  %1979 = vmatmul.mubr.bf16.gmra.mrb[0].mxu0 %v4759_v9  ;;  %3123 = vmatprep.subr.bf16.mxu1 %v5850_v31 }
 0x217   : > { %v2214_v27 = vmax.f32 %v1554_v54, 0.0  ;;  %1988 = vmatprep.mubr.bf16.mxu0 %v4771_v40 }
 0x218   : > { %v2445_v60 = vpack.c.bf16 %v2213_v2, %v2209_v46 }
 0x219   : > { %v2446_v48 = vpack.c.bf16 %v2214_v27, %v2210_v16  ;;  %v1557_v20 = vpop.f32.mrb[152].mxu0  ;;  %3124 = vmatpush1.bf16.msra.mxu1 %v4082_v63 }
 0x21a   : > { %v1558_v47 = vadd.f32 %v1557_v20, %v5034_v13  ;;  %v1559_v37 = vpop.f32.mrb[153].mxu0  ;;  %3125 = vmatprep.subr.bf16.mxu1 %v5850_v31 }
 0x21b   : > { %v1560_v9 = vadd.f32 %v1559_v37, %v5040_v49  ;;  %v1561_v55 = vpop.f32.mrb[154].mxu0  ;;  %2888 = vmatprep.mubr.bf16.mxu1 %v2446_v48 }
 0x21c   : > { %v1562_v21 = vadd.f32 %v1561_v55, %v5034_v13  ;;  %v1563_v40 = vpop.f32.mrb[155].mxu0  ;;  %2889 = vmatmul.mubr.bf16.gmra.mrb[72].mxu1 %v2445_v60  ;;  %v2217_v32 = vmax.f32 %v1558_v47, 0.0  ;;  %v4084_v47 = vld [vmem:[%s5837_s5 + $0xd8] sm:$0xff]  }
 0x21d   : > { %v1564_v22 = vadd.f32 %v1563_v40, %v5040_v49  ;;  %3126 = vmatpush1.bf16.msra.mxu1 %v4083_v29  ;;  %v2218_v52 = vmax.f32 %v1560_v9, 0.0 }
 0x21e   : > { %v2221_v62 = vmax.f32 %v1562_v21, 0.0  ;;  %1989 = vmatmul.mubr.bf16.gmra.mrb[4].mxu0 %v4769_v38  ;;  %3127 = vmatprep.subr.bf16.mxu1 %v5850_v31 }
 0x21f   : > { %v2222_v58 = vmax.f32 %v1564_v22, 0.0  ;;  %1998 = vmatprep.mubr.bf16.mxu0 %v4781_v6 }
 0x220   : > { %v2449_v10 = vpack.c.bf16 %v2221_v62, %v2217_v32 }
 0x221   : > { %v2450_v44 = vpack.c.bf16 %v2222_v58, %v2218_v52  ;;  %v1567_v25 = vpop.f32.mrb[156].mxu0  ;;  %3128 = vmatpush1.bf16.msra.mxu1 %v4084_v47 }
 0x222   : > { %v1568_v0 = vadd.f32 %v1567_v25, %v5034_v13  ;;  %v1569_v14 = vpop.f32.mrb[157].mxu0  ;;  %3129 = vmatprep.subr.bf16.mxu1 %v5850_v31 }
 0x223   : > { %v1570_v54 = vadd.f32 %v1569_v14, %v5040_v49  ;;  %v1571_v63 = vpop.f32.mrb[158].mxu0  ;;  %2896 = vmatprep.mubr.bf16.mxu1 %v2450_v44 }
 0x224   : > { %v1572_v46 = vadd.f32 %v1571_v63, %v5034_v13  ;;  %v1573_v2 = vpop.f32.mrb[159].mxu0  ;;  %2897 = vmatmul.mubr.bf16.gmra.mrb[76].mxu1 %v2449_v10  ;;  %v2225_v16 = vmax.f32 %v1568_v0, 0.0 }
 0x225   : > { %v1574_v38 = vadd.f32 %v1573_v2, %v5040_v49  ;;  %v2226_v6 = vmax.f32 %v1570_v54, 0.0 }
 0x226   : > { %v2229_v27 = vmax.f32 %v1572_v46, 0.0  ;;  %1999 = vmatmul.mubr.bf16.gmra.mrb[8].mxu0 %v4779_v4 }
 0x227   : > { %v2230_v60 = vmax.f32 %v1574_v38, 0.0  ;;  %2008 = vmatprep.mubr.bf16.mxu0 %v4791_v39 }
 0x228   : > { %v2453_v48 = vpack.c.bf16 %v2229_v27, %v2225_v16 }
 0x229   : > { %v2454_v20 = vpack.c.bf16 %v2230_v60, %v2226_v6  ;;  %v1577_v29 = vpop.f32.mrb[160].mxu0 }
 0x22a   : > { %v1578_v37 = vadd.f32 %v1577_v29, %v5034_v13  ;;  %v1579_v9 = vpop.f32.mrb[161].mxu0 }
 0x22b   : > { %v1580_v55 = vadd.f32 %v1579_v9, %v5040_v49  ;;  %v1581_v21 = vpop.f32.mrb[162].mxu0  ;;  %2904 = vmatprep.mubr.bf16.mxu1 %v2454_v20 }
 0x22c   : > { %v1582_v4 = vadd.f32 %v1581_v21, %v5034_v13  ;;  %v1583_v40 = vpop.f32.mrb[163].mxu0  ;;  %2905 = vmatmul.mubr.bf16.gmra.mrb[80].mxu1 %v2453_v48  ;;  %v2233_v22 = vmax.f32 %v1578_v37, 0.0  ;;  %v4085_v48 = vld [vmem:[%s5837_s5 + $0xe0] sm:$0xff]  }
 0x22d   : > { %v1584_v39 = vadd.f32 %v1583_v40, %v5040_v49  ;;  %v2234_v62 = vmax.f32 %v1580_v55, 0.0  ;;  %3130 = vmatpush1.bf16.msra.mxu1 %v4085_v48 }
 0x22e   : > { %v2237_v32 = vmax.f32 %v1582_v4, 0.0  ;;  %2009 = vmatmul.mubr.bf16.gmra.mrb[12].mxu0 %v4789_v33  ;;  %3131 = vmatprep.subr.bf16.mxu1 %v5850_v31 }
 0x22f   : > { %v2238_v52 = vmax.f32 %v1584_v39, 0.0  ;;  %2018 = vmatprep.mubr.bf16.mxu0 %v4801_v11 }
 0x230   : > { %v2457_v58 = vpack.c.bf16 %v2237_v32, %v2233_v22 }
 0x231   : > { %v2458_v10 = vpack.c.bf16 %v2238_v52, %v2234_v62  ;;  %v1587_v44 = vpop.f32.mrb[164].mxu0 }
 0x232   : > { %v1588_v25 = vadd.f32 %v1587_v44, %v5034_v13  ;;  %v1589_v0 = vpop.f32.mrb[165].mxu0 }
 0x233   : > { %v1590_v14 = vadd.f32 %v1589_v0, %v5040_v49  ;;  %v1591_v54 = vpop.f32.mrb[166].mxu0  ;;  %2912 = vmatprep.mubr.bf16.mxu1 %v2458_v10 }
 0x234   : > { %v1592_v63 = vadd.f32 %v1591_v54, %v5034_v13  ;;  %v1593_v46 = vpop.f32.mrb[167].mxu0  ;;  %2913 = vmatmul.mubr.bf16.gmra.mrb[84].mxu1 %v2457_v58  ;;  %v2241_v2 = vmax.f32 %v1588_v25, 0.0 }
 0x235   : > { %v1594_v33 = vadd.f32 %v1593_v46, %v5040_v49  ;;  %v2242_v11 = vmax.f32 %v1590_v14, 0.0 }
 0x236   : > { %v2245_v38 = vmax.f32 %v1592_v63, 0.0  ;;  %2019 = vmatmul.mubr.bf16.gmra.mrb[16].mxu0 %v4799_v5 }
 0x237   : > { %v2246_v16 = vmax.f32 %v1594_v33, 0.0  ;;  %2028 = vmatprep.mubr.bf16.mxu0 %v4811_v45 }
 0x238   : > { %v2461_v27 = vpack.c.bf16 %v2245_v38, %v2241_v2  ;;  %v4086_v2 = vld [vmem:[%s5837_s5 + $0xe8] sm:$0xff]  }
 0x239   : > { %v2462_v6 = vpack.c.bf16 %v2246_v16, %v2242_v11  ;;  %v1597_v60 = vpop.f32.mrb[168].mxu0  ;;  %3132 = vmatpush1.bf16.msra.mxu1 %v4086_v2 }
 0x23a   : > { %v1598_v20 = vadd.f32 %v1597_v60, %v5034_v13  ;;  %v1599_v29 = vpop.f32.mrb[169].mxu0  ;;  %3133 = vmatprep.subr.bf16.mxu1 %v5850_v31 }
 0x23b   : > { %v1600_v47 = vadd.f32 %v1599_v29, %v5040_v49  ;;  %v1601_v37 = vpop.f32.mrb[170].mxu0  ;;  %2920 = vmatprep.mubr.bf16.mxu1 %v2462_v6 }
 0x23c   : > { %v1602_v5 = vadd.f32 %v1601_v37, %v5034_v13  ;;  %v1603_v9 = vpop.f32.mrb[171].mxu0  ;;  %2921 = vmatmul.mubr.bf16.gmra.mrb[88].mxu1 %v2461_v27  ;;  %v2249_v55 = vmax.f32 %v1598_v20, 0.0 }
 0x23d   : > { %v1604_v45 = vadd.f32 %v1603_v9, %v5040_v49  ;;  %v2250_v4 = vmax.f32 %v1600_v47, 0.0 }
 0x23e   : > { %v2253_v21 = vmax.f32 %v1602_v5, 0.0  ;;  %2029 = vmatmul.mubr.bf16.gmra.mrb[20].mxu0 %v4809_v42 }
 0x23f   : > { %v2254_v40 = vmax.f32 %v1604_v45, 0.0  ;;  %2038 = vmatprep.mubr.bf16.mxu0 %v4821_v26 }
 0x240   : > { %v2465_v39 = vpack.c.bf16 %v2253_v21, %v2249_v55 }
 0x241   : > { %v2466_v22 = vpack.c.bf16 %v2254_v40, %v2250_v4  ;;  %v1607_v32 = vpop.f32.mrb[172].mxu0 }
 0x242   : > { %v1608_v62 = vadd.f32 %v1607_v32, %v5034_v13  ;;  %v1609_v52 = vpop.f32.mrb[173].mxu0 }
 0x243   : > { %v1610_v58 = vadd.f32 %v1609_v52, %v5040_v49  ;;  %v1611_v10 = vpop.f32.mrb[174].mxu0  ;;  %2928 = vmatprep.mubr.bf16.mxu1 %v2466_v22 }
 0x244   : > { %v1612_v44 = vadd.f32 %v1611_v10, %v5034_v13  ;;  %v1613_v25 = vpop.f32.mrb[175].mxu0  ;;  %2929 = vmatmul.mubr.bf16.gmra.mrb[92].mxu1 %v2465_v39  ;;  %v2257_v0 = vmax.f32 %v1608_v62, 0.0  ;;  %v4087_v10 = vld [vmem:[%s5837_s5 + $0xf0] sm:$0xff]  }
 0x245   : > { %v1614_v42 = vadd.f32 %v1613_v25, %v5040_v49  ;;  %v2258_v26 = vmax.f32 %v1610_v58, 0.0  ;;  %3134 = vmatpush1.bf16.msra.mxu1 %v4087_v10 }
 0x246   : > { %v2261_v14 = vmax.f32 %v1612_v44, 0.0  ;;  %2039 = vmatmul.mubr.bf16.gmra.mrb[24].mxu0 %v4819_v23  ;;  %3135 = vmatprep.subr.bf16.mxu1 %v5850_v31 }
 0x247   : > { %v2262_v54 = vmax.f32 %v1614_v42, 0.0  ;;  %2048 = vmatprep.mubr.bf16.mxu0 %v4840_v15 }
 0x248   : > { %v2469_v63 = vpack.c.bf16 %v2261_v14, %v2257_v0 }
 0x249   : > { %v2470_v46 = vpack.c.bf16 %v2262_v54, %v2258_v26  ;;  %v1617_v33 = vpop.f32.mrb[176].mxu0 }
 0x24a   : > { %v1618_v38 = vadd.f32 %v1617_v33, %v5034_v13  ;;  %v1619_v11 = vpop.f32.mrb[177].mxu0 }
 0x24b   : > { %v1620_v16 = vadd.f32 %v1619_v11, %v5040_v49  ;;  %v1621_v27 = vpop.f32.mrb[178].mxu0  ;;  %2936 = vmatprep.mubr.bf16.mxu1 %v2470_v46 }
 0x24c   : > { %v1622_v23 = vadd.f32 %v1621_v27, %v5034_v13  ;;  %v1623_v6 = vpop.f32.mrb[179].mxu0  ;;  %2937 = vmatmul.mubr.bf16.gmra.mrb[96].mxu1 %v2469_v63  ;;  %v2265_v60 = vmax.f32 %v1618_v38, 0.0 }
 0x24d   : > { %v1624_v15 = vadd.f32 %v1623_v6, %v5040_v49  ;;  %v2266_v20 = vmax.f32 %v1620_v16, 0.0 }
 0x24e   : > { %v2269_v48 = vmax.f32 %v1622_v23, 0.0  ;;  %2049 = vmatmul.mubr.bf16.gmra.mrb[28].mxu0 %v4838_v7 }
 0x24f   : > { %v2270_v29 = vmax.f32 %v1624_v15, 0.0  ;;  %2058 = vmatprep.mubr.bf16.mxu0 %v4860_v3 }
 0x250   : > { %v2473_v47 = vpack.c.bf16 %v2269_v48, %v2265_v60 }
 0x251   : > { %v2474_v37 = vpack.c.bf16 %v2270_v29, %v2266_v20  ;;  %v1627_v5 = vpop.f32.mrb[180].mxu0 }
 0x252   : > { %v1628_v9 = vadd.f32 %v1627_v5, %v5034_v13  ;;  %v1629_v45 = vpop.f32.mrb[181].mxu0 }
 0x253   : > { %v1630_v55 = vadd.f32 %v1629_v45, %v5040_v49  ;;  %v1631_v21 = vpop.f32.mrb[182].mxu0  ;;  %2944 = vmatprep.mubr.bf16.mxu1 %v2474_v37 }
 0x254   : > { %v1632_v4 = vadd.f32 %v1631_v21, %v5034_v13  ;;  %v1633_v40 = vpop.f32.mrb[183].mxu0  ;;  %2945 = vmatmul.mubr.bf16.gmra.mrb[100].mxu1 %v2473_v47  ;;  %v2273_v39 = vmax.f32 %v1628_v9, 0.0 }
 0x255   : > { %v1634_v7 = vadd.f32 %v1633_v40, %v5040_v49  ;;  %v2274_v3 = vmax.f32 %v1630_v55, 0.0 }
 0x256   : > { %v2277_v22 = vmax.f32 %v1632_v4, 0.0  ;;  %2059 = vmatmul.mubr.bf16.gmra.mrb[32].mxu0 %v4858_v1 }
 0x257   : > { %v2278_v32 = vmax.f32 %v1634_v7, 0.0  ;;  %2068 = vmatprep.mubr.bf16.mxu0 %v4880_v28 }
 0x258   : > { %v2477_v62 = vpack.c.bf16 %v2277_v22, %v2273_v39 }
 0x259   : > { %v2478_v52 = vpack.c.bf16 %v2278_v32, %v2274_v3  ;;  %v1637_v58 = vpop.f32.mrb[184].mxu0 }
 0x25a   : > { %v1638_v44 = vadd.f32 %v1637_v58, %v5034_v13  ;;  %v1639_v25 = vpop.f32.mrb[185].mxu0 }
 0x25b   : > { %v1640_v42 = vadd.f32 %v1639_v25, %v5040_v49  ;;  %v1641_v0 = vpop.f32.mrb[186].mxu0  ;;  %2952 = vmatprep.mubr.bf16.mxu1 %v2478_v52 }
 0x25c   : > { %v1642_v1 = vadd.f32 %v1641_v0, %v5034_v13  ;;  %v1643_v14 = vpop.f32.mrb[187].mxu0  ;;  %2953 = vmatmul.mubr.bf16.gmra.mrb[104].mxu1 %v2477_v62  ;;  %v2281_v26 = vmax.f32 %v1638_v44, 0.0 }
 0x25d   : > { %v1644_v28 = vadd.f32 %v1643_v14, %v5040_v49  ;;  %v2282_v63 = vmax.f32 %v1640_v42, 0.0 }
 0x25e   : > { %v2285_v54 = vmax.f32 %v1642_v1, 0.0  ;;  %2069 = vmatmul.mubr.bf16.gmra.mrb[36].mxu0 %v4878_v18 }
 0x25f   : > { %v2286_v46 = vmax.f32 %v1644_v28, 0.0  ;;  %v1687_v33 = vpop.f32.mrb[0].mxu1  ;;  %2078 = vmatprep.mubr.bf16.mxu0 %v4900_v59 }
 0x260   : > { %v2481_v2 = vpack.c.bf16 %v2285_v54, %v2281_v26  ;;  %v1688_v38 = vadd.f32 %v1687_v33, %v5034_v13  ;;  %v1689_v11 = vpop.f32.mrb[1].mxu1 }
 0x261   : > { %v2482_v16 = vpack.c.bf16 %v2286_v46, %v2282_v63  ;;  %v1690_v27 = vadd.f32 %v1689_v11, %v5040_v49  ;;  %v1647_v23 = vpop.f32.mrb[188].mxu0  ;;  %v1691_v31 = vpop.f32.mrb[2].mxu1 }
 0x262   : > { %v1648_v6 = vadd.f32 %v1647_v23, %v5034_v13  ;;  %v1692_v15 = vadd.f32 %v1691_v31, %v5034_v13  ;;  %v1649_v60 = vpop.f32.mrb[189].mxu0  ;;  %v1693_v18 = vpop.f32.mrb[3].mxu1  ;;  %v2321_v29 = vmax.f32 %v1688_v38, 0.0 }
 0x263   : > { %v1650_v48 = vadd.f32 %v1649_v60, %v5040_v49  ;;  %v1694_v20 = vadd.f32 %v1693_v18, %v5040_v49  ;;  %v1651_v59 = vpop.f32.mrb[190].mxu0  ;;  %2960 = vmatprep.mubr.bf16.mxu1 %v2482_v16  ;;  %v2322_v9 = vmax.f32 %v1690_v27, 0.0 }
 0x264   : > { %v2325_v47 = vmax.f32 %v1692_v15, 0.0  ;;  %v1652_v37 = vadd.f32 %v1651_v59, %v5034_v13  ;;  %v1653_v5 = vpop.f32.mrb[191].mxu0  ;;  %2961 = vmatmul.mubr.bf16.gmra.mrb[108].mxu1 %v2481_v2  ;;  %v2289_v21 = vmax.f32 %v1648_v6, 0.0 }
 0x265   : > { %v2326_v45 = vmax.f32 %v1694_v20, 0.0  ;;  %v1654_v55 = vadd.f32 %v1653_v5, %v5040_v49  ;;  %v2290_v7 = vmax.f32 %v1650_v48, 0.0 }
 0x266   : > { %v5206_v4 = vpack.c.bf16 %v2325_v47, %v2321_v29  ;;  %v2293_v40 = vmax.f32 %v1652_v37, 0.0  ;;  %2079 = vmatmul.mubr.bf16.gmra.mrb[40].mxu0 %v4898_v41  ;;  %v4088_v41 = vld [vmem:[%s5837_s5 + $0xf8] sm:$0xff]  }
 0x267   : > { %v5209_v39 = vpack.c.bf16 %v2326_v45, %v2322_v9  ;;  %v2294_v22 = vmax.f32 %v1654_v55, 0.0  ;;  %v1697_v3 = vpop.f32.mrb[4].mxu1  ;;  %2088 = vmatprep.mubr.bf16.mxu0 %v4920_v57  ;;  %3136 = vmatpush1.bf16.msra.mxu1 %v4088_v41 }
 0x268   : > { %v2485_v32 = vpack.c.bf16 %v2293_v40, %v2289_v21  ;;  %v1698_v62 = vadd.f32 %v1697_v3, %v5034_v13  ;;  %v1699_v52 = vpop.f32.mrb[5].mxu1 }
 0x269   : > { %v2486_v58 = vpack.c.bf16 %v2294_v22, %v2290_v7  ;;  %v1700_v10 = vadd.f32 %v1699_v52, %v5040_v49  ;;  %v1657_v44 = vpop.f32.mrb[192].mxu0  ;;  %v1701_v25 = vpop.f32.mrb[6].mxu1 }
 0x26a   : > { %v1658_v42 = vadd.f32 %v1657_v44, %v5034_v13  ;;  %v1702_v0 = vadd.f32 %v1701_v25, %v5034_v13  ;;  %v1659_v1 = vpop.f32.mrb[193].mxu0  ;;  %v1703_v14 = vpop.f32.mrb[7].mxu1  ;;  %v2329_v54 = vmax.f32 %v1698_v62, 0.0 }
 0x26b   : > { %v1660_v57 = vadd.f32 %v1659_v1, %v5040_v49  ;;  %v1704_v28 = vadd.f32 %v1703_v14, %v5040_v49  ;;  %v1661_v26 = vpop.f32.mrb[194].mxu0  ;;  %2968 = vmatprep.mubr.bf16.mxu1 %v2486_v58  ;;  %v2330_v2 = vmax.f32 %v1700_v10, 0.0 }
 0x26c   : > { %v2333_v63 = vmax.f32 %v1702_v0, 0.0  ;;  %v1662_v46 = vadd.f32 %v1661_v26, %v5034_v13  ;;  %v1663_v33 = vpop.f32.mrb[195].mxu0  ;;  %2969 = vmatmul.mubr.bf16.gmra.mrb[112].mxu1 %v2485_v32  ;;  %v2297_v16 = vmax.f32 %v1658_v42, 0.0 }
 0x26d   : > { %v2334_v38 = vmax.f32 %v1704_v28, 0.0  ;;  %v1664_v11 = vadd.f32 %v1663_v33, %v5040_v49  ;;  %v2298_v31 = vmax.f32 %v1660_v57, 0.0 }
 0x26e   : > { %v5223_v27 = vpack.c.bf16 %v2333_v63, %v2329_v54  ;;  %v2301_v23 = vmax.f32 %v1662_v46, 0.0  ;;  %2089 = vmatmul.mubr.bf16.gmra.mrb[44].mxu0 %v4918_v50 }
 0x26f   : > { %v5226_v6 = vpack.c.bf16 %v2334_v38, %v2330_v2  ;;  %v2302_v15 = vmax.f32 %v1664_v11, 0.0  ;;  %v1707_v60 = vpop.f32.mrb[8].mxu1  ;;  %2098 = vmatprep.mubr.bf16.mxu0 %v4940_v30  ;;  %v1133_v38 = vsub.s32 2, %v4497_v53 }
 0x270   : > { %v2489_v18 = vpack.c.bf16 %v2301_v23, %v2297_v16  ;;  %v1708_v48 = vadd.f32 %v1707_v60, %v5034_v13  ;;  %v1709_v20 = vpop.f32.mrb[9].mxu1  ;;  %v1137_v23 = vsub.s32 3, %v4497_v53 }
 0x271   : > { %v2490_v59 = vpack.c.bf16 %v2302_v15, %v2298_v31  ;;  %v1710_v29 = vadd.f32 %v1709_v20, %v5040_v49  ;;  %v1667_v47 = vpop.f32.mrb[196].mxu0  ;;  %v1711_v37 = vpop.f32.mrb[10].mxu1 }
 0x272   : > { %v1668_v5 = vadd.f32 %v1667_v47, %v5034_v13  ;;  %v1712_v50 = vadd.f32 %v1711_v37, %v5034_v13  ;;  %v1669_v9 = vpop.f32.mrb[197].mxu0  ;;  %v1713_v45 = vpop.f32.mrb[11].mxu1  ;;  %v2337_v40 = vmax.f32 %v1708_v48, 0.0 }
 0x273   : > { %v1670_v55 = vadd.f32 %v1669_v9, %v5040_v49  ;;  %v1714_v21 = vadd.f32 %v1713_v45, %v5040_v49  ;;  %v1671_v30 = vpop.f32.mrb[198].mxu0  ;;  %2976 = vmatprep.mubr.bf16.mxu1 %v2490_v59  ;;  %v2338_v32 = vmax.f32 %v1710_v29, 0.0 }
 0x274   : > { %v2341_v7 = vmax.f32 %v1712_v50, 0.0  ;;  %v1672_v22 = vadd.f32 %v1671_v30, %v5034_v13  ;;  %v1673_v3 = vpop.f32.mrb[199].mxu0  ;;  %2977 = vmatmul.mubr.bf16.gmra.mrb[116].mxu1 %v2489_v18  ;;  %v2305_v58 = vmax.f32 %v1668_v5, 0.0  ;;  %v5851_v5 = vld [vmem:[#allocation2_spill] sm:$0xff]  ;;  %v5257_v50 = vrot.slane %v5025_v8, %v1133_v38 }
 0x275   : > { %v2342_v62 = vmax.f32 %v1714_v21, 0.0  ;;  %v1674_v52 = vadd.f32 %v1673_v3, %v5040_v49  ;;  %v2306_v25 = vmax.f32 %v1670_v55, 0.0  ;;  %v5263_v21 = vrot.slane %v5025_v8, %v1137_v23 }
 0x276   : > { %v5237_v10 = vpack.c.bf16 %v2341_v7, %v2337_v40  ;;  %v2309_v44 = vmax.f32 %v1672_v22, 0.0  ;;  %2099 = vmatmul.mubr.bf16.gmra.mrb[48].mxu0 %v4938_v19 }
 0x277   : > { %v5240_v41 = vpack.c.bf16 %v2342_v62, %v2338_v32  ;;  %v2310_v42 = vmax.f32 %v1674_v52, 0.0  ;;  %v1717_v0 = vpop.f32.mrb[12].mxu1  ;;  %2108 = vmatprep.mubr.bf16.mxu0 %v4960_v17 }
 0x278   : > { %v2493_v1 = vpack.c.bf16 %v2309_v44, %v2305_v58  ;;  %v1718_v14 = vadd.f32 %v1717_v0, %v5034_v13  ;;  %v1719_v57 = vpop.f32.mrb[13].mxu1 }
 0x279   : > { %v2494_v28 = vpack.c.bf16 %v2310_v42, %v2306_v25  ;;  %v1720_v26 = vadd.f32 %v1719_v57, %v5040_v49  ;;  %v1677_v54 = vpop.f32.mrb[200].mxu0  ;;  %v1721_v63 = vpop.f32.mrb[14].mxu1 }
 0x27a   : > { %v1678_v46 = vadd.f32 %v1677_v54, %v5034_v13  ;;  %v1722_v19 = vadd.f32 %v1721_v63, %v5034_v13  ;;  %v1679_v33 = vpop.f32.mrb[201].mxu0  ;;  %v1723_v2 = vpop.f32.mrb[15].mxu1  ;;  %v2345_v31 = vmax.f32 %v1718_v14, 0.0 }
 0x27b   : > { %v1680_v11 = vadd.f32 %v1679_v33, %v5040_v49  ;;  %v1724_v17 = vadd.f32 %v1723_v2, %v5040_v49  ;;  %v1681_v16 = vpop.f32.mrb[202].mxu0  ;;  %2984 = vmatprep.mubr.bf16.mxu1 %v2494_v28  ;;  %v2346_v48 = vmax.f32 %v1720_v26, 0.0  ;;  %v5852_v33 = vld [vmem:[#allocation3_spill] sm:$0xff] }
 0x27c   : > { %v2349_v15 = vmax.f32 %v1722_v19, 0.0  ;;  %v1682_v60 = vadd.f32 %v1681_v16, %v5034_v13  ;;  %v1683_v18 = vpop.f32.mrb[203].mxu0  ;;  %2985 = vmatmul.mubr.bf16.gmra.mrb[120].mxu1 %v2493_v1  ;;  %v2313_v29 = vmax.f32 %v1678_v46, 0.0 }
 0x27d   : > { %v2350_v20 = vmax.f32 %v1724_v17, 0.0  ;;  %v1684_v59 = vadd.f32 %v1683_v18, %v5040_v49  ;;  %v2314_v53 = vmax.f32 %v1680_v11, 0.0 }
 0x27e   : > { %v5253_v47 = vpack.c.bf16 %v2349_v15, %v2345_v31  ;;  %v2317_v37 = vmax.f32 %v1682_v60, 0.0  ;;  %2109 = vmatmul.mubr.bf16.gmra.mrb[52].mxu0 %v5851_v5 }
 0x27f   : > { %v5259_v9 = vpack.c.bf16 %v2350_v20, %v2346_v48  ;;  %v2318_v45 = vmax.f32 %v1684_v59, 0.0  ;;  %v1727_v55 = vpop.f32.mrb[16].mxu1  ;;  %2118 = vmatprep.mubr.bf16.mxu0 %v4980_v34 }
 0x280   : > { %v2497_v30 = vpack.c.bf16 %v2317_v37, %v2313_v29  ;;  %v1728_v40 = vadd.f32 %v1727_v55, %v5034_v13  ;;  %v1729_v7 = vpop.f32.mrb[17].mxu1 }
 0x281   : > { %v2498_v22 = vpack.c.bf16 %v2318_v45, %v2314_v53  ;;  %v1730_v3 = vadd.f32 %v1729_v7, %v5040_v49  ;;  %v1731_v32 = vpop.f32.mrb[18].mxu1  ;;  %v1850_v62 = vpop.f32.mrb[204].mxu0 }
 0x282   : > { %v1732_v52 = vadd.f32 %v1731_v32, %v5034_v13  ;;  %v1851_v58 = vadd.f32 %v1850_v62, %v5257_v50  ;;  %v1733_v44 = vpop.f32.mrb[19].mxu1  ;;  %v1852_v25 = vpop.f32.mrb[205].mxu0  ;;  %v2353_v0 = vmax.f32 %v1728_v40, 0.0 }
 0x283   : > { %v1734_v34 = vadd.f32 %v1733_v44, %v5040_v49  ;;  %v1853_v8 = vadd.f32 %v1852_v25, %v5263_v21  ;;  %v1854_v42 = vpop.f32.mrb[206].mxu0  ;;  %2992 = vmatprep.mubr.bf16.mxu1 %v2498_v22  ;;  %v2354_v28 = vmax.f32 %v1730_v3, 0.0 }
 0x284   : > { %v2357_v1 = vmax.f32 %v1732_v52, 0.0  ;;  %v1855_v14 = vadd.f32 %v1854_v42, %v5257_v50  ;;  %v1856_v57 = vpop.f32.mrb[207].mxu0  ;;  %2993 = vmatmul.mubr.bf16.gmra.mrb[124].mxu1 %v2497_v30  ;;  %v2171_v46 = vmax.f32 %v1851_v58, 0.0 }
 0x285   : > { %v2358_v26 = vmax.f32 %v1734_v34, 0.0  ;;  %v1857_v54 = vadd.f32 %v1856_v57, %v5263_v21  ;;  %3000 = vmatprep.mubr.bf16.mxu1 %v5209_v39  ;;  %v2172_v38 = vmax.f32 %v1853_v8, 0.0 }
 0x286   : > { %v5274_v63 = vpack.c.bf16 %v2357_v1, %v2353_v0  ;;  %v2175_v19 = vmax.f32 %v1855_v14, 0.0  ;;  %2119 = vmatmul.mubr.bf16.gmra.mrb[56].mxu0 %v5852_v33 }
 0x287   : > { %v5277_v2 = vpack.c.bf16 %v2358_v26, %v2354_v28  ;;  %v2176_v11 = vmax.f32 %v1857_v54, 0.0  ;;  %v1737_v17 = vpop.f32.mrb[20].mxu1  ;;  %2128 = vmatprep.mubr.bf16.mxu0 %v4993_v36 }
 0x288   : > { %v5280_v16 = vpack.c.bf16 %v2175_v19, %v2171_v46  ;;  %v1738_v23 = vadd.f32 %v1737_v17, %v5034_v13  ;;  %v1739_v31 = vpop.f32.mrb[21].mxu1 }
 0x289   : > { %v5283_v15 = vpack.c.bf16 %v2176_v11, %v2172_v38  ;;  %v1740_v39 = vadd.f32 %v1739_v31, %v5040_v49  ;;  %v1741_v60 = vpop.f32.mrb[22].mxu1  ;;  %v1860_v18 = vpop.f32.mrb[208].mxu0 }
 0x28a   : > { %v1742_v48 = vadd.f32 %v1741_v60, %v5034_v13  ;;  %v1861_v20 = vadd.f32 %v1860_v18, %v5257_v50  ;;  %v1743_v59 = vpop.f32.mrb[23].mxu1  ;;  %v1862_v29 = vpop.f32.mrb[209].mxu0  ;;  %v2361_v53 = vmax.f32 %v1738_v23, 0.0 }
 0x28b   : > { %v1744_v37 = vadd.f32 %v1743_v59, %v5040_v49  ;;  %v1863_v36 = vadd.f32 %v1862_v29, %v5263_v21  ;;  %v1864_v5 = vpop.f32.mrb[210].mxu0  ;;  %v2362_v40 = vmax.f32 %v1740_v39, 0.0 }
 0x28c   : > { %v2365_v45 = vmax.f32 %v1742_v48, 0.0  ;;  %v1865_v55 = vadd.f32 %v1864_v5, %v5257_v50  ;;  %v1866_v30 = vpop.f32.mrb[211].mxu0  ;;  %3001 = vmatmul.mubr.bf16.gmra.mrb[128].mxu1 %v5206_v4  ;;  %v2179_v32 = vmax.f32 %v1861_v20, 0.0 }
 0x28d   : > { %v2366_v7 = vmax.f32 %v1744_v37, 0.0  ;;  %v1867_v22 = vadd.f32 %v1866_v30, %v5263_v21  ;;  %3008 = vmatprep.mubr.bf16.mxu1 %v5226_v6  ;;  %v2180_v58 = vmax.f32 %v1863_v36, 0.0 }
 0x28e   : > { %v5294_v3 = vpack.c.bf16 %v2365_v45, %v2361_v53  ;;  %v2183_v62 = vmax.f32 %v1865_v55, 0.0  ;;  %2129 = vmatmul.mubr.bf16.gmra.mrb[60].mxu0 %v4991_v56 }
 0x28f   : > { %v5297_v52 = vpack.c.bf16 %v2366_v7, %v2362_v40  ;;  %v2184_v44 = vmax.f32 %v1867_v22, 0.0  ;;  %v1747_v25 = vpop.f32.mrb[24].mxu1  ;;  %2138 = vmatprep.mubr.bf16.mxu0 %v5005_v43 }
 0x290   : > { %v5300_v4 = vpack.c.bf16 %v2183_v62, %v2179_v32  ;;  %v1748_v34 = vadd.f32 %v1747_v25, %v5034_v13  ;;  %v1749_v8 = vpop.f32.mrb[25].mxu1 }
 0x291   : > { %v5303_v42 = vpack.c.bf16 %v2184_v44, %v2180_v58  ;;  %v1750_v6 = vadd.f32 %v1749_v8, %v5040_v49  ;;  %v1751_v0 = vpop.f32.mrb[26].mxu1  ;;  %v1870_v1 = vpop.f32.mrb[212].mxu0 }
 0x292   : > { %v1752_v56 = vadd.f32 %v1751_v0, %v5034_v13  ;;  %v1871_v14 = vadd.f32 %v1870_v1, %v5257_v50  ;;  %v1753_v57 = vpop.f32.mrb[27].mxu1  ;;  %v1872_v28 = vpop.f32.mrb[213].mxu0  ;;  %v2369_v46 = vmax.f32 %v1748_v34, 0.0 }
 0x293   : > { %v1754_v26 = vadd.f32 %v1753_v57, %v5040_v49  ;;  %v1873_v43 = vadd.f32 %v1872_v28, %v5263_v21  ;;  %v1874_v54 = vpop.f32.mrb[214].mxu0  ;;  %v2370_v11 = vmax.f32 %v1750_v6, 0.0 }
 0x294   : > { %v2373_v19 = vmax.f32 %v1752_v56, 0.0  ;;  %v1875_v33 = vadd.f32 %v1874_v54, %v5257_v50  ;;  %v1876_v38 = vpop.f32.mrb[215].mxu0  ;;  %3009 = vmatmul.mubr.bf16.gmra.mrb[132].mxu1 %v5223_v27  ;;  %v2187_v39 = vmax.f32 %v1871_v14, 0.0 }
 0x295   : > { %v2374_v17 = vmax.f32 %v1754_v26, 0.0  ;;  %v1877_v23 = vadd.f32 %v1876_v38, %v5263_v21  ;;  %3016 = vmatprep.mubr.bf16.mxu1 %v5240_v41  ;;  %v2188_v48 = vmax.f32 %v1873_v43, 0.0 }
 0x296   : > { %v5314_v31 = vpack.c.bf16 %v2373_v19, %v2369_v46  ;;  %v2191_v60 = vmax.f32 %v1875_v33, 0.0  ;;  %2139 = vmatmul.mubr.bf16.gmra.mrb[64].mxu0 %v5003_v35 }
 0x297   : > { %v5317_v18 = vpack.c.bf16 %v2374_v17, %v2370_v11  ;;  %v2192_v20 = vmax.f32 %v1877_v23, 0.0  ;;  %v1757_v59 = vpop.f32.mrb[28].mxu1  ;;  %2148 = vmatprep.mubr.bf16.mxu0 %v5017_v51 }
 0x298   : > { %v5320_v27 = vpack.c.bf16 %v2191_v60, %v2187_v39  ;;  %v1758_v29 = vadd.f32 %v1757_v59, %v5034_v13  ;;  %v1759_v37 = vpop.f32.mrb[29].mxu1 }
 0x299   : > { %v5323_v36 = vpack.c.bf16 %v2192_v20, %v2188_v48  ;;  %v1760_v41 = vadd.f32 %v1759_v37, %v5040_v49  ;;  %v1761_v5 = vpop.f32.mrb[30].mxu1  ;;  %v1880_v53 = vpop.f32.mrb[216].mxu0 }
 0x29a   : > { %v1762_v35 = vadd.f32 %v1761_v5, %v5034_v13  ;;  %v1881_v45 = vadd.f32 %v1880_v53, %v5257_v50  ;;  %v1763_v55 = vpop.f32.mrb[31].mxu1  ;;  %v1882_v30 = vpop.f32.mrb[217].mxu0  ;;  %v2377_v22 = vmax.f32 %v1758_v29, 0.0 }
 0x29b   : > { %v1764_v40 = vadd.f32 %v1763_v55, %v5040_v49  ;;  %v1883_v51 = vadd.f32 %v1882_v30, %v5263_v21  ;;  %v1884_v7 = vpop.f32.mrb[218].mxu0  ;;  %v2378_v44 = vmax.f32 %v1760_v41, 0.0 }
 0x29c   : > { %v2381_v32 = vmax.f32 %v1762_v35, 0.0  ;;  %v1885_v62 = vadd.f32 %v1884_v7, %v5257_v50  ;;  %v1886_v58 = vpop.f32.mrb[219].mxu0  ;;  %3017 = vmatmul.mubr.bf16.gmra.mrb[136].mxu1 %v5237_v10  ;;  %v2195_v6 = vmax.f32 %v1881_v45, 0.0 }
 0x29d   : > { %v2382_v25 = vmax.f32 %v1764_v40, 0.0  ;;  %v1887_v34 = vadd.f32 %v1886_v58, %v5263_v21  ;;  %3024 = vmatprep.mubr.bf16.mxu1 %v5259_v9  ;;  %v2196_v56 = vmax.f32 %v1883_v51, 0.0 }
 0x29e   : > { %v5334_v8 = vpack.c.bf16 %v2381_v32, %v2377_v22  ;;  %v2199_v0 = vmax.f32 %v1885_v62, 0.0  ;;  %2149 = vmatmul.mubr.bf16.gmra.mrb[68].mxu0 %v5015_v24 }
 0x29f   : > { %v5337_v1 = vpack.c.bf16 %v2382_v25, %v2378_v44  ;;  %v2200_v14 = vmax.f32 %v1887_v34, 0.0  ;;  %v1767_v57 = vpop.f32.mrb[32].mxu1  ;;  %2158 = vmatprep.mubr.bf16.mxu0 %v5044_v61 }
 0x2a0   : > { %v5340_v10 = vpack.c.bf16 %v2199_v0, %v2195_v6  ;;  %v1768_v28 = vadd.f32 %v1767_v57, %v5034_v13  ;;  %v1769_v26 = vpop.f32.mrb[33].mxu1 }
 0x2a1   : > { %v5343_v43 = vpack.c.bf16 %v2200_v14, %v2196_v56  ;;  %v1770_v9 = vadd.f32 %v1769_v26, %v5040_v49  ;;  %v1771_v54 = vpop.f32.mrb[34].mxu1  ;;  %v1890_v46 = vpop.f32.mrb[220].mxu0 }
 0x2a2   : > { %v1772_v24 = vadd.f32 %v1771_v54, %v5034_v13  ;;  %v1891_v19 = vadd.f32 %v1890_v46, %v5257_v50  ;;  %v1773_v33 = vpop.f32.mrb[35].mxu1  ;;  %v1892_v38 = vpop.f32.mrb[221].mxu0  ;;  %v2385_v23 = vmax.f32 %v1768_v28, 0.0 }
 0x2a3   : > { %v1774_v11 = vadd.f32 %v1773_v33, %v5040_v49  ;;  %v1893_v61 = vadd.f32 %v1892_v38, %v5263_v21  ;;  %v1894_v17 = vpop.f32.mrb[222].mxu0  ;;  %v2386_v20 = vmax.f32 %v1770_v9, 0.0 }
 0x2a4   : > { %v2389_v39 = vmax.f32 %v1772_v24, 0.0  ;;  %v1895_v60 = vadd.f32 %v1894_v17, %v5257_v50  ;;  %v1896_v48 = vpop.f32.mrb[223].mxu0  ;;  %3025 = vmatmul.mubr.bf16.gmra.mrb[140].mxu1 %v5253_v47  ;;  %v2203_v41 = vmax.f32 %v1891_v19, 0.0 }
 0x2a5   : > { %v2390_v59 = vmax.f32 %v1774_v11, 0.0  ;;  %v1897_v29 = vadd.f32 %v1896_v48, %v5263_v21  ;;  %3032 = vmatprep.mubr.bf16.mxu1 %v5277_v2  ;;  %v2204_v35 = vmax.f32 %v1893_v61, 0.0 }
 0x2a6   : > { %v5354_v37 = vpack.c.bf16 %v2389_v39, %v2385_v23  ;;  %v2207_v5 = vmax.f32 %v1895_v60, 0.0  ;;  %2159 = vmatmul.mubr.bf16.gmra.mrb[72].mxu0 %v5042_v12 }
 0x2a7   : > { %v5357_v53 = vpack.c.bf16 %v2390_v59, %v2386_v20  ;;  %v2208_v45 = vmax.f32 %v1897_v29, 0.0  ;;  %v1777_v55 = vpop.f32.mrb[36].mxu1 }
 0x2a8   : > { %v5359_v30 = vpack.c.bf16 %v2207_v5, %v2203_v41  ;;  %v1778_v47 = vadd.f32 %v1777_v55, %v5034_v13  ;;  %v1779_v40 = vpop.f32.mrb[37].mxu1 }
 0x2a9   : > { %v5362_v51 = vpack.c.bf16 %v2208_v45, %v2204_v35  ;;  %v1780_v2 = vadd.f32 %v1779_v40, %v5040_v49  ;;  %v1781_v7 = vpop.f32.mrb[38].mxu1  ;;  %v1900_v22 = vpop.f32.mrb[224].mxu0 }
 0x2aa   : > { %v1782_v32 = vadd.f32 %v1781_v7, %v5034_v13  ;;  %v1901_v12 = vadd.f32 %v1900_v22, %v5257_v50  ;;  %v1783_v62 = vpop.f32.mrb[39].mxu1  ;;  %v1902_v58 = vpop.f32.mrb[225].mxu0  ;;  %v2393_v6 = vmax.f32 %v1778_v47, 0.0 }
 0x2ab   : > { %v1784_v44 = vadd.f32 %v1783_v62, %v5040_v49  ;;  %v1903_v25 = vadd.f32 %v1902_v58, %v5263_v21  ;;  %v1904_v34 = vpop.f32.mrb[226].mxu0  ;;  %v2394_v57 = vmax.f32 %v1780_v2, 0.0 }
 0x2ac   : > { %v2397_v0 = vmax.f32 %v1782_v32, 0.0  ;;  %v1905_v56 = vadd.f32 %v1904_v34, %v5257_v50  ;;  %v1906_v14 = vpop.f32.mrb[227].mxu0  ;;  %3033 = vmatmul.mubr.bf16.gmra.mrb[144].mxu1 %v5274_v63  ;;  %v2211_v54 = vmax.f32 %v1901_v12, 0.0 }
 0x2ad   : > { %v2398_v28 = vmax.f32 %v1784_v44, 0.0  ;;  %v1907_v26 = vadd.f32 %v1906_v14, %v5263_v21  ;;  %3040 = vmatprep.mubr.bf16.mxu1 %v5297_v52  ;;  %v2212_v19 = vmax.f32 %v1903_v25, 0.0 }
 0x2ae   : > { %v5373_v9 = vpack.c.bf16 %v2397_v0, %v2393_v6  ;;  %v2215_v46 = vmax.f32 %v1905_v56, 0.0 }
 0x2af   : > { %v5375_v24 = vpack.c.bf16 %v2398_v28, %v2394_v57  ;;  %v2216_v33 = vmax.f32 %v1907_v26, 0.0  ;;  %v1787_v38 = vpop.f32.mrb[40].mxu1 }
 0x2b0   : > { %v5377_v11 = vpack.c.bf16 %v2215_v46, %v2211_v54  ;;  %v1788_v61 = vadd.f32 %v1787_v38, %v5034_v13  ;;  %v1789_v63 = vpop.f32.mrb[41].mxu1 }
 0x2b1   : > { %v5380_v17 = vpack.c.bf16 %v2216_v33, %v2212_v19  ;;  %v1790_v23 = vadd.f32 %v1789_v63, %v5040_v49  ;;  %v1791_v39 = vpop.f32.mrb[42].mxu1  ;;  %v1910_v52 = vpop.f32.mrb[228].mxu0 }
 0x2b2   : > { %v1792_v60 = vadd.f32 %v1791_v39, %v5034_v13  ;;  %v1911_v48 = vadd.f32 %v1910_v52, %v5257_v50  ;;  %v1793_v20 = vpop.f32.mrb[43].mxu1  ;;  %v1912_v59 = vpop.f32.mrb[229].mxu0  ;;  %v2401_v35 = vmax.f32 %v1788_v61, 0.0 }
 0x2b3   : > { %v1794_v29 = vadd.f32 %v1793_v20, %v5040_v49  ;;  %v1913_v41 = vadd.f32 %v1912_v59, %v5263_v21  ;;  %v1914_v5 = vpop.f32.mrb[230].mxu0  ;;  %v2402_v40 = vmax.f32 %v1790_v23, 0.0 }
 0x2b4   : > { %v2405_v45 = vmax.f32 %v1792_v60, 0.0  ;;  %v1915_v55 = vadd.f32 %v1914_v5, %v5257_v50  ;;  %v1916_v47 = vpop.f32.mrb[231].mxu0  ;;  %3041 = vmatmul.mubr.bf16.gmra.mrb[148].mxu1 %v5294_v3  ;;  %v2219_v32 = vmax.f32 %v1911_v48, 0.0 }
 0x2b5   : > { %v2406_v2 = vmax.f32 %v1794_v29, 0.0  ;;  %v1917_v7 = vadd.f32 %v1916_v47, %v5263_v21  ;;  %3048 = vmatprep.mubr.bf16.mxu1 %v5317_v18  ;;  %v2220_v58 = vmax.f32 %v1913_v41, 0.0 }
 0x2b6   : > { %v5391_v22 = vpack.c.bf16 %v2405_v45, %v2401_v35  ;;  %v2223_v12 = vmax.f32 %v1915_v55, 0.0 }
 0x2b7   : > { %v5393_v62 = vpack.c.bf16 %v2406_v2, %v2402_v40  ;;  %v2224_v44 = vmax.f32 %v1917_v7, 0.0  ;;  %v1797_v25 = vpop.f32.mrb[44].mxu1 }
 0x2b8   : > { %v5395_v34 = vpack.c.bf16 %v2223_v12, %v2219_v32  ;;  %v1798_v6 = vadd.f32 %v1797_v25, %v5034_v13  ;;  %v1799_v3 = vpop.f32.mrb[45].mxu1 }
 0x2b9   : > { %v5398_v0 = vpack.c.bf16 %v2224_v44, %v2220_v58  ;;  %v1800_v56 = vadd.f32 %v1799_v3, %v5040_v49  ;;  %v1801_v14 = vpop.f32.mrb[46].mxu1  ;;  %v1920_v18 = vpop.f32.mrb[232].mxu0 }
 0x2ba   : > { %v1802_v57 = vadd.f32 %v1801_v14, %v5034_v13  ;;  %v1921_v28 = vadd.f32 %v1920_v18, %v5257_v50  ;;  %v1803_v26 = vpop.f32.mrb[47].mxu1  ;;  %v1922_v54 = vpop.f32.mrb[233].mxu0  ;;  %v2409_v38 = vmax.f32 %v1798_v6, 0.0 }
 0x2bb   : > { %v1804_v46 = vadd.f32 %v1803_v26, %v5040_v49  ;;  %v1923_v19 = vadd.f32 %v1922_v54, %v5263_v21  ;;  %v1924_v33 = vpop.f32.mrb[234].mxu0  ;;  %v2410_v39 = vmax.f32 %v1800_v56, 0.0 }
 0x2bc   : > { %v2413_v61 = vmax.f32 %v1802_v57, 0.0  ;;  %v1925_v63 = vadd.f32 %v1924_v33, %v5257_v50  ;;  %v1926_v23 = vpop.f32.mrb[235].mxu0  ;;  %3049 = vmatmul.mubr.bf16.gmra.mrb[152].mxu1 %v5314_v31  ;;  %v2227_v20 = vmax.f32 %v1921_v28, 0.0 }
 0x2bd   : > { %v2414_v52 = vmax.f32 %v1804_v46, 0.0  ;;  %v1927_v60 = vadd.f32 %v1926_v23, %v5263_v21  ;;  %3056 = vmatprep.mubr.bf16.mxu1 %v5337_v1  ;;  %v2228_v41 = vmax.f32 %v1923_v19, 0.0 }
 0x2be   : > { %v5409_v48 = vpack.c.bf16 %v2413_v61, %v2409_v38  ;;  %v2231_v59 = vmax.f32 %v1925_v63, 0.0 }
 0x2bf   : > { %v5411_v29 = vpack.c.bf16 %v2414_v52, %v2410_v39  ;;  %v2232_v5 = vmax.f32 %v1927_v60, 0.0  ;;  %v1807_v35 = vpop.f32.mrb[48].mxu1 }
 0x2c0   : > { %v5413_v45 = vpack.c.bf16 %v2231_v59, %v2227_v20  ;;  %v1808_v55 = vadd.f32 %v1807_v35, %v5034_v13  ;;  %v1809_v31 = vpop.f32.mrb[49].mxu1 }
 0x2c1   : > { %v5416_v47 = vpack.c.bf16 %v2232_v5, %v2228_v41  ;;  %v1810_v40 = vadd.f32 %v1809_v31, %v5040_v49  ;;  %v1811_v2 = vpop.f32.mrb[50].mxu1  ;;  %v1930_v1 = vpop.f32.mrb[236].mxu0 }
 0x2c2   : > { %v1812_v7 = vadd.f32 %v1811_v2, %v5034_v13  ;;  %v1931_v32 = vadd.f32 %v1930_v1, %v5257_v50  ;;  %v1813_v12 = vpop.f32.mrb[51].mxu1  ;;  %v1932_v58 = vpop.f32.mrb[237].mxu0  ;;  %v2417_v3 = vmax.f32 %v1808_v55, 0.0 }
 0x2c3   : > { %v1814_v44 = vadd.f32 %v1813_v12, %v5040_v49  ;;  %v1933_v25 = vadd.f32 %v1932_v58, %v5263_v21  ;;  %v1934_v6 = vpop.f32.mrb[238].mxu0  ;;  %v2418_v57 = vmax.f32 %v1810_v40, 0.0 }
 0x2c4   : > { %v2421_v56 = vmax.f32 %v1812_v7, 0.0  ;;  %v1935_v14 = vadd.f32 %v1934_v6, %v5257_v50  ;;  %v1936_v18 = vpop.f32.mrb[239].mxu0  ;;  %3057 = vmatmul.mubr.bf16.gmra.mrb[156].mxu1 %v5334_v8  ;;  %v2235_v54 = vmax.f32 %v1931_v32, 0.0 }
 0x2c5   : > { %v2422_v28 = vmax.f32 %v1814_v44, 0.0  ;;  %v1937_v13 = vadd.f32 %v1936_v18, %v5263_v21  ;;  %3064 = vmatprep.mubr.bf16.mxu1 %v5357_v53  ;;  %v2236_v19 = vmax.f32 %v1933_v25, 0.0 }
 0x2c6   : > { %v5427_v26 = vpack.c.bf16 %v2421_v56, %v2417_v3  ;;  %v2239_v49 = vmax.f32 %v1935_v14, 0.0 }
 0x2c7   : > { %v2550_v46 = vpack.c.bf16 %v2422_v28, %v2418_v57  ;;  %v2240_v33 = vmax.f32 %v1937_v13, 0.0 }
 0x2c8   : > { %v5429_v38 = vpack.c.bf16 %v2239_v49, %v2235_v54 }
 0x2c9   : > { %v5431_v61 = vpack.c.bf16 %v2240_v33, %v2236_v19  ;;  %v1940_v63 = vpop.f32.mrb[240].mxu0 }
 0x2ca   : > { %v1941_v8 = vadd.f32 %v1940_v63, %v5257_v50  ;;  %v1942_v23 = vpop.f32.mrb[241].mxu0 }
 0x2cb   : > { %v1943_v39 = vadd.f32 %v1942_v23, %v5263_v21  ;;  %v1944_v52 = vpop.f32.mrb[242].mxu0 }
 0x2cc   : > { %v1945_v53 = vadd.f32 %v1944_v52, %v5257_v50  ;;  %v1946_v60 = vpop.f32.mrb[243].mxu0  ;;  %3065 = vmatmul.mubr.bf16.gmra.mrb[160].mxu1 %v5354_v37  ;;  %v2243_v59 = vmax.f32 %v1941_v8, 0.0 }
 0x2cd   : > { %v1947_v20 = vadd.f32 %v1946_v60, %v5263_v21  ;;  %3072 = vmatprep.mubr.bf16.mxu1 %v5375_v24  ;;  %v2244_v5 = vmax.f32 %v1943_v39, 0.0 }
 0x2ce   : > { %v2247_v41 = vmax.f32 %v1945_v53, 0.0 }
 0x2cf   : > { %v2248_v35 = vmax.f32 %v1947_v20, 0.0 }
 0x2d0   : > { %v5439_v55 = vpack.c.bf16 %v2247_v41, %v2243_v59 }
 0x2d1   : > { %v5441_v31 = vpack.c.bf16 %v2248_v35, %v2244_v5  ;;  %v1950_v40 = vpop.f32.mrb[244].mxu0 }
 0x2d2   : > { %v1951_v2 = vadd.f32 %v1950_v40, %v5257_v50  ;;  %v1952_v1 = vpop.f32.mrb[245].mxu0 }
 0x2d3   : > { %v1953_v7 = vadd.f32 %v1952_v1, %v5263_v21  ;;  %v1954_v32 = vpop.f32.mrb[246].mxu0 }
 0x2d4   : > { %v1955_v37 = vadd.f32 %v1954_v32, %v5257_v50  ;;  %v1956_v12 = vpop.f32.mrb[247].mxu0  ;;  %3073 = vmatmul.mubr.bf16.gmra.mrb[164].mxu1 %v5373_v9  ;;  %v2251_v58 = vmax.f32 %v1951_v2, 0.0 }
 0x2d5   : > { %v1957_v24 = vadd.f32 %v1956_v12, %v5263_v21  ;;  %3080 = vmatprep.mubr.bf16.mxu1 %v5393_v62  ;;  %v2252_v25 = vmax.f32 %v1953_v7, 0.0 }
 0x2d6   : > { %v2255_v44 = vmax.f32 %v1955_v37, 0.0 }
 0x2d7   : > { %v2256_v6 = vmax.f32 %v1957_v24, 0.0 }
 0x2d8   : > { %v5449_v3 = vpack.c.bf16 %v2255_v44, %v2251_v58 }
 0x2d9   : > { %v5451_v56 = vpack.c.bf16 %v2256_v6, %v2252_v25  ;;  %v1960_v14 = vpop.f32.mrb[248].mxu0 }
 0x2da   : > { %v1961_v18 = vadd.f32 %v1960_v14, %v5257_v50  ;;  %v1962_v57 = vpop.f32.mrb[249].mxu0 }
 0x2db   : > { %v1963_v28 = vadd.f32 %v1962_v57, %v5263_v21  ;;  %v1964_v13 = vpop.f32.mrb[250].mxu0 }
 0x2dc   : > { %v1965_v9 = vadd.f32 %v1964_v13, %v5257_v50  ;;  %v1966_v54 = vpop.f32.mrb[251].mxu0  ;;  %3081 = vmatmul.mubr.bf16.gmra.mrb[168].mxu1 %v5391_v22  ;;  %v2259_v49 = vmax.f32 %v1961_v18, 0.0 }
 0x2dd   : > { %v1967_v62 = vadd.f32 %v1966_v54, %v5263_v21  ;;  %3088 = vmatprep.mubr.bf16.mxu1 %v5411_v29  ;;  %v2260_v33 = vmax.f32 %v1963_v28, 0.0 }
 0x2de   : > { %v2263_v19 = vmax.f32 %v1965_v9, 0.0 }
 0x2df   : > { %v2264_v63 = vmax.f32 %v1967_v62, 0.0 }
 0x2e0   : > { %v5459_v8 = vpack.c.bf16 %v2263_v19, %v2259_v49 }
 0x2e1   : > { %v5461_v23 = vpack.c.bf16 %v2264_v63, %v2260_v33  ;;  %v1970_v39 = vpop.f32.mrb[252].mxu0 }
 0x2e2   : > { %v1971_v52 = vadd.f32 %v1970_v39, %v5257_v50  ;;  %v1972_v53 = vpop.f32.mrb[253].mxu0 }
 0x2e3   : > { %v1973_v60 = vadd.f32 %v1972_v53, %v5263_v21  ;;  %v1974_v20 = vpop.f32.mrb[254].mxu0 }
 0x2e4   : > { %v1975_v22 = vadd.f32 %v1974_v20, %v5257_v50  ;;  %v1976_v59 = vpop.f32.mrb[255].mxu0  ;;  %3089 = vmatmul.mubr.bf16.gmra.mrb[172].mxu1 %v5409_v48  ;;  %v2267_v41 = vmax.f32 %v1971_v52, 0.0 }
 0x2e5   : > { %v1977_v29 = vadd.f32 %v1976_v59, %v5263_v21  ;;  %3096 = vmatprep.mubr.bf16.mxu1 %v2550_v46  ;;  %v2268_v35 = vmax.f32 %v1973_v60, 0.0 }
 0x2e6   : > { %v2271_v5 = vmax.f32 %v1975_v22, 0.0 }
 0x2e7   : > { %v2272_v40 = vmax.f32 %v1977_v29, 0.0 }
 0x2e8   : > { %v5468_v2 = vpack.c.bf16 %v2271_v5, %v2267_v41 }
 0x2e9   : > { %v5470_v1 = vpack.c.bf16 %v2272_v40, %v2268_v35  ;;  %v1980_v7 = vpop.f32.mrb[0].mxu0 }
 0x2ea   : > { %v1981_v32 = vadd.f32 %v1980_v7, %v5257_v50  ;;  %v1982_v37 = vpop.f32.mrb[1].mxu0 }
 0x2eb   : > { %v1983_v12 = vadd.f32 %v1982_v37, %v5263_v21  ;;  %v1984_v24 = vpop.f32.mrb[2].mxu0 }
 0x2ec   : > { %v1985_v48 = vadd.f32 %v1984_v24, %v5257_v50  ;;  %v1986_v58 = vpop.f32.mrb[3].mxu0  ;;  %3097 = vmatmul.mubr.bf16.gmra.mrb[176].mxu1 %v5427_v26  ;;  %v2275_v44 = vmax.f32 %v1981_v32, 0.0 }
 0x2ed   : > { %v1987_v46 = vadd.f32 %v1986_v58, %v5263_v21  ;;  %3137 = vmatprep.mubr.bf16.mxu1 %v5283_v15  ;;  %v2276_v6 = vmax.f32 %v1983_v12, 0.0 }
 0x2ee   : > { %v2279_v25 = vmax.f32 %v1985_v48, 0.0 }
 0x2ef   : > { %v2280_v14 = vmax.f32 %v1987_v46, 0.0 }
 0x2f0   : > { %v5478_v18 = vpack.c.bf16 %v2279_v25, %v2275_v44 }
 0x2f1   : > { %v5480_v57 = vpack.c.bf16 %v2280_v14, %v2276_v6  ;;  %v1990_v28 = vpop.f32.mrb[4].mxu0 }
 0x2f2   : > { %v1991_v13 = vadd.f32 %v1990_v28, %v5257_v50  ;;  %v1992_v9 = vpop.f32.mrb[5].mxu0 }
 0x2f3   : > { %v1993_v54 = vadd.f32 %v1992_v9, %v5263_v21  ;;  %v1994_v62 = vpop.f32.mrb[6].mxu0 }
 0x2f4   : > { %v1995_v26 = vadd.f32 %v1994_v62, %v5257_v50  ;;  %v1996_v49 = vpop.f32.mrb[7].mxu0  ;;  %3138 = vmatmul.mubr.bf16.vlgmr.msra.gmra.mrb[52].mxu1 %v5280_v16  ;;  %v2283_v19 = vmax.f32 %v1991_v13, 0.0 }
 0x2f5   : > { %v1997_v15 = vadd.f32 %v1996_v49, %v5263_v21  ;;  %3145 = vmatprep.mubr.bf16.mxu1 %v5303_v42  ;;  %v2284_v63 = vmax.f32 %v1993_v54, 0.0 }
 0x2f6   : > { %v2287_v33 = vmax.f32 %v1995_v26, 0.0 }
 0x2f7   : > { %v2288_v39 = vmax.f32 %v1997_v15, 0.0 }
 0x2f8   : > { %v5488_v52 = vpack.c.bf16 %v2287_v33, %v2283_v19 }
 0x2f9   : > { %v5490_v53 = vpack.c.bf16 %v2288_v39, %v2284_v63  ;;  %v2000_v60 = vpop.f32.mrb[8].mxu0 }
 0x2fa   : > { %v2001_v20 = vadd.f32 %v2000_v60, %v5257_v50  ;;  %v2002_v22 = vpop.f32.mrb[9].mxu0 }
 0x2fb   : > { %v2003_v59 = vadd.f32 %v2002_v22, %v5263_v21  ;;  %v2004_v29 = vpop.f32.mrb[10].mxu0 }
 0x2fc   : > { %v2005_v16 = vadd.f32 %v2004_v29, %v5257_v50  ;;  %v2006_v41 = vpop.f32.mrb[11].mxu0  ;;  %3146 = vmatmul.mubr.bf16.gmra.mrb[56].mxu1 %v5300_v4  ;;  %v2291_v5 = vmax.f32 %v2001_v20, 0.0 }
 0x2fd   : > { %v2007_v42 = vadd.f32 %v2006_v41, %v5263_v21  ;;  %3153 = vmatprep.mubr.bf16.mxu1 %v5323_v36  ;;  %v2292_v40 = vmax.f32 %v2003_v59, 0.0 }
 0x2fe   : > { %v2295_v35 = vmax.f32 %v2005_v16, 0.0 }
 0x2ff   : > { %v2296_v7 = vmax.f32 %v2007_v42, 0.0 }
 0x300   : > { %v5498_v32 = vpack.c.bf16 %v2295_v35, %v2291_v5 }
 0x301   : > { %v5500_v37 = vpack.c.bf16 %v2296_v7, %v2292_v40  ;;  %v2010_v12 = vpop.f32.mrb[12].mxu0 }
 0x302   : > { %v2011_v24 = vadd.f32 %v2010_v12, %v5257_v50  ;;  %v2012_v48 = vpop.f32.mrb[13].mxu0 }
 0x303   : > { %v2013_v58 = vadd.f32 %v2012_v48, %v5263_v21  ;;  %v2014_v46 = vpop.f32.mrb[14].mxu0 }
 0x304   : > { %v2015_v4 = vadd.f32 %v2014_v46, %v5257_v50  ;;  %v2016_v44 = vpop.f32.mrb[15].mxu0  ;;  %3154 = vmatmul.mubr.bf16.gmra.mrb[60].mxu1 %v5320_v27  ;;  %v2299_v25 = vmax.f32 %v2011_v24, 0.0 }
 0x305   : > { %v2017_v36 = vadd.f32 %v2016_v44, %v5263_v21  ;;  %3161 = vmatprep.mubr.bf16.mxu1 %v5343_v43  ;;  %v2300_v14 = vmax.f32 %v2013_v58, 0.0 }
 0x306   : > { %v2303_v6 = vmax.f32 %v2015_v4, 0.0 }
 0x307   : > { %v2304_v28 = vmax.f32 %v2017_v36, 0.0 }
 0x308   : > { %v5508_v13 = vpack.c.bf16 %v2303_v6, %v2299_v25 }
 0x309   : > { %v5510_v9 = vpack.c.bf16 %v2304_v28, %v2300_v14  ;;  %v2020_v54 = vpop.f32.mrb[16].mxu0 }
 0x30a   : > { %v2021_v62 = vadd.f32 %v2020_v54, %v5257_v50  ;;  %v2022_v26 = vpop.f32.mrb[17].mxu0 }
 0x30b   : > { %v2023_v49 = vadd.f32 %v2022_v26, %v5263_v21  ;;  %v2024_v15 = vpop.f32.mrb[18].mxu0 }
 0x30c   : > { %v2025_v27 = vadd.f32 %v2024_v15, %v5257_v50  ;;  %v2026_v19 = vpop.f32.mrb[19].mxu0  ;;  %3162 = vmatmul.mubr.bf16.gmra.mrb[64].mxu1 %v5340_v10  ;;  %v2307_v33 = vmax.f32 %v2021_v62, 0.0 }
 0x30d   : > { %v2027_v43 = vadd.f32 %v2026_v19, %v5263_v21  ;;  %3169 = vmatprep.mubr.bf16.mxu1 %v5362_v51  ;;  %v2308_v39 = vmax.f32 %v2023_v49, 0.0 }
 0x30e   : > { %v2311_v63 = vmax.f32 %v2025_v27, 0.0 }
 0x30f   : > { %v2312_v60 = vmax.f32 %v2027_v43, 0.0 }
 0x310   : > { %v5518_v20 = vpack.c.bf16 %v2311_v63, %v2307_v33 }
 0x311   : > { %v5520_v22 = vpack.c.bf16 %v2312_v60, %v2308_v39  ;;  %v2030_v59 = vpop.f32.mrb[20].mxu0 }
 0x312   : > { %v2031_v29 = vadd.f32 %v2030_v59, %v5257_v50  ;;  %v2032_v16 = vpop.f32.mrb[21].mxu0 }
 0x313   : > { %v2033_v41 = vadd.f32 %v2032_v16, %v5263_v21  ;;  %v2034_v42 = vpop.f32.mrb[22].mxu0 }
 0x314   : > { %v2035_v10 = vadd.f32 %v2034_v42, %v5257_v50  ;;  %v2036_v5 = vpop.f32.mrb[23].mxu0  ;;  %3170 = vmatmul.mubr.bf16.gmra.mrb[68].mxu1 %v5359_v30  ;;  %v2315_v35 = vmax.f32 %v2031_v29, 0.0 }
 0x315   : > { %v2037_v51 = vadd.f32 %v2036_v5, %v5263_v21  ;;  %3177 = vmatprep.mubr.bf16.mxu1 %v5380_v17  ;;  %v2316_v7 = vmax.f32 %v2033_v41, 0.0 }
 0x316   : > { %v2319_v40 = vmax.f32 %v2035_v10, 0.0 }
 0x317   : > { %v2320_v12 = vmax.f32 %v2037_v51, 0.0 }
 0x318   : > { %v5528_v24 = vpack.c.bf16 %v2319_v40, %v2315_v35 }
 0x319   : > { %v5530_v48 = vpack.c.bf16 %v2320_v12, %v2316_v7  ;;  %v2040_v58 = vpop.f32.mrb[24].mxu0 }
 0x31a   : > { %v2041_v46 = vadd.f32 %v2040_v58, %v5257_v50  ;;  %v2042_v4 = vpop.f32.mrb[25].mxu0 }
 0x31b   : > { %v2043_v44 = vadd.f32 %v2042_v4, %v5263_v21  ;;  %v2044_v36 = vpop.f32.mrb[26].mxu0 }
 0x31c   : > { %v2045_v30 = vadd.f32 %v2044_v36, %v5257_v50  ;;  %v2046_v25 = vpop.f32.mrb[27].mxu0  ;;  %3178 = vmatmul.mubr.bf16.gmra.mrb[72].mxu1 %v5377_v11  ;;  %v2323_v6 = vmax.f32 %v2041_v46, 0.0 }
 0x31d   : > { %v2047_v17 = vadd.f32 %v2046_v25, %v5263_v21  ;;  %3185 = vmatprep.mubr.bf16.mxu1 %v5398_v0  ;;  %v2324_v28 = vmax.f32 %v2043_v44, 0.0 }
 0x31e   : > { %v2327_v14 = vmax.f32 %v2045_v30, 0.0 }
 0x31f   : > { %v2328_v54 = vmax.f32 %v2047_v17, 0.0 }
 0x320   : > { %v5538_v62 = vpack.c.bf16 %v2327_v14, %v2323_v6 }
 0x321   : > { %v5540_v26 = vpack.c.bf16 %v2328_v54, %v2324_v28  ;;  %v2050_v49 = vpop.f32.mrb[28].mxu0 }
 0x322   : > { %v2051_v15 = vadd.f32 %v2050_v49, %v5257_v50  ;;  %v2052_v27 = vpop.f32.mrb[29].mxu0 }
 0x323   : > { %v2053_v19 = vadd.f32 %v2052_v27, %v5263_v21  ;;  %v2054_v43 = vpop.f32.mrb[30].mxu0 }
 0x324   : > { %v2055_v11 = vadd.f32 %v2054_v43, %v5257_v50  ;;  %v2056_v33 = vpop.f32.mrb[31].mxu0  ;;  %3186 = vmatmul.mubr.bf16.gmra.mrb[76].mxu1 %v5395_v34  ;;  %v2331_v63 = vmax.f32 %v2051_v15, 0.0 }
 0x325   : > { %v2057_v0 = vadd.f32 %v2056_v33, %v5263_v21  ;;  %3193 = vmatprep.mubr.bf16.mxu1 %v5416_v47  ;;  %v2332_v60 = vmax.f32 %v2053_v19, 0.0 }
 0x326   : > { %v2335_v39 = vmax.f32 %v2055_v11, 0.0 }
 0x327   : > { %v2336_v59 = vmax.f32 %v2057_v0, 0.0 }
 0x328   : > { %v5548_v29 = vpack.c.bf16 %v2335_v39, %v2331_v63 }
 0x329   : > { %v5550_v16 = vpack.c.bf16 %v2336_v59, %v2332_v60  ;;  %v2060_v41 = vpop.f32.mrb[32].mxu0 }
 0x32a   : > { %v2061_v42 = vadd.f32 %v2060_v41, %v5257_v50  ;;  %v2062_v10 = vpop.f32.mrb[33].mxu0 }
 0x32b   : > { %v2063_v5 = vadd.f32 %v2062_v10, %v5263_v21  ;;  %v2064_v51 = vpop.f32.mrb[34].mxu0 }
 0x32c   : > { %v2065_v34 = vadd.f32 %v2064_v51, %v5257_v50  ;;  %v2066_v35 = vpop.f32.mrb[35].mxu0  ;;  %3194 = vmatmul.mubr.bf16.gmra.mrb[80].mxu1 %v5413_v45  ;;  %v2339_v40 = vmax.f32 %v2061_v42, 0.0 }
 0x32d   : > { %v2067_v47 = vadd.f32 %v2066_v35, %v5263_v21  ;;  %3201 = vmatprep.mubr.bf16.mxu1 %v5431_v61  ;;  %v2340_v12 = vmax.f32 %v2063_v5, 0.0 }
 0x32e   : > { %v2343_v7 = vmax.f32 %v2065_v34, 0.0 }
 0x32f   : > { %v2344_v58 = vmax.f32 %v2067_v47, 0.0 }
 0x330   : > { %v5558_v46 = vpack.c.bf16 %v2343_v7, %v2339_v40 }
 0x331   : > { %v5560_v4 = vpack.c.bf16 %v2344_v58, %v2340_v12  ;;  %v2070_v44 = vpop.f32.mrb[36].mxu0 }
 0x332   : > { %v2071_v36 = vadd.f32 %v2070_v44, %v5257_v50  ;;  %v2072_v30 = vpop.f32.mrb[37].mxu0 }
 0x333   : > { %v2073_v25 = vadd.f32 %v2072_v30, %v5263_v21  ;;  %v2074_v17 = vpop.f32.mrb[38].mxu0 }
 0x334   : > { %v2075_v45 = vadd.f32 %v2074_v17, %v5257_v50  ;;  %v2076_v6 = vpop.f32.mrb[39].mxu0  ;;  %3202 = vmatmul.mubr.bf16.gmra.mrb[84].mxu1 %v5429_v38  ;;  %v2347_v14 = vmax.f32 %v2071_v36, 0.0 }
 0x335   : > { %v2077_v61 = vadd.f32 %v2076_v6, %v5263_v21  ;;  %3209 = vmatprep.mubr.bf16.mxu1 %v5441_v31  ;;  %v2348_v54 = vmax.f32 %v2073_v25, 0.0 }
 0x336   : > { %v2351_v28 = vmax.f32 %v2075_v45, 0.0 }
 0x337   : > { %v2352_v49 = vmax.f32 %v2077_v61, 0.0 }
 0x338   : > { %v5568_v15 = vpack.c.bf16 %v2351_v28, %v2347_v14 }
 0x339   : > { %v5570_v27 = vpack.c.bf16 %v2352_v49, %v2348_v54  ;;  %v2080_v19 = vpop.f32.mrb[40].mxu0 }
 0x33a   : > { %v2081_v43 = vadd.f32 %v2080_v19, %v5257_v50  ;;  %v2082_v11 = vpop.f32.mrb[41].mxu0 }
 0x33b   : > { %v2083_v33 = vadd.f32 %v2082_v11, %v5263_v21  ;;  %v2084_v0 = vpop.f32.mrb[42].mxu0 }
 0x33c   : > { %v2085_v38 = vadd.f32 %v2084_v0, %v5257_v50  ;;  %v2086_v63 = vpop.f32.mrb[43].mxu0  ;;  %3210 = vmatmul.mubr.bf16.gmra.mrb[88].mxu1 %v5439_v55  ;;  %v2355_v39 = vmax.f32 %v2081_v43, 0.0 }
 0x33d   : > { %v2087_v31 = vadd.f32 %v2086_v63, %v5263_v21  ;;  %3217 = vmatprep.mubr.bf16.mxu1 %v5451_v56  ;;  %v2356_v59 = vmax.f32 %v2083_v33, 0.0 }
 0x33e   : > { %v2359_v60 = vmax.f32 %v2085_v38, 0.0 }
 0x33f   : > { %v2360_v41 = vmax.f32 %v2087_v31, 0.0 }
 0x340   : > { %v5578_v42 = vpack.c.bf16 %v2359_v60, %v2355_v39 }
 0x341   : > { %v5580_v10 = vpack.c.bf16 %v2360_v41, %v2356_v59  ;;  %v2090_v5 = vpop.f32.mrb[44].mxu0 }
 0x342   : > { %v2091_v51 = vadd.f32 %v2090_v5, %v5257_v50  ;;  %v2092_v34 = vpop.f32.mrb[45].mxu0 }
 0x343   : > { %v2093_v35 = vadd.f32 %v2092_v34, %v5263_v21  ;;  %v2094_v47 = vpop.f32.mrb[46].mxu0 }
 0x344   : > { %v2095_v55 = vadd.f32 %v2094_v47, %v5257_v50  ;;  %v2096_v40 = vpop.f32.mrb[47].mxu0  ;;  %3218 = vmatmul.mubr.bf16.gmra.mrb[92].mxu1 %v5449_v3  ;;  %v2363_v7 = vmax.f32 %v2091_v51, 0.0 }
 0x345   : > { %v2097_v56 = vadd.f32 %v2096_v40, %v5263_v21  ;;  %3225 = vmatprep.mubr.bf16.mxu1 %v5461_v23  ;;  %v2364_v58 = vmax.f32 %v2093_v35, 0.0 }
 0x346   : > { %v2367_v12 = vmax.f32 %v2095_v55, 0.0 }
 0x347   : > { %v2368_v44 = vmax.f32 %v2097_v56, 0.0 }
 0x348   : > { %v5588_v36 = vpack.c.bf16 %v2367_v12, %v2363_v7 }
 0x349   : > { %v5590_v30 = vpack.c.bf16 %v2368_v44, %v2364_v58  ;;  %v2100_v25 = vpop.f32.mrb[48].mxu0 }
 0x34a   : > { %v2101_v17 = vadd.f32 %v2100_v25, %v5257_v50  ;;  %v2102_v45 = vpop.f32.mrb[49].mxu0 }
 0x34b   : > { %v2103_v6 = vadd.f32 %v2102_v45, %v5263_v21  ;;  %v2104_v61 = vpop.f32.mrb[50].mxu0 }
 0x34c   : > { %v2105_v3 = vadd.f32 %v2104_v61, %v5257_v50  ;;  %v2106_v14 = vpop.f32.mrb[51].mxu0  ;;  %3226 = vmatmul.mubr.bf16.gmra.mrb[96].mxu1 %v5459_v8  ;;  %v2371_v28 = vmax.f32 %v2101_v17, 0.0 }
 0x34d   : > { %v2107_v23 = vadd.f32 %v2106_v14, %v5263_v21  ;;  %3233 = vmatprep.mubr.bf16.mxu1 %v5470_v1  ;;  %v2372_v49 = vmax.f32 %v2103_v6, 0.0 }
 0x34e   : > { %v2375_v54 = vmax.f32 %v2105_v3, 0.0 }
 0x34f   : > { %v2376_v19 = vmax.f32 %v2107_v23, 0.0 }
 0x350   : > { %v5598_v43 = vpack.c.bf16 %v2375_v54, %v2371_v28 }
 0x351   : > { %v5600_v11 = vpack.c.bf16 %v2376_v19, %v2372_v49  ;;  %v2110_v33 = vpop.f32.mrb[52].mxu0 }
 0x352   : > { %v2111_v0 = vadd.f32 %v2110_v33, %v5257_v50  ;;  %v2112_v38 = vpop.f32.mrb[53].mxu0 }
 0x353   : > { %v2113_v63 = vadd.f32 %v2112_v38, %v5263_v21  ;;  %v2114_v31 = vpop.f32.mrb[54].mxu0 }
 0x354   : > { %v2115_v8 = vadd.f32 %v2114_v31, %v5257_v50  ;;  %v2116_v39 = vpop.f32.mrb[55].mxu0  ;;  %3234 = vmatmul.mubr.bf16.gmra.mrb[100].mxu1 %v5468_v2  ;;  %v2379_v60 = vmax.f32 %v2111_v0, 0.0 }
 0x355   : > { %v2117_v1 = vadd.f32 %v2116_v39, %v5263_v21  ;;  %3241 = vmatprep.mubr.bf16.mxu1 %v5480_v57  ;;  %v2380_v41 = vmax.f32 %v2113_v63, 0.0 }
 0x356   : > { %v2383_v59 = vmax.f32 %v2115_v8, 0.0 }
 0x357   : > { %v2384_v5 = vmax.f32 %v2117_v1, 0.0 }
 0x358   : > { %v5608_v51 = vpack.c.bf16 %v2383_v59, %v2379_v60 }
 0x359   : > { %v5610_v34 = vpack.c.bf16 %v2384_v5, %v2380_v41  ;;  %v2120_v35 = vpop.f32.mrb[56].mxu0 }
 0x35a   : > { %v2121_v47 = vadd.f32 %v2120_v35, %v5257_v50  ;;  %v2122_v55 = vpop.f32.mrb[57].mxu0 }
 0x35b   : > { %v2123_v40 = vadd.f32 %v2122_v55, %v5263_v21  ;;  %v2124_v56 = vpop.f32.mrb[58].mxu0 }
 0x35c   : > { %v2125_v2 = vadd.f32 %v2124_v56, %v5257_v50  ;;  %v2126_v7 = vpop.f32.mrb[59].mxu0  ;;  %3242 = vmatmul.mubr.bf16.gmra.mrb[104].mxu1 %v5478_v18  ;;  %v2387_v12 = vmax.f32 %v2121_v47, 0.0 }
 0x35d   : > { %v2127_v57 = vadd.f32 %v2126_v7, %v5263_v21  ;;  %3249 = vmatprep.mubr.bf16.mxu1 %v5490_v53  ;;  %v2388_v44 = vmax.f32 %v2123_v40, 0.0 }
 0x35e   : > { %v2391_v58 = vmax.f32 %v2125_v2, 0.0 }
 0x35f   : > { %v2392_v25 = vmax.f32 %v2127_v57, 0.0 }
 0x360   : > { %v5618_v17 = vpack.c.bf16 %v2391_v58, %v2387_v12 }
 0x361   : > { %v5620_v45 = vpack.c.bf16 %v2392_v25, %v2388_v44  ;;  %v2130_v6 = vpop.f32.mrb[60].mxu0 }
 0x362   : > { %v2131_v61 = vadd.f32 %v2130_v6, %v5257_v50  ;;  %v2132_v3 = vpop.f32.mrb[61].mxu0 }
 0x363   : > { %v2133_v14 = vadd.f32 %v2132_v3, %v5263_v21  ;;  %v2134_v23 = vpop.f32.mrb[62].mxu0 }
 0x364   : > { %v2135_v18 = vadd.f32 %v2134_v23, %v5257_v50  ;;  %v2136_v28 = vpop.f32.mrb[63].mxu0  ;;  %3250 = vmatmul.mubr.bf16.gmra.mrb[108].mxu1 %v5488_v52  ;;  %v2395_v54 = vmax.f32 %v2131_v61, 0.0 }
 0x365   : > { %v2137_v53 = vadd.f32 %v2136_v28, %v5263_v21  ;;  %3257 = vmatprep.mubr.bf16.mxu1 %v5500_v37  ;;  %v2396_v19 = vmax.f32 %v2133_v14, 0.0 }
 0x366   : > { %v2399_v49 = vmax.f32 %v2135_v18, 0.0 }
 0x367   : > { %v2400_v33 = vmax.f32 %v2137_v53, 0.0 }
 0x368   : > { %v5628_v0 = vpack.c.bf16 %v2399_v49, %v2395_v54 }
 0x369   : > { %v5630_v38 = vpack.c.bf16 %v2400_v33, %v2396_v19  ;;  %v2140_v63 = vpop.f32.mrb[64].mxu0 }
 0x36a   : > { %v2141_v31 = vadd.f32 %v2140_v63, %v5257_v50  ;;  %v2142_v8 = vpop.f32.mrb[65].mxu0 }
 0x36b   : > { %v2143_v39 = vadd.f32 %v2142_v8, %v5263_v21  ;;  %v2144_v1 = vpop.f32.mrb[66].mxu0 }
 0x36c   : > { %v2145_v52 = vadd.f32 %v2144_v1, %v5257_v50  ;;  %v2146_v60 = vpop.f32.mrb[67].mxu0  ;;  %3258 = vmatmul.mubr.bf16.gmra.mrb[112].mxu1 %v5498_v32  ;;  %v2403_v59 = vmax.f32 %v2141_v31, 0.0 }
 0x36d   : > { %v2147_v37 = vadd.f32 %v2146_v60, %v5263_v21  ;;  %3265 = vmatprep.mubr.bf16.mxu1 %v5510_v9  ;;  %v2404_v5 = vmax.f32 %v2143_v39, 0.0 }
 0x36e   : > { %v2407_v41 = vmax.f32 %v2145_v52, 0.0 }
 0x36f   : > { %v2408_v35 = vmax.f32 %v2147_v37, 0.0 }
 0x370   : > { %v5638_v47 = vpack.c.bf16 %v2407_v41, %v2403_v59 }
 0x371   : > { %v5640_v55 = vpack.c.bf16 %v2408_v35, %v2404_v5  ;;  %v2150_v40 = vpop.f32.mrb[68].mxu0 }
 0x372   : > { %v2151_v56 = vadd.f32 %v2150_v40, %v5257_v50  ;;  %v2152_v2 = vpop.f32.mrb[69].mxu0 }
 0x373   : > { %v2153_v7 = vadd.f32 %v2152_v2, %v5263_v21  ;;  %v2154_v57 = vpop.f32.mrb[70].mxu0 }
 0x374   : > { %v2155_v32 = vadd.f32 %v2154_v57, %v5257_v50  ;;  %v2156_v12 = vpop.f32.mrb[71].mxu0  ;;  %3266 = vmatmul.mubr.bf16.gmra.mrb[116].mxu1 %v5508_v13  ;;  %v2411_v58 = vmax.f32 %v2151_v56, 0.0 }
 0x375   : > { %v2157_v9 = vadd.f32 %v2156_v12, %v5263_v21  ;;  %3273 = vmatprep.mubr.bf16.mxu1 %v5520_v22  ;;  %v2412_v25 = vmax.f32 %v2153_v7, 0.0 }
 0x376   : > { %v2415_v44 = vmax.f32 %v2155_v32, 0.0 }
 0x377   : > { %v2416_v6 = vmax.f32 %v2157_v9, 0.0 }
 0x378   : > { %v5648_v61 = vpack.c.bf16 %v2415_v44, %v2411_v58 }
 0x379   : > { %v5650_v3 = vpack.c.bf16 %v2416_v6, %v2412_v25  ;;  %v2160_v14 = vpop.f32.mrb[72].mxu0 }
 0x37a   : > { %v2161_v23 = vadd.f32 %v2160_v14, %v5257_v50  ;;  %v2162_v18 = vpop.f32.mrb[73].mxu0 }
 0x37b   : > { %v2163_v28 = vadd.f32 %v2162_v18, %v5263_v21  ;;  %v2164_v53 = vpop.f32.mrb[74].mxu0 }
 0x37c   : > { %v2165_v13 = vadd.f32 %v2164_v53, %v5257_v50  ;;  %v2166_v54 = vpop.f32.mrb[75].mxu0  ;;  %3274 = vmatmul.mubr.bf16.gmra.mrb[120].mxu1 %v5518_v20  ;;  %v2419_v49 = vmax.f32 %v2161_v23, 0.0  ;;  %v5683_v50 = vld [vmem:[%s5838_s6] ss:$0 sm:$0xff] }
 0x37d   : > { %v2167_v22 = vadd.f32 %v2166_v54, %v5263_v21  ;;  %3281 = vmatprep.mubr.bf16.mxu1 %v5530_v48  ;;  %v2420_v33 = vmax.f32 %v2163_v28, 0.0 }
 0x37e   : > { %v2423_v19 = vmax.f32 %v2165_v13, 0.0 }
 0x37f   : > { %v2424_v63 = vmax.f32 %v2167_v22, 0.0 }
 0x380   : > { %v5658_v31 = vpack.c.bf16 %v2423_v19, %v2419_v49 }
 0x381   : > { %v5660_v8 = vpack.c.bf16 %v2424_v63, %v2420_v33 }
 0x384   : > { %3282 = vmatmul.mubr.bf16.gmra.mrb[124].mxu1 %v5528_v24 }
 0x385   : > { %3289 = vmatprep.mubr.bf16.mxu1 %v5540_v26 }
 0x38c   : > { %3290 = vmatmul.mubr.bf16.gmra.mrb[128].mxu1 %v5538_v62 }
 0x38d   : > { %3297 = vmatprep.mubr.bf16.mxu1 %v5550_v16 }
 0x394   : > { %3298 = vmatmul.mubr.bf16.gmra.mrb[132].mxu1 %v5548_v29 }
 0x395   : > { %3305 = vmatprep.mubr.bf16.mxu1 %v5560_v4 }
 0x39c   : > { %3306 = vmatmul.mubr.bf16.gmra.mrb[136].mxu1 %v5558_v46 }
 0x39d   : > { %3313 = vmatprep.mubr.bf16.mxu1 %v5570_v27 }
 0x3a4   : > { %3314 = vmatmul.mubr.bf16.gmra.mrb[140].mxu1 %v5568_v15 }
 0x3a5   : > { %3321 = vmatprep.mubr.bf16.mxu1 %v5580_v10 }
 0x3ac   : > { %3322 = vmatmul.mubr.bf16.gmra.mrb[144].mxu1 %v5578_v42 }
 0x3ad   : > { %3329 = vmatprep.mubr.bf16.mxu1 %v5590_v30 }
 0x3b4   : > { %3330 = vmatmul.mubr.bf16.gmra.mrb[148].mxu1 %v5588_v36 }
 0x3b5   : > { %3337 = vmatprep.mubr.bf16.mxu1 %v5600_v11 }
 0x3bc   : > { %3338 = vmatmul.mubr.bf16.gmra.mrb[152].mxu1 %v5598_v43 }
 0x3bd   : > { %3345 = vmatprep.mubr.bf16.mxu1 %v5610_v34 }
 0x3c4   : > { %3346 = vmatmul.mubr.bf16.gmra.mrb[156].mxu1 %v5608_v51 }
 0x3c5   : > { %3353 = vmatprep.mubr.bf16.mxu1 %v5620_v45 }
 0x3c7   : > { %v3139_v21 = vpop.f32.mrb[52].mxu1 }
 0x3c8   : > { %v3754_v20 = vadd.f32 %v5683_v50, %v3139_v21  ;;  %v3141_v24 = vpop.f32.mrb[53].mxu1 }
 0x3c9   : > { %v3142_v48 = vpop.f32.mrb[54].mxu1 }
 0x3ca   : > { %4089 = vtanh.f32 %v3754_v20  ;;  %v3755_v62 = vadd.f32 %v5683_v50, %v3142_v48  ;;  %v3144_v26 = vpop.f32.mrb[55].mxu1 }
 0x3cc   : > { %4091 = vtanh.f32 %v3755_v62  ;;  %3354 = vmatmul.mubr.bf16.gmra.mrb[160].mxu1 %v5618_v17 }
 0x3cd   : > { %3361 = vmatprep.mubr.bf16.mxu1 %v5630_v38 }
 0x3cf   : > { %v3147_v29 = vpop.f32.mrb[56].mxu1 }
 0x3d0   : > { %v3756_v16 = vadd.f32 %v5683_v50, %v3147_v29  ;;  %v3149_v46 = vpop.f32.mrb[57].mxu1 }
 0x3d1   : > { %v3150_v4 = vpop.f32.mrb[58].mxu1 }
 0x3d2   : > { %4093 = vtanh.f32 %v3756_v16  ;;  %v3757_v15 = vadd.f32 %v5683_v50, %v3150_v4  ;;  %v3152_v27 = vpop.f32.mrb[59].mxu1 }
 0x3d4   : > { %v4090_v42 = vpop.eup %4089  ;;  %4095 = vtanh.f32 %v3757_v15  ;;  %3362 = vmatmul.mubr.bf16.gmra.mrb[164].mxu1 %v5628_v0 }
 0x3d5   : > { %3458 = vst [vmem:[%s5695_s18] sm:$0xff] %v4090_v42  ;;  %3369 = vmatprep.mubr.bf16.mxu1 %v5640_v55 }
 0x3d6   : > { %v4092_v10 = vpop.eup %4091 }
 0x3d7   : > { %3459 = vst [vmem:[%s5695_s18 + $0x8] sm:$0xff] %v4092_v10  ;;  %v3155_v36 = vpop.f32.mrb[60].mxu1 }
 0x3d8   : > { %v3758_v30 = vadd.f32 %v5683_v50, %v3155_v36  ;;  %v3157_v43 = vpop.f32.mrb[61].mxu1 }
 0x3d9   : > { %v3158_v11 = vpop.f32.mrb[62].mxu1 }
 0x3da   : > { %4097 = vtanh.f32 %v3758_v30  ;;  %v3759_v51 = vadd.f32 %v5683_v50, %v3158_v11  ;;  %v3160_v34 = vpop.f32.mrb[63].mxu1 }
 0x3dc   : > { %v4094_v17 = vpop.eup %4093  ;;  %4099 = vtanh.f32 %v3759_v51  ;;  %3370 = vmatmul.mubr.bf16.gmra.mrb[168].mxu1 %v5638_v47 }
 0x3dd   : > { %3460 = vst [vmem:[%s5695_s18 + $0x10] sm:$0xff] %v4094_v17  ;;  %3377 = vmatprep.mubr.bf16.mxu1 %v5650_v3 }
 0x3de   : > { %v4096_v45 = vpop.eup %4095 }
 0x3df   : > { %3461 = vst [vmem:[%s5695_s18 + $0x18] sm:$0xff] %v4096_v45  ;;  %v3163_v0 = vpop.f32.mrb[64].mxu1 }
 0x3e0   : > { %v3760_v38 = vadd.f32 %v5683_v50, %v3163_v0  ;;  %v3165_v39 = vpop.f32.mrb[65].mxu1 }
 0x3e1   : > { %v3166_v1 = vpop.f32.mrb[66].mxu1 }
 0x3e2   : > { %4101 = vtanh.f32 %v3760_v38  ;;  %v3761_v52 = vadd.f32 %v5683_v50, %v3166_v1  ;;  %v3168_v60 = vpop.f32.mrb[67].mxu1 }
 0x3e4   : > { %v4098_v37 = vpop.eup %4097  ;;  %4103 = vtanh.f32 %v3761_v52  ;;  %3378 = vmatmul.mubr.bf16.gmra.mrb[172].mxu1 %v5648_v61 }
 0x3e5   : > { %3462 = vst [vmem:[%s5695_s18 + $0x20] sm:$0xff] %v4098_v37  ;;  %3385 = vmatprep.mubr.bf16.mxu1 %v5660_v8 }
 0x3e6   : > { %v4100_v59 = vpop.eup %4099 }
 0x3e7   : > { %3463 = vst [vmem:[%s5695_s18 + $0x28] sm:$0xff] %v4100_v59  ;;  %v3171_v41 = vpop.f32.mrb[68].mxu1 }
 0x3e8   : > { %v3762_v5 = vadd.f32 %v5683_v50, %v3171_v41  ;;  %v3173_v35 = vpop.f32.mrb[69].mxu1 }
 0x3e9   : > { %v3174_v47 = vpop.f32.mrb[70].mxu1 }
 0x3ea   : > { %4105 = vtanh.f32 %v3762_v5  ;;  %v3763_v55 = vadd.f32 %v5683_v50, %v3174_v47  ;;  %v3176_v40 = vpop.f32.mrb[71].mxu1 }
 0x3ec   : > { %v4102_v56 = vpop.eup %4101  ;;  %4107 = vtanh.f32 %v3763_v55  ;;  %3386 = vmatmul.mubr.bf16.gmra.mrb[176].mxu1 %v5658_v31 }
 0x3ed   : > { %3464 = vst [vmem:[%s5695_s18 + $0x30] sm:$0xff] %v4102_v56 }
 0x3ee   : > { %v4104_v2 = vpop.eup %4103 }
 0x3ef   : > { %3465 = vst [vmem:[%s5695_s18 + $0x38] sm:$0xff] %v4104_v2  ;;  %v3179_v7 = vpop.f32.mrb[72].mxu1 }
 0x3f0   : > { %v3764_v57 = vadd.f32 %v5683_v50, %v3179_v7  ;;  %v3181_v32 = vpop.f32.mrb[73].mxu1 }
 0x3f1   : > { %v3182_v12 = vpop.f32.mrb[74].mxu1 }
 0x3f2   : > { %4109 = vtanh.f32 %v3764_v57  ;;  %v3765_v9 = vadd.f32 %v5683_v50, %v3182_v12  ;;  %v3184_v58 = vpop.f32.mrb[75].mxu1 }
 0x3f4   : > { %v4106_v44 = vpop.eup %4105  ;;  %4111 = vtanh.f32 %v3765_v9 }
 0x3f5   : > { %3466 = vst [vmem:[%s5695_s18 + $0x40] sm:$0xff] %v4106_v44 }
 0x3f6   : > { %v4108_v25 = vpop.eup %4107 }
 0x3f7   : > { %3467 = vst [vmem:[%s5695_s18 + $0x48] sm:$0xff] %v4108_v25  ;;  %v3187_v6 = vpop.f32.mrb[76].mxu1 }
 0x3f8   : > { %v3766_v61 = vadd.f32 %v5683_v50, %v3187_v6  ;;  %v3189_v3 = vpop.f32.mrb[77].mxu1 }
 0x3f9   : > { %v3190_v14 = vpop.f32.mrb[78].mxu1 }
 0x3fa   : > { %4113 = vtanh.f32 %v3766_v61  ;;  %v3767_v23 = vadd.f32 %v5683_v50, %v3190_v14  ;;  %v3192_v18 = vpop.f32.mrb[79].mxu1 }
 0x3fc   : > { %v4110_v28 = vpop.eup %4109  ;;  %4115 = vtanh.f32 %v3767_v23 }
 0x3fd   : > { %3468 = vst [vmem:[%s5695_s18 + $0x50] sm:$0xff] %v4110_v28 }
 0x3fe   : > { %v4112_v53 = vpop.eup %4111 }
 0x3ff   : > { %3469 = vst [vmem:[%s5695_s18 + $0x58] sm:$0xff] %v4112_v53  ;;  %v3195_v13 = vpop.f32.mrb[80].mxu1 }
 0x400   : > { %v3768_v54 = vadd.f32 %v5683_v50, %v3195_v13  ;;  %v3197_v22 = vpop.f32.mrb[81].mxu1 }
 0x401   : > { %v3198_v49 = vpop.f32.mrb[82].mxu1 }
 0x402   : > { %4117 = vtanh.f32 %v3768_v54  ;;  %v3769_v19 = vadd.f32 %v5683_v50, %v3198_v49  ;;  %v3200_v33 = vpop.f32.mrb[83].mxu1 }
 0x404   : > { %v4114_v63 = vpop.eup %4113  ;;  %4119 = vtanh.f32 %v3769_v19 }
 0x405   : > { %3470 = vst [vmem:[%s5695_s18 + $0x60] sm:$0xff] %v4114_v63 }
 0x406   : > { %v4116_v31 = vpop.eup %4115 }
 0x407   : > { %3471 = vst [vmem:[%s5695_s18 + $0x68] sm:$0xff] %v4116_v31  ;;  %v3203_v8 = vpop.f32.mrb[84].mxu1 }
 0x408   : > { %v3770_v21 = vadd.f32 %v5683_v50, %v3203_v8  ;;  %v3205_v20 = vpop.f32.mrb[85].mxu1 }
 0x409   : > { %v3206_v24 = vpop.f32.mrb[86].mxu1 }
 0x40a   : > { %4121 = vtanh.f32 %v3770_v21  ;;  %v3771_v48 = vadd.f32 %v5683_v50, %v3206_v24  ;;  %v3208_v62 = vpop.f32.mrb[87].mxu1 }
 0x40c   : > { %v4118_v26 = vpop.eup %4117  ;;  %4123 = vtanh.f32 %v3771_v48 }
 0x40d   : > { %3472 = vst [vmem:[%s5695_s18 + $0x70] sm:$0xff] %v4118_v26 }
 0x40e   : > { %v4120_v29 = vpop.eup %4119 }
 0x40f   : > { %3473 = vst [vmem:[%s5695_s18 + $0x78] sm:$0xff] %v4120_v29  ;;  %v3211_v16 = vpop.f32.mrb[88].mxu1 }
 0x410   : > { %v3772_v46 = vadd.f32 %v5683_v50, %v3211_v16  ;;  %v3213_v4 = vpop.f32.mrb[89].mxu1 }
 0x411   : > { %v3214_v15 = vpop.f32.mrb[90].mxu1 }
 0x412   : > { %4125 = vtanh.f32 %v3772_v46  ;;  %v3773_v27 = vadd.f32 %v5683_v50, %v3214_v15  ;;  %v3216_v42 = vpop.f32.mrb[91].mxu1 }
 0x414   : > { %v4122_v10 = vpop.eup %4121  ;;  %4127 = vtanh.f32 %v3773_v27 }
 0x415   : > { %3474 = vst [vmem:[%s5695_s18 + $0x80] sm:$0xff] %v4122_v10 }
 0x416   : > { %v4124_v36 = vpop.eup %4123 }
 0x417   : > { %3475 = vst [vmem:[%s5695_s18 + $0x88] sm:$0xff] %v4124_v36  ;;  %v3219_v30 = vpop.f32.mrb[92].mxu1 }
 0x418   : > { %v3774_v43 = vadd.f32 %v5683_v50, %v3219_v30  ;;  %v3221_v11 = vpop.f32.mrb[93].mxu1 }
 0x419   : > { %v3222_v51 = vpop.f32.mrb[94].mxu1 }
 0x41a   : > { %4129 = vtanh.f32 %v3774_v43  ;;  %v3775_v34 = vadd.f32 %v5683_v50, %v3222_v51  ;;  %v3224_v17 = vpop.f32.mrb[95].mxu1 }
 0x41c   : > { %v4126_v45 = vpop.eup %4125  ;;  %4131 = vtanh.f32 %v3775_v34 }
 0x41d   : > { %3476 = vst [vmem:[%s5695_s18 + $0x90] sm:$0xff] %v4126_v45 }
 0x41e   : > { %v4128_v0 = vpop.eup %4127 }
 0x41f   : > { %3477 = vst [vmem:[%s5695_s18 + $0x98] sm:$0xff] %v4128_v0  ;;  %v3227_v38 = vpop.f32.mrb[96].mxu1 }
 0x420   : > { %v3776_v39 = vadd.f32 %v5683_v50, %v3227_v38  ;;  %v3229_v1 = vpop.f32.mrb[97].mxu1 }
 0x421   : > { %v3230_v52 = vpop.f32.mrb[98].mxu1 }
 0x422   : > { %4133 = vtanh.f32 %v3776_v39  ;;  %v3777_v60 = vadd.f32 %v5683_v50, %v3230_v52  ;;  %v3232_v37 = vpop.f32.mrb[99].mxu1 }
 0x424   : > { %v4130_v59 = vpop.eup %4129  ;;  %4135 = vtanh.f32 %v3777_v60 }
 0x425   : > { %3478 = vst [vmem:[%s5695_s18 + $0xa0] sm:$0xff] %v4130_v59 }
 0x426   : > { %v4132_v41 = vpop.eup %4131 }
 0x427   : > { %3479 = vst [vmem:[%s5695_s18 + $0xa8] sm:$0xff] %v4132_v41  ;;  %v3235_v5 = vpop.f32.mrb[100].mxu1 }
 0x428   : > { %v3778_v35 = vadd.f32 %v5683_v50, %v3235_v5  ;;  %v3237_v47 = vpop.f32.mrb[101].mxu1 }
 0x429   : > { %v3238_v55 = vpop.f32.mrb[102].mxu1 }
 0x42a   : > { %4137 = vtanh.f32 %v3778_v35  ;;  %v3779_v40 = vadd.f32 %v5683_v50, %v3238_v55  ;;  %v3240_v56 = vpop.f32.mrb[103].mxu1 }
 0x42c   : > { %v4134_v2 = vpop.eup %4133  ;;  %4139 = vtanh.f32 %v3779_v40 }
 0x42d   : > { %3480 = vst [vmem:[%s5695_s18 + $0xb0] sm:$0xff] %v4134_v2 }
 0x42e   : > { %v4136_v7 = vpop.eup %4135 }
 0x42f   : > { %3481 = vst [vmem:[%s5695_s18 + $0xb8] sm:$0xff] %v4136_v7  ;;  %v3243_v57 = vpop.f32.mrb[104].mxu1 }
 0x430   : > { %v3780_v32 = vadd.f32 %v5683_v50, %v3243_v57  ;;  %v3245_v12 = vpop.f32.mrb[105].mxu1 }
 0x431   : > { %v3246_v9 = vpop.f32.mrb[106].mxu1 }
 0x432   : > { %4141 = vtanh.f32 %v3780_v32  ;;  %v3781_v58 = vadd.f32 %v5683_v50, %v3246_v9  ;;  %v3248_v44 = vpop.f32.mrb[107].mxu1 }
 0x434   : > { %v4138_v25 = vpop.eup %4137  ;;  %4143 = vtanh.f32 %v3781_v58 }
 0x435   : > { %3482 = vst [vmem:[%s5695_s18 + $0xc0] sm:$0xff] %v4138_v25 }
 0x436   : > { %v4140_v6 = vpop.eup %4139 }
 0x437   : > { %3483 = vst [vmem:[%s5695_s18 + $0xc8] sm:$0xff] %v4140_v6  ;;  %v3251_v61 = vpop.f32.mrb[108].mxu1 }
 0x438   : > { %v3782_v3 = vadd.f32 %v5683_v50, %v3251_v61  ;;  %v3253_v14 = vpop.f32.mrb[109].mxu1 }
 0x439   : > { %v3254_v23 = vpop.f32.mrb[110].mxu1 }
 0x43a   : > { %4145 = vtanh.f32 %v3782_v3  ;;  %v3783_v18 = vadd.f32 %v5683_v50, %v3254_v23  ;;  %v3256_v28 = vpop.f32.mrb[111].mxu1 }
 0x43c   : > { %v4142_v53 = vpop.eup %4141  ;;  %4147 = vtanh.f32 %v3783_v18 }
 0x43d   : > { %3484 = vst [vmem:[%s5695_s18 + $0xd0] sm:$0xff] %v4142_v53 }
 0x43e   : > { %v4144_v13 = vpop.eup %4143 }
 0x43f   : > { %3485 = vst [vmem:[%s5695_s18 + $0xd8] sm:$0xff] %v4144_v13  ;;  %v3259_v54 = vpop.f32.mrb[112].mxu1 }
 0x440   : > { %v3784_v22 = vadd.f32 %v5683_v50, %v3259_v54  ;;  %v3261_v49 = vpop.f32.mrb[113].mxu1 }
 0x441   : > { %v3262_v19 = vpop.f32.mrb[114].mxu1 }
 0x442   : > { %4149 = vtanh.f32 %v3784_v22  ;;  %v3785_v33 = vadd.f32 %v5683_v50, %v3262_v19  ;;  %v3264_v63 = vpop.f32.mrb[115].mxu1 }
 0x444   : > { %v4146_v31 = vpop.eup %4145  ;;  %4151 = vtanh.f32 %v3785_v33 }
 0x445   : > { %3486 = vst [vmem:[%s5695_s18 + $0xe0] sm:$0xff] %v4146_v31 }
 0x446   : > { %v4148_v8 = vpop.eup %4147 }
 0x447   : > { %3487 = vst [vmem:[%s5695_s18 + $0xe8] sm:$0xff] %v4148_v8  ;;  %v3267_v21 = vpop.f32.mrb[116].mxu1 }
 0x448   : > { %v3786_v20 = vadd.f32 %v5683_v50, %v3267_v21  ;;  %v3269_v24 = vpop.f32.mrb[117].mxu1 }
 0x449   : > { %v3270_v48 = vpop.f32.mrb[118].mxu1 }
 0x44a   : > { %4153 = vtanh.f32 %v3786_v20  ;;  %v3787_v62 = vadd.f32 %v5683_v50, %v3270_v48  ;;  %v3272_v26 = vpop.f32.mrb[119].mxu1 }
 0x44c   : > { %v4150_v29 = vpop.eup %4149  ;;  %4155 = vtanh.f32 %v3787_v62 }
 0x44d   : > { %3488 = vst [vmem:[%s5695_s18 + $0xf0] sm:$0xff] %v4150_v29 }
 0x44e   : > { %v4152_v16 = vpop.eup %4151 }
 0x44f   : > { %3489 = vst [vmem:[%s5695_s18 + $0xf8] sm:$0xff] %v4152_v16  ;;  %v3275_v46 = vpop.f32.mrb[120].mxu1 }
 0x450   : > { %v3788_v4 = vadd.f32 %v5683_v50, %v3275_v46  ;;  %v3277_v15 = vpop.f32.mrb[121].mxu1 }
 0x451   : > { %v3278_v27 = vpop.f32.mrb[122].mxu1 }
 0x452   : > { %4157 = vtanh.f32 %v3788_v4  ;;  %v3789_v42 = vadd.f32 %v5683_v50, %v3278_v27  ;;  %v3280_v10 = vpop.f32.mrb[123].mxu1 }
 0x454   : > { %v4154_v36 = vpop.eup %4153  ;;  %4159 = vtanh.f32 %v3789_v42 }
 0x455   : > { %3490 = vst [vmem:[%s5695_s18 + $0x100] sm:$0xff] %v4154_v36 }
 0x456   : > { %v4156_v30 = vpop.eup %4155 }
 0x457   : > { %3491 = vst [vmem:[%s5695_s18 + $0x108] sm:$0xff] %v4156_v30  ;;  %v3283_v43 = vpop.f32.mrb[124].mxu1 }
 0x458   : > { %v3790_v11 = vadd.f32 %v5683_v50, %v3283_v43  ;;  %v3285_v51 = vpop.f32.mrb[125].mxu1 }
 0x459   : > { %v3286_v34 = vpop.f32.mrb[126].mxu1 }
 0x45a   : > { %4161 = vtanh.f32 %v3790_v11  ;;  %v3791_v17 = vadd.f32 %v5683_v50, %v3286_v34  ;;  %v3288_v45 = vpop.f32.mrb[127].mxu1 }
 0x45c   : > { %v4158_v0 = vpop.eup %4157  ;;  %4163 = vtanh.f32 %v3791_v17 }
 0x45d   : > { %3492 = vst [vmem:[%s5695_s18 + $0x110] sm:$0xff] %v4158_v0 }
 0x45e   : > { %v4160_v38 = vpop.eup %4159 }
 0x45f   : > { %3493 = vst [vmem:[%s5695_s18 + $0x118] sm:$0xff] %v4160_v38  ;;  %v3291_v39 = vpop.f32.mrb[128].mxu1 }
 0x460   : > { %v3792_v1 = vadd.f32 %v5683_v50, %v3291_v39  ;;  %v3293_v52 = vpop.f32.mrb[129].mxu1 }
 0x461   : > { %v3294_v60 = vpop.f32.mrb[130].mxu1 }
 0x462   : > { %4165 = vtanh.f32 %v3792_v1  ;;  %v3793_v37 = vadd.f32 %v5683_v50, %v3294_v60  ;;  %v3296_v59 = vpop.f32.mrb[131].mxu1 }
 0x464   : > { %v4162_v41 = vpop.eup %4161  ;;  %4167 = vtanh.f32 %v3793_v37 }
 0x465   : > { %3494 = vst [vmem:[%s5695_s18 + $0x120] sm:$0xff] %v4162_v41 }
 0x466   : > { %v4164_v5 = vpop.eup %4163 }
 0x467   : > { %3495 = vst [vmem:[%s5695_s18 + $0x128] sm:$0xff] %v4164_v5  ;;  %v3299_v35 = vpop.f32.mrb[132].mxu1 }
 0x468   : > { %v3794_v47 = vadd.f32 %v5683_v50, %v3299_v35  ;;  %v3301_v55 = vpop.f32.mrb[133].mxu1 }
 0x469   : > { %v3302_v40 = vpop.f32.mrb[134].mxu1 }
 0x46a   : > { %4169 = vtanh.f32 %v3794_v47  ;;  %v3795_v56 = vadd.f32 %v5683_v50, %v3302_v40  ;;  %v3304_v2 = vpop.f32.mrb[135].mxu1 }
 0x46c   : > { %v4166_v7 = vpop.eup %4165  ;;  %4171 = vtanh.f32 %v3795_v56 }
 0x46d   : > { %3496 = vst [vmem:[%s5695_s18 + $0x130] sm:$0xff] %v4166_v7 }
 0x46e   : > { %v4168_v57 = vpop.eup %4167 }
 0x46f   : > { %3497 = vst [vmem:[%s5695_s18 + $0x138] sm:$0xff] %v4168_v57  ;;  %v3307_v32 = vpop.f32.mrb[136].mxu1 }
 0x470   : > { %v3796_v12 = vadd.f32 %v5683_v50, %v3307_v32  ;;  %v3309_v9 = vpop.f32.mrb[137].mxu1 }
 0x471   : > { %v3310_v58 = vpop.f32.mrb[138].mxu1 }
 0x472   : > { %4173 = vtanh.f32 %v3796_v12  ;;  %v3797_v44 = vadd.f32 %v5683_v50, %v3310_v58  ;;  %v3312_v25 = vpop.f32.mrb[139].mxu1 }
 0x474   : > { %v4170_v6 = vpop.eup %4169  ;;  %4175 = vtanh.f32 %v3797_v44 }
 0x475   : > { %3498 = vst [vmem:[%s5695_s18 + $0x140] sm:$0xff] %v4170_v6 }
 0x476   : > { %v4172_v61 = vpop.eup %4171 }
 0x477   : > { %3499 = vst [vmem:[%s5695_s18 + $0x148] sm:$0xff] %v4172_v61  ;;  %v3315_v3 = vpop.f32.mrb[140].mxu1 }
 0x478   : > { %v3798_v14 = vadd.f32 %v5683_v50, %v3315_v3  ;;  %v3317_v23 = vpop.f32.mrb[141].mxu1 }
 0x479   : > { %v3318_v18 = vpop.f32.mrb[142].mxu1 }
 0x47a   : > { %4177 = vtanh.f32 %v3798_v14  ;;  %v3799_v28 = vadd.f32 %v5683_v50, %v3318_v18  ;;  %v3320_v53 = vpop.f32.mrb[143].mxu1 }
 0x47c   : > { %v4174_v13 = vpop.eup %4173  ;;  %4179 = vtanh.f32 %v3799_v28 }
 0x47d   : > { %3500 = vst [vmem:[%s5695_s18 + $0x150] sm:$0xff] %v4174_v13 }
 0x47e   : > { %v4176_v54 = vpop.eup %4175 }
 0x47f   : > { %3501 = vst [vmem:[%s5695_s18 + $0x158] sm:$0xff] %v4176_v54  ;;  %v3323_v22 = vpop.f32.mrb[144].mxu1 }
 0x480   : > { %v3800_v49 = vadd.f32 %v5683_v50, %v3323_v22  ;;  %v3325_v19 = vpop.f32.mrb[145].mxu1 }
 0x481   : > { %v3326_v33 = vpop.f32.mrb[146].mxu1 }
 0x482   : > { %4181 = vtanh.f32 %v3800_v49  ;;  %v3801_v63 = vadd.f32 %v5683_v50, %v3326_v33  ;;  %v3328_v31 = vpop.f32.mrb[147].mxu1 }
 0x484   : > { %v4178_v8 = vpop.eup %4177  ;;  %4183 = vtanh.f32 %v3801_v63 }
 0x485   : > { %3502 = vst [vmem:[%s5695_s18 + $0x160] sm:$0xff] %v4178_v8 }
 0x486   : > { %v4180_v21 = vpop.eup %4179 }
 0x487   : > { %3503 = vst [vmem:[%s5695_s18 + $0x168] sm:$0xff] %v4180_v21  ;;  %v3331_v20 = vpop.f32.mrb[148].mxu1 }
 0x488   : > { %v3802_v24 = vadd.f32 %v5683_v50, %v3331_v20  ;;  %v3333_v48 = vpop.f32.mrb[149].mxu1 }
 0x489   : > { %v3334_v62 = vpop.f32.mrb[150].mxu1 }
 0x48a   : > { %4185 = vtanh.f32 %v3802_v24  ;;  %v3803_v26 = vadd.f32 %v5683_v50, %v3334_v62  ;;  %v3336_v29 = vpop.f32.mrb[151].mxu1 }
 0x48c   : > { %v4182_v16 = vpop.eup %4181  ;;  %4187 = vtanh.f32 %v3803_v26 }
 0x48d   : > { %3504 = vst [vmem:[%s5695_s18 + $0x170] sm:$0xff] %v4182_v16 }
 0x48e   : > { %v4184_v46 = vpop.eup %4183 }
 0x48f   : > { %3505 = vst [vmem:[%s5695_s18 + $0x178] sm:$0xff] %v4184_v46  ;;  %v3339_v4 = vpop.f32.mrb[152].mxu1 }
 0x490   : > { %v3804_v15 = vadd.f32 %v5683_v50, %v3339_v4  ;;  %v3341_v27 = vpop.f32.mrb[153].mxu1 }
 0x491   : > { %v3342_v42 = vpop.f32.mrb[154].mxu1 }
 0x492   : > { %4189 = vtanh.f32 %v3804_v15  ;;  %v3805_v10 = vadd.f32 %v5683_v50, %v3342_v42  ;;  %v3344_v36 = vpop.f32.mrb[155].mxu1 }
 0x494   : > { %v4186_v30 = vpop.eup %4185  ;;  %4191 = vtanh.f32 %v3805_v10 }
 0x495   : > { %3506 = vst [vmem:[%s5695_s18 + $0x180] sm:$0xff] %v4186_v30 }
 0x496   : > { %v4188_v43 = vpop.eup %4187 }
 0x497   : > { %3507 = vst [vmem:[%s5695_s18 + $0x188] sm:$0xff] %v4188_v43  ;;  %v3347_v11 = vpop.f32.mrb[156].mxu1 }
 0x498   : > { %v3806_v51 = vadd.f32 %v5683_v50, %v3347_v11  ;;  %v3349_v34 = vpop.f32.mrb[157].mxu1 }
 0x499   : > { %v3350_v17 = vpop.f32.mrb[158].mxu1 }
 0x49a   : > { %4193 = vtanh.f32 %v3806_v51  ;;  %v3807_v45 = vadd.f32 %v5683_v50, %v3350_v17  ;;  %v3352_v0 = vpop.f32.mrb[159].mxu1 }
 0x49c   : > { %v4190_v38 = vpop.eup %4189  ;;  %4195 = vtanh.f32 %v3807_v45 }
 0x49d   : > { %3508 = vst [vmem:[%s5695_s18 + $0x190] sm:$0xff] %v4190_v38 }
 0x49e   : > { %v4192_v39 = vpop.eup %4191 }
 0x49f   : > { %3509 = vst [vmem:[%s5695_s18 + $0x198] sm:$0xff] %v4192_v39  ;;  %v3355_v1 = vpop.f32.mrb[160].mxu1 }
 0x4a0   : > { %v3808_v52 = vadd.f32 %v5683_v50, %v3355_v1  ;;  %v3357_v60 = vpop.f32.mrb[161].mxu1 }
 0x4a1   : > { %v3358_v37 = vpop.f32.mrb[162].mxu1 }
 0x4a2   : > { %4197 = vtanh.f32 %v3808_v52  ;;  %v3809_v59 = vadd.f32 %v5683_v50, %v3358_v37  ;;  %v3360_v41 = vpop.f32.mrb[163].mxu1 }
 0x4a4   : > { %v4194_v5 = vpop.eup %4193  ;;  %4199 = vtanh.f32 %v3809_v59 }
 0x4a5   : > { %3510 = vst [vmem:[%s5695_s18 + $0x1a0] sm:$0xff] %v4194_v5 }
 0x4a6   : > { %v4196_v35 = vpop.eup %4195 }
 0x4a7   : > { %3511 = vst [vmem:[%s5695_s18 + $0x1a8] sm:$0xff] %v4196_v35  ;;  %v3363_v47 = vpop.f32.mrb[164].mxu1 }
 0x4a8   : > { %v3810_v55 = vadd.f32 %v5683_v50, %v3363_v47  ;;  %v3365_v40 = vpop.f32.mrb[165].mxu1 }
 0x4a9   : > { %v3366_v56 = vpop.f32.mrb[166].mxu1 }
 0x4aa   : > { %4201 = vtanh.f32 %v3810_v55  ;;  %v3811_v2 = vadd.f32 %v5683_v50, %v3366_v56  ;;  %v3368_v7 = vpop.f32.mrb[167].mxu1 }
 0x4ac   : > { %v4198_v57 = vpop.eup %4197  ;;  %4203 = vtanh.f32 %v3811_v2 }
 0x4ad   : > { %3512 = vst [vmem:[%s5695_s18 + $0x1b0] sm:$0xff] %v4198_v57 }
 0x4ae   : > { %v4200_v32 = vpop.eup %4199 }
 0x4af   : > { %3513 = vst [vmem:[%s5695_s18 + $0x1b8] sm:$0xff] %v4200_v32  ;;  %v3371_v12 = vpop.f32.mrb[168].mxu1 }
 0x4b0   : > { %v3812_v9 = vadd.f32 %v5683_v50, %v3371_v12  ;;  %v3373_v58 = vpop.f32.mrb[169].mxu1 }
 0x4b1   : > { %v3374_v44 = vpop.f32.mrb[170].mxu1 }
 0x4b2   : > { %4205 = vtanh.f32 %v3812_v9  ;;  %v3813_v25 = vadd.f32 %v5683_v50, %v3374_v44  ;;  %v3376_v6 = vpop.f32.mrb[171].mxu1 }
 0x4b4   : > { %v4202_v61 = vpop.eup %4201  ;;  %4207 = vtanh.f32 %v3813_v25 }
 0x4b5   : > { %3514 = vst [vmem:[%s5695_s18 + $0x1c0] sm:$0xff] %v4202_v61 }
 0x4b6   : > { %v4204_v3 = vpop.eup %4203 }
 0x4b7   : > { %3515 = vst [vmem:[%s5695_s18 + $0x1c8] sm:$0xff] %v4204_v3  ;;  %v3379_v14 = vpop.f32.mrb[172].mxu1 }
 0x4b8   : > { %v3814_v23 = vadd.f32 %v5683_v50, %v3379_v14  ;;  %v3381_v18 = vpop.f32.mrb[173].mxu1 }
 0x4b9   : > { %v3382_v28 = vpop.f32.mrb[174].mxu1 }
 0x4ba   : > { %4209 = vtanh.f32 %v3814_v23  ;;  %v3815_v53 = vadd.f32 %v5683_v50, %v3382_v28  ;;  %v3384_v13 = vpop.f32.mrb[175].mxu1 }
 0x4bc   : > { %v4206_v54 = vpop.eup %4205  ;;  %4211 = vtanh.f32 %v3815_v53 }
 0x4bd   : > { %3516 = vst [vmem:[%s5695_s18 + $0x1d0] sm:$0xff] %v4206_v54 }
 0x4be   : > { %v4208_v22 = vpop.eup %4207 }
 0x4bf   : > { %3517 = vst [vmem:[%s5695_s18 + $0x1d8] sm:$0xff] %v4208_v22  ;;  %v3387_v49 = vpop.f32.mrb[176].mxu1 }
 0x4c0   : > { %v3816_v19 = vadd.f32 %v5683_v50, %v3387_v49  ;;  %v3389_v33 = vpop.f32.mrb[177].mxu1 }
 0x4c1   : > { %v3390_v63 = vpop.f32.mrb[178].mxu1 }
 0x4c2   : > { %4213 = vtanh.f32 %v3816_v19  ;;  %v3817_v31 = vadd.f32 %v5683_v50, %v3390_v63  ;;  %v3392_v8 = vpop.f32.mrb[179].mxu1 }
 0x4c4   : > { %v4210_v21 = vpop.eup %4209  ;;  %4215 = vtanh.f32 %v3817_v31 }
 0x4c5   : > { %3518 = vst [vmem:[%s5695_s18 + $0x1e0] sm:$0xff] %v4210_v21 }
 0x4c6   : > { %v4212_v20 = vpop.eup %4211 }
 0x4c7   : > { %3519 = vst [vmem:[%s5695_s18 + $0x1e8] sm:$0xff] %v4212_v20 }
 0x4cc   : > { %v4214_v24 = vpop.eup %4213 }
 0x4cd   : > { %3520 = vst [vmem:[%s5695_s18 + $0x1f0] sm:$0xff] %v4214_v24 }
 0x4ce   : > { %v4216_v48 = vpop.eup %4215 }
 0x4cf   : > { %3521 = vst [vmem:[%s5695_s18 + $0x1f8] sm:$0xff] %v4216_v48 }
 0x4d0 PF: > { %s17_s24 = sadd.s32 1, %s4223_s24  }
 0x4d1   : > { %p14_p4 = scmp.ge.s32.totalorder %s17_s24, 4  }
 0x4d3   :  { %16 = sbr.rel (!%p14_p4) target bundleno = 1 (0x1), region = 78 }

</bundles_post_ra>
